<compile_context>
chip_gen: v7x
topology: tpu7x:2x2x1
jax: 0.10.0
libtpu: 0.0.40
codegen_flags: <defaults>
</compile_context>

<pallas_src>
import functools

import jax
import jax.numpy as jnp
from jax import lax
from jax.experimental import pallas as pl
from jax.experimental.pallas import tpu as pltpu


# ---------------------------------------------------------------------------
# In-kernel helper: build the 9-tap slab for a 3x3 "same" conv (channel-first)
# ---------------------------------------------------------------------------
def _conv3x3_slab(x_f32, masks_bf, H, W):
    """x_f32: (C, HW) f32; masks_bf: (9, 1, HW) bf16 -> (9*C, HW) bf16 tap-major slab."""
    HW = H * W
    taps = []
    for dy in range(3):
        for dx in range(3):
            k = dy * 3 + dx
            s = (dy - 1) * W + (dx - 1)          # flattened source offset
            # tap[:, i] = x[:, i + s]  (zero-padded via the border mask below)
            # TODO(synk): roll in bf16 once packed-type lane rotates are verified; f32
            #             rolls are used for guaranteed lowering, cast happens right after.
            t = x_f32 if s == 0 else pltpu.roll(x_f32, (-s) % HW, axis=1)
            t = t.astype(jnp.bfloat16)
            if k != 4:                            # center tap needs no border mask
                t = t * masks_bf[k]
            taps.append(t)
    return jnp.concatenate(taps, axis=0)          # (9*C, HW) bf16


# ---------------------------------------------------------------------------
# Fused kernel (grid=(B,), one batch element per step)
# ---------------------------------------------------------------------------
def _rednet_head_kernel(x_ref, m_ref,
                        w5a_ref, s5a_ref, b5a_ref,
                        aqk_ref, cqk_ref, wv_ref, bv_ref, gamma_ref,
                        w51_ref, s51_ref, b51_ref,
                        w6_ref, b6_ref,
                        o_ref, *, H, W):
    f32 = jnp.float32
    bf16 = jnp.bfloat16
    x = x_ref[...]                                # (Cin, HW) f32
    masks = m_ref[...]                            # (9, 1, HW) bf16

    # ---- conv5a: 3x3 conv (no bias) as one deep-K matmul + folded BN + ReLU ----
    slab1 = _conv3x3_slab(x, masks, H, W)                                   # (9*Cin, HW)
    acc1 = jnp.dot(w5a_ref[...], slab1, preferred_element_type=f32)         # (Ci, HW)
    feat1 = jnp.maximum(acc1 * s5a_ref[...] + b5a_ref[...], 0.0)            # (Ci, HW) f32
    feat1_bf = feat1.astype(bf16)

    # ---- Attention_Mod (folded bilinear energy, softmax over j, gamma residual) ----
    g = jnp.dot(aqk_ref[...], feat1_bf, preferred_element_type=f32)         # (Ci, HW)
    e_bias = jnp.dot(cqk_ref[...], feat1_bf, preferred_element_type=f32)    # (1, HW)
    energy = lax.dot_general(g.astype(bf16), feat1_bf,
                             (((0,), (0,)), ((), ())),
                             preferred_element_type=f32) + e_bias           # (HW, HW)
    e_max = jnp.max(energy, axis=-1, keepdims=True)
    p = jnp.exp(energy - e_max)                                             # f32
    inv_l = pl.reciprocal(jnp.sum(p, axis=-1, keepdims=True), approx=True)  # (HW, 1)
    attn_bf = (p * inv_l).astype(bf16)                                      # (HW, HW) bf16

    v = jnp.dot(wv_ref[...], feat1_bf, preferred_element_type=f32) + bv_ref[...]  # (Ci, HW)
    ctx = lax.dot_general(v.astype(bf16), attn_bf,
                          (((1,), (1,)), ((), ())),
                          preferred_element_type=f32)                       # (Ci, HW)
    sa_feat = gamma_ref[0, 0] * ctx + feat1                                 # (Ci, HW) f32

    # ---- conv51: 3x3 conv as one deep-K matmul + folded BN + ReLU ----
    slab2 = _conv3x3_slab(sa_feat, masks, H, W)                             # (9*Ci, HW)
    acc2 = jnp.dot(w51_ref[...], slab2, preferred_element_type=f32)         # (Ci, HW)
    sa_conv = jnp.maximum(acc2 * s51_ref[...] + b51_ref[...], 0.0)

    # ---- conv6: Dropout2d (inference identity) + 1x1 conv, lane-dense (Cout, HW) ----
    out = jnp.dot(w6_ref[...], sa_conv.astype(bf16),
                  preferred_element_type=f32) + b6_ref[...]                 # (Cout, HW)
    o_ref[...] = out.astype(o_ref.dtype)


# ---------------------------------------------------------------------------
# Wrapper: host-side weight folding + single pallas_call
# ---------------------------------------------------------------------------
def rednet_head_forward(x_nchw, P, eps=1e-5):
    B, Cin, H, W = x_nchw.shape
    Ci = P["w5a"].shape[0]
    Cout = P["w6"].shape[0]
    HW = H * W
    f32 = jnp.float32
    bf16 = jnp.bfloat16

    # NCHW -> channel-first flattened (C, HW): free reshape, no transpose.
    x_cf = x_nchw.reshape(B, Cin, HW)

    # 9 multiplicative border masks (shared by conv5a and conv51).
    idx = jnp.arange(HW, dtype=jnp.int32)
    row, col = idx // W, idx % W
    masks = []
    for dy in range(3):
        for dx in range(3):
            m = jnp.ones((HW,), jnp.bool_)
            if dy == 0:
                m = m & (row >= 1)
            if dy == 2:
                m = m & (row <= H - 2)
            if dx == 0:
                m = m & (col >= 1)
            if dx == 2:
                m = m & (col <= W - 2)
            masks.append(m)
    mask9 = jnp.stack(masks).astype(bf16).reshape(9, 1, HW)

    def fold_bn(g, b, m, v):
        s = g / jnp.sqrt(v + eps)
        return s.reshape(-1, 1), (b - m * s).reshape(-1, 1)

    s5a, b5a = fold_bn(P["bn5a_g"], P["bn5a_b"], P["bn5a_m"], P["bn5a_v"])
    s51, b51 = fold_bn(P["bn51_g"], P["bn51_b"], P["bn51_m"], P["bn51_v"])

    # 3x3 weights -> (Cout, 9*Cin), tap-major (k = dy*3+dx) matching the slab rows.
    w5a_r = jnp.transpose(P["w5a"], (0, 2, 3, 1)).reshape(Ci, 9 * Cin).astype(bf16)
    w51_r = jnp.transpose(P["w51"], (0, 2, 3, 1)).reshape(Ci, 9 * Ci).astype(bf16)

    # Fold Q.K^T: energy = feat1^T (Wq^T Wk) feat1 + (Wk^T bq)^T feat1 (+ row-consts).
    wq2 = P["wq"].reshape(-1, Ci)
    wk2 = P["wk"].reshape(-1, Ci)
    a_qk = (wk2.T @ wq2).astype(bf16)                     # (Ci, Ci) == (Wq^T Wk)^T
    c_qk = (P["bq"] @ wk2).reshape(1, Ci).astype(bf16)    # (1, Ci)  == (Wk^T bq)^T
    wv2 = P["wv"].reshape(Ci, Ci).astype(bf16)
    bv = P["bv"].reshape(Ci, 1).astype(f32)
    w6_r = P["w6"].reshape(Cout, Ci).astype(bf16)
    b6 = P["b6"].reshape(Cout, 1).astype(f32)
    gamma = jnp.asarray(P["gamma"], f32).reshape(1, 1)

    kernel = functools.partial(_rednet_head_kernel, H=H, W=W)

    in_specs = [
        pl.BlockSpec((None, Cin, HW), lambda b: (b, 0, 0)),   # x (per-batch block)
        pl.BlockSpec((9, 1, HW), lambda b: (0, 0, 0)),        # border masks (bf16)
        pl.BlockSpec((Ci, 9 * Cin), lambda b: (0, 0)),        # conv5a weights (bf16)
        pl.BlockSpec((Ci, 1), lambda b: (0, 0)),              # bn5a scale
        pl.BlockSpec((Ci, 1), lambda b: (0, 0)),              # bn5a bias
        pl.BlockSpec((Ci, Ci), lambda b: (0, 0)),             # folded (Wq^T Wk)^T
        pl.BlockSpec((1, Ci), lambda b: (0, 0)),              # folded (Wk^T bq)^T
        pl.BlockSpec((Ci, Ci), lambda b: (0, 0)),             # Wv
        pl.BlockSpec((Ci, 1), lambda b: (0, 0)),              # bv
        pl.BlockSpec(memory_space=pltpu.MemorySpace.SMEM),    # gamma (scalar, SMEM)
        pl.BlockSpec((Ci, 9 * Ci), lambda b: (0, 0)),         # conv51 weights (bf16)
        pl.BlockSpec((Ci, 1), lambda b: (0, 0)),              # bn51 scale
        pl.BlockSpec((Ci, 1), lambda b: (0, 0)),              # bn51 bias
        pl.BlockSpec((Cout, Ci), lambda b: (0, 0)),           # w6
        pl.BlockSpec((Cout, 1), lambda b: (0, 0)),            # b6
    ]

    out = pl.pallas_call(
        kernel,
        out_shape=jax.ShapeDtypeStruct((B, Cout, HW), f32),
        grid_spec=pltpu.PrefetchScalarGridSpec(
            num_scalar_prefetch=0,
            grid=(B,),
            in_specs=in_specs,
            out_specs=pl.BlockSpec((None, Cout, HW), lambda b: (b, 0, 0)),
        ),
        compiler_params=pltpu.CompilerParams(dimension_semantics=("parallel",)),
    )(x_cf, mask9, w5a_r, s5a, b5a, a_qk, c_qk, wv2, bv, gamma,
      w51_r, s51, b51, w6_r, b6)

    # (B, Cout, H*W) is already the NCHW flattening -> free reshape, no transpose.
    return out.reshape(B, Cout, H, W)


# ---------------------------------------------------------------------------
# Pure-JAX reference (correctness check only)
# ---------------------------------------------------------------------------
def ref_forward(x_nchw, P, eps=1e-5):
    HI = jax.lax.Precision.HIGHEST

    def conv3x3(x, w):
        return jax.lax.conv_general_dilated(
            x, w, window_strides=(1, 1), padding=((1, 1), (1, 1)),
            dimension_numbers=("NCHW", "OIHW", "NCHW"), precision=HI)

    def bn(x, g, b, m, v):
        s = (g / jnp.sqrt(v + eps))[None, :, None, None]
        return (x - m[None, :, None, None]) * s + b[None, :, None, None]

    def conv1x1(x, w, b):
        w2 = w.reshape(w.shape[0], w.shape[1])
        return jnp.einsum("bchw,oc->bohw", x, w2, precision=HI) + b[None, :, None, None]

    feat1 = jax.nn.relu(bn(conv3x3(x_nchw, P["w5a"]),
                           P["bn5a_g"], P["bn5a_b"], P["bn5a_m"], P["bn5a_v"]))
    B, C, H, W = feat1.shape
    q = conv1x1(feat1, P["wq"], P["bq"]).reshape(B, -1, H * W)
    k = conv1x1(feat1, P["wk"], P["bk"]).reshape(B, -1, H * W)
    v = conv1x1(feat1, P["wv"], P["bv"]).reshape(B, C, H * W)
    energy = jnp.einsum("bci,bcj->bij", q, k, precision=HI)
    attn = jax.nn.softmax(energy, axis=-1)
    out = jnp.einsum("bcj,bij->bci", v, attn, precision=HI).reshape(B, C, H, W)
    sa_feat = P["gamma"] * out + feat1
    sa_conv = jax.nn.relu(bn(conv3x3(sa_feat, P["w51"]),
                             P["bn51_g"], P["bn51_b"], P["bn51_m"], P["bn51_v"]))
    return conv1x1(sa_conv, P["w6"], P["b6"])


# ---------------------------------------------------------------------------
if __name__ == "__main__":
    B, Cin, H, W = 2, 64, 16, 16
    Cout = 16
    Ci = Cin // 4          # inter_channels = 16
    Cq = Ci // 8           # query/key channels = 2

    keys = jax.random.split(jax.random.PRNGKey(0), 24)
    n = lambda i, shape, s=0.05: s * jax.random.normal(keys[i], shape, dtype=jnp.float32)

    P = {
        "w5a": n(0, (Ci, Cin, 3, 3)),
        "bn5a_g": 1.0 + n(1, (Ci,), 0.1), "bn5a_b": n(2, (Ci,), 0.1),
        "bn5a_m": n(3, (Ci,), 0.1),
        "bn5a_v": 1.0 + 0.1 * jax.random.uniform(keys[4], (Ci,), dtype=jnp.float32),
        "wq": n(5, (Cq, Ci, 1, 1), 0.1), "bq": n(6, (Cq,), 0.1),
        "wk": n(7, (Cq, Ci, 1, 1), 0.1), "bk": n(8, (Cq,), 0.1),
        "wv": n(9, (Ci, Ci, 1, 1), 0.1), "bv": n(10, (Ci,), 0.1),
        # PyTorch inits gamma=0; use a nonzero deterministic value to exercise the path.
        "gamma": jnp.float32(0.1),
        "w51": n(11, (Ci, Ci, 3, 3)),
        "bn51_g": 1.0 + n(12, (Ci,), 0.1), "bn51_b": n(13, (Ci,), 0.1),
        "bn51_m": n(14, (Ci,), 0.1),
        "bn51_v": 1.0 + 0.1 * jax.random.uniform(keys[15], (Ci,), dtype=jnp.float32),
        "w6": n(16, (Cout, Ci, 1, 1), 0.1), "b6": n(17, (Cout,), 0.05),
    }

    x = jax.random.normal(keys[23], (B, Cin, H, W), dtype=jnp.float32)

    fwd = jax.jit(rednet_head_forward)
    out = jax.block_until_ready(fwd(x, P))
    assert out.shape == (B, Cout, H, W), out.shape

    ref = ref_forward(x, P)
    max_err = float(jnp.max(jnp.abs(out - ref)))
    assert max_err < 5e-2, f"mismatch vs reference: {max_err}"

    print("KERNEL_OK")
</pallas_src>

<mosaic_0001>
module attributes {stable_mosaic.version = 11 : i64} {
  func.func @_rednet_head_kernel(%arg0: i32, %arg1: memref<1x64x256xf32, #tpu.memory_space<vmem>>, %arg2: memref<9x1x256xbf16, #tpu.memory_space<vmem>>, %arg3: memref<16x576xbf16, #tpu.memory_space<vmem>>, %arg4: memref<16x1xf32, #tpu.memory_space<vmem>>, %arg5: memref<16x1xf32, #tpu.memory_space<vmem>>, %arg6: memref<16x16xbf16, #tpu.memory_space<vmem>>, %arg7: memref<1x16xbf16, #tpu.memory_space<vmem>>, %arg8: memref<16x16xbf16, #tpu.memory_space<vmem>>, %arg9: memref<16x1xf32, #tpu.memory_space<vmem>>, %arg10: memref<1x1xf32, #tpu.memory_space<smem>>, %arg11: memref<16x144xbf16, #tpu.memory_space<vmem>>, %arg12: memref<16x1xf32, #tpu.memory_space<vmem>>, %arg13: memref<16x1xf32, #tpu.memory_space<vmem>>, %arg14: memref<16x16xbf16, #tpu.memory_space<vmem>>, %arg15: memref<16x1xf32, #tpu.memory_space<vmem>>, %arg16: memref<1x16x256xf32, #tpu.memory_space<vmem>>) attributes {dimension_semantics = [#tpu.dimension_semantics<parallel>], iteration_bounds = array<i64: 2>, scalar_prefetch = 0 : i64, scratch_operands = 0 : i64, tpu.core_type = #tpu.core_type<tc>, window_params = [{transform_indices = @transform_0, window_bounds = array<i64: 1, 64, 256>}, {pipeline_mode = #tpu.pipeline_mode<synchronous>, transform_indices = @transform_1, window_bounds = array<i64: 9, 1, 256>}, {pipeline_mode = #tpu.pipeline_mode<synchronous>, transform_indices = @transform_2, window_bounds = array<i64: 16, 576>}, {pipeline_mode = #tpu.pipeline_mode<synchronous>, transform_indices = @transform_3, window_bounds = array<i64: 16, 1>}, {pipeline_mode = #tpu.pipeline_mode<synchronous>, transform_indices = @transform_4, window_bounds = array<i64: 16, 1>}, {pipeline_mode = #tpu.pipeline_mode<synchronous>, transform_indices = @transform_5, window_bounds = array<i64: 16, 16>}, {pipeline_mode = #tpu.pipeline_mode<synchronous>, transform_indices = @transform_6, window_bounds = array<i64: 1, 16>}, {pipeline_mode = #tpu.pipeline_mode<synchronous>, transform_indices = @transform_7, window_bounds = array<i64: 16, 16>}, {pipeline_mode = #tpu.pipeline_mode<synchronous>, transform_indices = @transform_8, window_bounds = array<i64: 16, 1>}, {transform_indices = @transform_9, window_bounds = array<i64: 1, 1>}, {pipeline_mode = #tpu.pipeline_mode<synchronous>, transform_indices = @transform_10, window_bounds = array<i64: 16, 144>}, {pipeline_mode = #tpu.pipeline_mode<synchronous>, transform_indices = @transform_11, window_bounds = array<i64: 16, 1>}, {pipeline_mode = #tpu.pipeline_mode<synchronous>, transform_indices = @transform_12, window_bounds = array<i64: 16, 1>}, {pipeline_mode = #tpu.pipeline_mode<synchronous>, transform_indices = @transform_13, window_bounds = array<i64: 16, 16>}, {pipeline_mode = #tpu.pipeline_mode<synchronous>, transform_indices = @transform_14, window_bounds = array<i64: 16, 1>}, {transform_indices = @transform_15, window_bounds = array<i64: 1, 16, 256>}]} {
    %c0 = arith.constant 0 : index
    %c0_0 = arith.constant 0 : index
    %c0_1 = arith.constant 0 : index
    %0 = vector.load %arg1[%c0, %c0_0, %c0_1] : memref<1x64x256xf32, #tpu.memory_space<vmem>>, vector<1x64x256xf32>
    %1 = vector.shape_cast %0 : vector<1x64x256xf32> to vector<64x256xf32>
    %c0_2 = arith.constant 0 : index
    %c0_3 = arith.constant 0 : index
    %c0_4 = arith.constant 0 : index
    %2 = vector.load %arg2[%c0_2, %c0_3, %c0_4] : memref<9x1x256xbf16, #tpu.memory_space<vmem>>, vector<9x1x256xbf16>
    %c17_i32 = arith.constant 17 : i32
    %3 = tpu.dynamic_rotate %1 by %c17_i32 dim 1 : vector<64x256xf32>, i32 -> vector<64x256xf32>
    %4 = arith.truncf %3 : vector<64x256xf32> to vector<64x256xbf16>
    %5 = vector.extract_strided_slice %2 {offsets = [0, 0, 0], sizes = [1, 1, 256], strides = [1, 1, 1]} : vector<9x1x256xbf16> to vector<1x1x256xbf16>
    %6 = vector.shape_cast %5 : vector<1x1x256xbf16> to vector<1x256xbf16>
    %7 = vector.broadcast %6 : vector<1x256xbf16> to vector<64x256xbf16>
    %8 = arith.mulf %4, %7 : vector<64x256xbf16>
    %c16_i32 = arith.constant 16 : i32
    %9 = tpu.dynamic_rotate %1 by %c16_i32 dim 1 : vector<64x256xf32>, i32 -> vector<64x256xf32>
    %10 = arith.truncf %9 : vector<64x256xf32> to vector<64x256xbf16>
    %11 = vector.extract_strided_slice %2 {offsets = [1, 0, 0], sizes = [1, 1, 256], strides = [1, 1, 1]} : vector<9x1x256xbf16> to vector<1x1x256xbf16>
    %12 = vector.shape_cast %11 : vector<1x1x256xbf16> to vector<1x256xbf16>
    %13 = vector.broadcast %12 : vector<1x256xbf16> to vector<64x256xbf16>
    %14 = arith.mulf %10, %13 : vector<64x256xbf16>
    %c15_i32 = arith.constant 15 : i32
    %15 = tpu.dynamic_rotate %1 by %c15_i32 dim 1 : vector<64x256xf32>, i32 -> vector<64x256xf32>
    %16 = arith.truncf %15 : vector<64x256xf32> to vector<64x256xbf16>
    %17 = vector.extract_strided_slice %2 {offsets = [2, 0, 0], sizes = [1, 1, 256], strides = [1, 1, 1]} : vector<9x1x256xbf16> to vector<1x1x256xbf16>
    %18 = vector.shape_cast %17 : vector<1x1x256xbf16> to vector<1x256xbf16>
    %19 = vector.broadcast %18 : vector<1x256xbf16> to vector<64x256xbf16>
    %20 = arith.mulf %16, %19 : vector<64x256xbf16>
    %c1_i32 = arith.constant 1 : i32
    %21 = tpu.dynamic_rotate %1 by %c1_i32 dim 1 : vector<64x256xf32>, i32 -> vector<64x256xf32>
    %22 = arith.truncf %21 : vector<64x256xf32> to vector<64x256xbf16>
    %23 = vector.extract_strided_slice %2 {offsets = [3, 0, 0], sizes = [1, 1, 256], strides = [1, 1, 1]} : vector<9x1x256xbf16> to vector<1x1x256xbf16>
    %24 = vector.shape_cast %23 : vector<1x1x256xbf16> to vector<1x256xbf16>
    %25 = vector.broadcast %24 : vector<1x256xbf16> to vector<64x256xbf16>
    %26 = arith.mulf %22, %25 : vector<64x256xbf16>
    %27 = arith.truncf %1 : vector<64x256xf32> to vector<64x256xbf16>
    %c255_i32 = arith.constant 255 : i32
    %28 = tpu.dynamic_rotate %1 by %c255_i32 dim 1 : vector<64x256xf32>, i32 -> vector<64x256xf32>
    %29 = arith.truncf %28 : vector<64x256xf32> to vector<64x256xbf16>
    %30 = vector.extract_strided_slice %2 {offsets = [5, 0, 0], sizes = [1, 1, 256], strides = [1, 1, 1]} : vector<9x1x256xbf16> to vector<1x1x256xbf16>
    %31 = vector.shape_cast %30 : vector<1x1x256xbf16> to vector<1x256xbf16>
    %32 = vector.broadcast %31 : vector<1x256xbf16> to vector<64x256xbf16>
    %33 = arith.mulf %29, %32 : vector<64x256xbf16>
    %c241_i32 = arith.constant 241 : i32
    %34 = tpu.dynamic_rotate %1 by %c241_i32 dim 1 : vector<64x256xf32>, i32 -> vector<64x256xf32>
    %35 = arith.truncf %34 : vector<64x256xf32> to vector<64x256xbf16>
    %36 = vector.extract_strided_slice %2 {offsets = [6, 0, 0], sizes = [1, 1, 256], strides = [1, 1, 1]} : vector<9x1x256xbf16> to vector<1x1x256xbf16>
    %37 = vector.shape_cast %36 : vector<1x1x256xbf16> to vector<1x256xbf16>
    %38 = vector.broadcast %37 : vector<1x256xbf16> to vector<64x256xbf16>
    %39 = arith.mulf %35, %38 : vector<64x256xbf16>
    %c240_i32 = arith.constant 240 : i32
    %40 = tpu.dynamic_rotate %1 by %c240_i32 dim 1 : vector<64x256xf32>, i32 -> vector<64x256xf32>
    %41 = arith.truncf %40 : vector<64x256xf32> to vector<64x256xbf16>
    %42 = vector.extract_strided_slice %2 {offsets = [7, 0, 0], sizes = [1, 1, 256], strides = [1, 1, 1]} : vector<9x1x256xbf16> to vector<1x1x256xbf16>
    %43 = vector.shape_cast %42 : vector<1x1x256xbf16> to vector<1x256xbf16>
    %44 = vector.broadcast %43 : vector<1x256xbf16> to vector<64x256xbf16>
    %45 = arith.mulf %41, %44 : vector<64x256xbf16>
    %c239_i32 = arith.constant 239 : i32
    %46 = tpu.dynamic_rotate %1 by %c239_i32 dim 1 : vector<64x256xf32>, i32 -> vector<64x256xf32>
    %47 = arith.truncf %46 : vector<64x256xf32> to vector<64x256xbf16>
    %48 = vector.extract_strided_slice %2 {offsets = [8, 0, 0], sizes = [1, 1, 256], strides = [1, 1, 1]} : vector<9x1x256xbf16> to vector<1x1x256xbf16>
    %49 = vector.shape_cast %48 : vector<1x1x256xbf16> to vector<1x256xbf16>
    %50 = vector.broadcast %49 : vector<1x256xbf16> to vector<64x256xbf16>
    %51 = arith.mulf %47, %50 : vector<64x256xbf16>
    %52 = tpu.concatenate %8, %14, %20, %26, %27, %33, %39, %45, %51 in 0 : vector<64x256xbf16>, vector<64x256xbf16>, vector<64x256xbf16>, vector<64x256xbf16>, vector<64x256xbf16>, vector<64x256xbf16>, vector<64x256xbf16>, vector<64x256xbf16>, vector<64x256xbf16> -> vector<576x256xbf16>
    %c0_5 = arith.constant 0 : index
    %c0_6 = arith.constant 0 : index
    %53 = vector.load %arg3[%c0_5, %c0_6] : memref<16x576xbf16, #tpu.memory_space<vmem>>, vector<16x576xbf16>
    %cst = arith.constant dense<0.000000e+00> : vector<16x256xf32>
    %54 = tpu.matmul %53, %52, %cst {dimension_numbers = #tpu.dot_dimension_numbers<[1], [0], [0], [1], [0, 0, 1, 1], [], []>} : vector<16x576xbf16>, vector<576x256xbf16>, vector<16x256xf32> -> vector<16x256xf32>
    %c0_7 = arith.constant 0 : index
    %c0_8 = arith.constant 0 : index
    %55 = vector.load %arg4[%c0_7, %c0_8] : memref<16x1xf32, #tpu.memory_space<vmem>>, vector<16x1xf32>
    %56 = vector.broadcast %55 : vector<16x1xf32> to vector<16x256xf32>
    %57 = arith.mulf %54, %56 : vector<16x256xf32>
    %c0_9 = arith.constant 0 : index
    %c0_10 = arith.constant 0 : index
    %58 = vector.load %arg5[%c0_9, %c0_10] : memref<16x1xf32, #tpu.memory_space<vmem>>, vector<16x1xf32>
    %59 = vector.broadcast %58 : vector<16x1xf32> to vector<16x256xf32>
    %60 = arith.addf %57, %59 : vector<16x256xf32>
    %cst_11 = arith.constant 0.000000e+00 : f32
    %61 = vector.broadcast %cst_11 : f32 to vector<16x256xf32>
    %62 = arith.maximumf %60, %61 : vector<16x256xf32>
    %63 = arith.truncf %62 : vector<16x256xf32> to vector<16x256xbf16>
    %c0_12 = arith.constant 0 : index
    %c0_13 = arith.constant 0 : index
    %64 = vector.load %arg6[%c0_12, %c0_13] : memref<16x16xbf16, #tpu.memory_space<vmem>>, vector<16x16xbf16>
    %cst_14 = arith.constant dense<0.000000e+00> : vector<16x256xf32>
    %65 = tpu.matmul %64, %63, %cst_14 {dimension_numbers = #tpu.dot_dimension_numbers<[1], [0], [0], [1], [0, 0, 1, 1], [], []>} : vector<16x16xbf16>, vector<16x256xbf16>, vector<16x256xf32> -> vector<16x256xf32>
    %c0_15 = arith.constant 0 : index
    %c0_16 = arith.constant 0 : index
    %66 = vector.load %arg7[%c0_15, %c0_16] : memref<1x16xbf16, #tpu.memory_space<vmem>>, vector<1x16xbf16>
    %cst_17 = arith.constant dense<0.000000e+00> : vector<1x256xf32>
    %67 = tpu.matmul %66, %63, %cst_17 {dimension_numbers = #tpu.dot_dimension_numbers<[1], [0], [0], [1], [0, 0, 1, 1], [], []>} : vector<1x16xbf16>, vector<16x256xbf16>, vector<1x256xf32> -> vector<1x256xf32>
    %68 = arith.truncf %65 : vector<16x256xf32> to vector<16x256xbf16>
    %cst_18 = arith.constant dense<0.000000e+00> : vector<256x256xf32>
    %69 = tpu.matmul %68, %63, %cst_18 {dimension_numbers = #tpu.dot_dimension_numbers<[0], [0], [1], [1], [0, 1, 1, 1], [], []>} : vector<16x256xbf16>, vector<16x256xbf16>, vector<256x256xf32> -> vector<256x256xf32>
    %70 = vector.broadcast %67 : vector<1x256xf32> to vector<256x256xf32>
    %71 = arith.addf %69, %70 : vector<256x256xf32>
    %cst_19 = arith.constant dense<0xFF800000> : vector<256xf32>
    %72 = vector.multi_reduction <maximumf>, %71, %cst_19 [1] : vector<256x256xf32> to vector<256xf32>
    %73 = vector.shape_cast %72 : vector<256xf32> to vector<256x1xf32>
    %74 = vector.broadcast %73 : vector<256x1xf32> to vector<256x256xf32>
    %75 = arith.subf %71, %74 : vector<256x256xf32>
    %76 = math.exp %75 : vector<256x256xf32>
    %cst_20 = arith.constant dense<0.000000e+00> : vector<256xf32>
    %77 = vector.multi_reduction <add>, %76, %cst_20 [1] : vector<256x256xf32> to vector<256xf32>
    %78 = vector.shape_cast %77 : vector<256xf32> to vector<256x1xf32>
    %79 = tpu.reciprocal %78 {approx = true} : vector<256x1xf32> -> vector<256x1xf32>
    %80 = vector.broadcast %79 : vector<256x1xf32> to vector<256x256xf32>
    %81 = arith.mulf %76, %80 : vector<256x256xf32>
    %82 = arith.truncf %81 : vector<256x256xf32> to vector<256x256xbf16>
    %c0_21 = arith.constant 0 : index
    %c0_22 = arith.constant 0 : index
    %83 = vector.load %arg8[%c0_21, %c0_22] : memref<16x16xbf16, #tpu.memory_space<vmem>>, vector<16x16xbf16>
    %cst_23 = arith.constant dense<0.000000e+00> : vector<16x256xf32>
    %84 = tpu.matmul %83, %63, %cst_23 {dimension_numbers = #tpu.dot_dimension_numbers<[1], [0], [0], [1], [0, 0, 1, 1], [], []>} : vector<16x16xbf16>, vector<16x256xbf16>, vector<16x256xf32> -> vector<16x256xf32>
    %c0_24 = arith.constant 0 : index
    %c0_25 = arith.constant 0 : index
    %85 = vector.load %arg9[%c0_24, %c0_25] : memref<16x1xf32, #tpu.memory_space<vmem>>, vector<16x1xf32>
    %86 = vector.broadcast %85 : vector<16x1xf32> to vector<16x256xf32>
    %87 = arith.addf %84, %86 : vector<16x256xf32>
    %88 = arith.truncf %87 : vector<16x256xf32> to vector<16x256xbf16>
    %cst_26 = arith.constant dense<0.000000e+00> : vector<16x256xf32>
    %89 = tpu.matmul %88, %82, %cst_26 {dimension_numbers = #tpu.dot_dimension_numbers<[1], [1], [0], [0], [0, 0, 1, 0], [], []>} : vector<16x256xbf16>, vector<256x256xbf16>, vector<16x256xf32> -> vector<16x256xf32>
    %c0_27 = arith.constant 0 : index
    %c0_28 = arith.constant 0 : index
    %90 = memref.load %arg10[%c0_27, %c0_28] : memref<1x1xf32, #tpu.memory_space<smem>>
    %91 = vector.broadcast %90 : f32 to vector<16x256xf32>
    %92 = arith.mulf %91, %89 : vector<16x256xf32>
    %93 = arith.addf %92, %62 : vector<16x256xf32>
    %c17_i32_29 = arith.constant 17 : i32
    %94 = tpu.dynamic_rotate %93 by %c17_i32_29 dim 1 : vector<16x256xf32>, i32 -> vector<16x256xf32>
    %95 = arith.truncf %94 : vector<16x256xf32> to vector<16x256xbf16>
    %96 = vector.extract_strided_slice %2 {offsets = [0, 0, 0], sizes = [1, 1, 256], strides = [1, 1, 1]} : vector<9x1x256xbf16> to vector<1x1x256xbf16>
    %97 = vector.shape_cast %96 : vector<1x1x256xbf16> to vector<1x256xbf16>
    %98 = vector.broadcast %97 : vector<1x256xbf16> to vector<16x256xbf16>
    %99 = arith.mulf %95, %98 : vector<16x256xbf16>
    %c16_i32_30 = arith.constant 16 : i32
    %100 = tpu.dynamic_rotate %93 by %c16_i32_30 dim 1 : vector<16x256xf32>, i32 -> vector<16x256xf32>
    %101 = arith.truncf %100 : vector<16x256xf32> to vector<16x256xbf16>
    %102 = vector.extract_strided_slice %2 {offsets = [1, 0, 0], sizes = [1, 1, 256], strides = [1, 1, 1]} : vector<9x1x256xbf16> to vector<1x1x256xbf16>
    %103 = vector.shape_cast %102 : vector<1x1x256xbf16> to vector<1x256xbf16>
    %104 = vector.broadcast %103 : vector<1x256xbf16> to vector<16x256xbf16>
    %105 = arith.mulf %101, %104 : vector<16x256xbf16>
    %c15_i32_31 = arith.constant 15 : i32
    %106 = tpu.dynamic_rotate %93 by %c15_i32_31 dim 1 : vector<16x256xf32>, i32 -> vector<16x256xf32>
    %107 = arith.truncf %106 : vector<16x256xf32> to vector<16x256xbf16>
    %108 = vector.extract_strided_slice %2 {offsets = [2, 0, 0], sizes = [1, 1, 256], strides = [1, 1, 1]} : vector<9x1x256xbf16> to vector<1x1x256xbf16>
    %109 = vector.shape_cast %108 : vector<1x1x256xbf16> to vector<1x256xbf16>
    %110 = vector.broadcast %109 : vector<1x256xbf16> to vector<16x256xbf16>
    %111 = arith.mulf %107, %110 : vector<16x256xbf16>
    %c1_i32_32 = arith.constant 1 : i32
    %112 = tpu.dynamic_rotate %93 by %c1_i32_32 dim 1 : vector<16x256xf32>, i32 -> vector<16x256xf32>
    %113 = arith.truncf %112 : vector<16x256xf32> to vector<16x256xbf16>
    %114 = vector.extract_strided_slice %2 {offsets = [3, 0, 0], sizes = [1, 1, 256], strides = [1, 1, 1]} : vector<9x1x256xbf16> to vector<1x1x256xbf16>
    %115 = vector.shape_cast %114 : vector<1x1x256xbf16> to vector<1x256xbf16>
    %116 = vector.broadcast %115 : vector<1x256xbf16> to vector<16x256xbf16>
    %117 = arith.mulf %113, %116 : vector<16x256xbf16>
    %118 = arith.truncf %93 : vector<16x256xf32> to vector<16x256xbf16>
    %c255_i32_33 = arith.constant 255 : i32
    %119 = tpu.dynamic_rotate %93 by %c255_i32_33 dim 1 : vector<16x256xf32>, i32 -> vector<16x256xf32>
    %120 = arith.truncf %119 : vector<16x256xf32> to vector<16x256xbf16>
    %121 = vector.extract_strided_slice %2 {offsets = [5, 0, 0], sizes = [1, 1, 256], strides = [1, 1, 1]} : vector<9x1x256xbf16> to vector<1x1x256xbf16>
    %122 = vector.shape_cast %121 : vector<1x1x256xbf16> to vector<1x256xbf16>
    %123 = vector.broadcast %122 : vector<1x256xbf16> to vector<16x256xbf16>
    %124 = arith.mulf %120, %123 : vector<16x256xbf16>
    %c241_i32_34 = arith.constant 241 : i32
    %125 = tpu.dynamic_rotate %93 by %c241_i32_34 dim 1 : vector<16x256xf32>, i32 -> vector<16x256xf32>
    %126 = arith.truncf %125 : vector<16x256xf32> to vector<16x256xbf16>
    %127 = vector.extract_strided_slice %2 {offsets = [6, 0, 0], sizes = [1, 1, 256], strides = [1, 1, 1]} : vector<9x1x256xbf16> to vector<1x1x256xbf16>
    %128 = vector.shape_cast %127 : vector<1x1x256xbf16> to vector<1x256xbf16>
    %129 = vector.broadcast %128 : vector<1x256xbf16> to vector<16x256xbf16>
    %130 = arith.mulf %126, %129 : vector<16x256xbf16>
    %c240_i32_35 = arith.constant 240 : i32
    %131 = tpu.dynamic_rotate %93 by %c240_i32_35 dim 1 : vector<16x256xf32>, i32 -> vector<16x256xf32>
    %132 = arith.truncf %131 : vector<16x256xf32> to vector<16x256xbf16>
    %133 = vector.extract_strided_slice %2 {offsets = [7, 0, 0], sizes = [1, 1, 256], strides = [1, 1, 1]} : vector<9x1x256xbf16> to vector<1x1x256xbf16>
    %134 = vector.shape_cast %133 : vector<1x1x256xbf16> to vector<1x256xbf16>
    %135 = vector.broadcast %134 : vector<1x256xbf16> to vector<16x256xbf16>
    %136 = arith.mulf %132, %135 : vector<16x256xbf16>
    %c239_i32_36 = arith.constant 239 : i32
    %137 = tpu.dynamic_rotate %93 by %c239_i32_36 dim 1 : vector<16x256xf32>, i32 -> vector<16x256xf32>
    %138 = arith.truncf %137 : vector<16x256xf32> to vector<16x256xbf16>
    %139 = vector.extract_strided_slice %2 {offsets = [8, 0, 0], sizes = [1, 1, 256], strides = [1, 1, 1]} : vector<9x1x256xbf16> to vector<1x1x256xbf16>
    %140 = vector.shape_cast %139 : vector<1x1x256xbf16> to vector<1x256xbf16>
    %141 = vector.broadcast %140 : vector<1x256xbf16> to vector<16x256xbf16>
    %142 = arith.mulf %138, %141 : vector<16x256xbf16>
    %143 = tpu.concatenate %99, %105, %111, %117, %118, %124, %130, %136, %142 in 0 : vector<16x256xbf16>, vector<16x256xbf16>, vector<16x256xbf16>, vector<16x256xbf16>, vector<16x256xbf16>, vector<16x256xbf16>, vector<16x256xbf16>, vector<16x256xbf16>, vector<16x256xbf16> -> vector<144x256xbf16>
    %c0_37 = arith.constant 0 : index
    %c0_38 = arith.constant 0 : index
    %144 = vector.load %arg11[%c0_37, %c0_38] : memref<16x144xbf16, #tpu.memory_space<vmem>>, vector<16x144xbf16>
    %cst_39 = arith.constant dense<0.000000e+00> : vector<16x256xf32>
    %145 = tpu.matmul %144, %143, %cst_39 {dimension_numbers = #tpu.dot_dimension_numbers<[1], [0], [0], [1], [0, 0, 1, 1], [], []>} : vector<16x144xbf16>, vector<144x256xbf16>, vector<16x256xf32> -> vector<16x256xf32>
    %c0_40 = arith.constant 0 : index
    %c0_41 = arith.constant 0 : index
    %146 = vector.load %arg12[%c0_40, %c0_41] : memref<16x1xf32, #tpu.memory_space<vmem>>, vector<16x1xf32>
    %147 = vector.broadcast %146 : vector<16x1xf32> to vector<16x256xf32>
    %148 = arith.mulf %145, %147 : vector<16x256xf32>
    %c0_42 = arith.constant 0 : index
    %c0_43 = arith.constant 0 : index
    %149 = vector.load %arg13[%c0_42, %c0_43] : memref<16x1xf32, #tpu.memory_space<vmem>>, vector<16x1xf32>
    %150 = vector.broadcast %149 : vector<16x1xf32> to vector<16x256xf32>
    %151 = arith.addf %148, %150 : vector<16x256xf32>
    %cst_44 = arith.constant 0.000000e+00 : f32
    %152 = vector.broadcast %cst_44 : f32 to vector<16x256xf32>
    %153 = arith.maximumf %151, %152 : vector<16x256xf32>
    %c0_45 = arith.constant 0 : index
    %c0_46 = arith.constant 0 : index
    %154 = vector.load %arg14[%c0_45, %c0_46] : memref<16x16xbf16, #tpu.memory_space<vmem>>, vector<16x16xbf16>
    %155 = arith.truncf %153 : vector<16x256xf32> to vector<16x256xbf16>
    %cst_47 = arith.constant dense<0.000000e+00> : vector<16x256xf32>
    %156 = tpu.matmul %154, %155, %cst_47 {dimension_numbers = #tpu.dot_dimension_numbers<[1], [0], [0], [1], [0, 0, 1, 1], [], []>} : vector<16x16xbf16>, vector<16x256xbf16>, vector<16x256xf32> -> vector<16x256xf32>
    %c0_48 = arith.constant 0 : index
    %c0_49 = arith.constant 0 : index
    %157 = vector.load %arg15[%c0_48, %c0_49] : memref<16x1xf32, #tpu.memory_space<vmem>>, vector<16x1xf32>
    %158 = vector.broadcast %157 : vector<16x1xf32> to vector<16x256xf32>
    %159 = arith.addf %156, %158 : vector<16x256xf32>
    %c0_50 = arith.constant 0 : index
    %c0_51 = arith.constant 0 : index
    %c0_52 = arith.constant 0 : index
    %160 = vector.load %arg16[%c0_50, %c0_51, %c0_52] : memref<1x16x256xf32, #tpu.memory_space<vmem>>, vector<1x16x256xf32>
    %161 = vector.shape_cast %160 : vector<1x16x256xf32> to vector<16x256xf32>
    %162 = vector.shape_cast %159 : vector<16x256xf32> to vector<1x16x256xf32>
    tpu.vector_store %arg16[%c0_50, %c0_51, %c0_52], %162 {strides = array<i32>} : memref<1x16x256xf32, #tpu.memory_space<vmem>>, vector<1x16x256xf32>,
    return
  }
  func.func @transform_0(%arg0: i32) -> (i32, i32, i32) {
    %c0_i32 = arith.constant 0 : i32
    %c0_i32_0 = arith.constant 0 : i32
    %c0_i32_1 = arith.constant 0 : i32
    return %arg0, %c0_i32, %c0_i32_0 : i32, i32, i32
  }
  func.func @transform_1(%arg0: i32) -> (i32, i32, i32) {
    %c0_i32 = arith.constant 0 : i32
    %c0_i32_0 = arith.constant 0 : i32
    %c0_i32_1 = arith.constant 0 : i32
    %c0_i32_2 = arith.constant 0 : i32
    return %c0_i32, %c0_i32_0, %c0_i32_1 : i32, i32, i32
  }
  func.func @transform_2(%arg0: i32) -> (i32, i32) {
    %c0_i32 = arith.constant 0 : i32
    %c0_i32_0 = arith.constant 0 : i32
    %c0_i32_1 = arith.constant 0 : i32
    return %c0_i32, %c0_i32_0 : i32, i32
  }
  func.func @transform_3(%arg0: i32) -> (i32, i32) {
    %c0_i32 = arith.constant 0 : i32
    %c0_i32_0 = arith.constant 0 : i32
    %c0_i32_1 = arith.constant 0 : i32
    return %c0_i32, %c0_i32_0 : i32, i32
  }
  func.func @transform_4(%arg0: i32) -> (i32, i32) {
    %c0_i32 = arith.constant 0 : i32
    %c0_i32_0 = arith.constant 0 : i32
    %c0_i32_1 = arith.constant 0 : i32
    return %c0_i32, %c0_i32_0 : i32, i32
  }
  func.func @transform_5(%arg0: i32) -> (i32, i32) {
    %c0_i32 = arith.constant 0 : i32
    %c0_i32_0 = arith.constant 0 : i32
    %c0_i32_1 = arith.constant 0 : i32
    return %c0_i32, %c0_i32_0 : i32, i32
  }
  func.func @transform_6(%arg0: i32) -> (i32, i32) {
    %c0_i32 = arith.constant 0 : i32
    %c0_i32_0 = arith.constant 0 : i32
    %c0_i32_1 = arith.constant 0 : i32
    return %c0_i32, %c0_i32_0 : i32, i32
  }
  func.func @transform_7(%arg0: i32) -> (i32, i32) {
    %c0_i32 = arith.constant 0 : i32
    %c0_i32_0 = arith.constant 0 : i32
    %c0_i32_1 = arith.constant 0 : i32
    return %c0_i32, %c0_i32_0 : i32, i32
  }
  func.func @transform_8(%arg0: i32) -> (i32, i32) {
    %c0_i32 = arith.constant 0 : i32
    %c0_i32_0 = arith.constant 0 : i32
    %c0_i32_1 = arith.constant 0 : i32
    return %c0_i32, %c0_i32_0 : i32, i32
  }
  func.func @transform_9(%arg0: i32) -> (i32, i32) {
    %c0_i32 = arith.constant 0 : i32
    %c0_i32_0 = arith.constant 0 : i32
    %c0_i32_1 = arith.constant 0 : i32
    return %c0_i32, %c0_i32_0 : i32, i32
  }
  func.func @transform_10(%arg0: i32) -> (i32, i32) {
    %c0_i32 = arith.constant 0 : i32
    %c0_i32_0 = arith.constant 0 : i32
    %c0_i32_1 = arith.constant 0 : i32
    return %c0_i32, %c0_i32_0 : i32, i32
  }
  func.func @transform_11(%arg0: i32) -> (i32, i32) {
    %c0_i32 = arith.constant 0 : i32
    %c0_i32_0 = arith.constant 0 : i32
    %c0_i32_1 = arith.constant 0 : i32
    return %c0_i32, %c0_i32_0 : i32, i32
  }
  func.func @transform_12(%arg0: i32) -> (i32, i32) {
    %c0_i32 = arith.constant 0 : i32
    %c0_i32_0 = arith.constant 0 : i32
    %c0_i32_1 = arith.constant 0 : i32
    return %c0_i32, %c0_i32_0 : i32, i32
  }
  func.func @transform_13(%arg0: i32) -> (i32, i32) {
    %c0_i32 = arith.constant 0 : i32
    %c0_i32_0 = arith.constant 0 : i32
    %c0_i32_1 = arith.constant 0 : i32
    return %c0_i32, %c0_i32_0 : i32, i32
  }
  func.func @transform_14(%arg0: i32) -> (i32, i32) {
    %c0_i32 = arith.constant 0 : i32
    %c0_i32_0 = arith.constant 0 : i32
    %c0_i32_1 = arith.constant 0 : i32
    return %c0_i32, %c0_i32_0 : i32, i32
  }
  func.func @transform_15(%arg0: i32) -> (i32, i32, i32) {
    %c0_i32 = arith.constant 0 : i32
    %c0_i32_0 = arith.constant 0 : i32
    %c0_i32_1 = arith.constant 0 : i32
    return %arg0, %c0_i32, %c0_i32_0 : i32, i32, i32
  }
}

</mosaic_0001>

<bundles_post_ra>
// kernel: rednet_head_forward.1
= control target key start
LH: loop header
LB: loop body
LE: loop exit
PB: predicated region body
PF: predicated region fallthrough
CT: control target
= control target key end

     0   :  { %s3699_s20 = smov 0   ;;  %s5369_s0 = inlined_call_operand.vmem [shape: f32[2,64,256], index: 0, kind: input, shape index: {}]   ;;  %s5370_s1 = inlined_call_operand.vmem [shape: bf16[9,1,256], index: 1, kind: input, shape index: {}]   ;;  %s5371_s2 = inlined_call_operand.vmem [shape: bf16[16,576], index: 2, kind: input, shape index: {}]   ;;  %s5372_s3 = inlined_call_operand.vmem [shape: f32[16,1], index: 3, kind: input, shape index: {}]   ;;  %s5373_s4 = inlined_call_operand.vmem [shape: f32[16,1], index: 4, kind: input, shape index: {}]   ;;  %s5374_s5 = inlined_call_operand.vmem [shape: bf16[16,16], index: 5, kind: input, shape index: {}]   ;;  %s5375_s6 = inlined_call_operand.vmem [shape: bf16[1,16], index: 6, kind: input, shape index: {}]   ;;  %s5376_s7 = inlined_call_operand.vmem [shape: bf16[16,16], index: 7, kind: input, shape index: {}]   ;;  %s5377_s8 = inlined_call_operand.vmem [shape: f32[16,1], index: 8, kind: input, shape index: {}]   ;;  %s5378_s9 = inlined_call_operand.<no memory space> [shape: f32[1,1], index: 9, kind: input, shape index: {}]   ;;  %s5379_s10 = inlined_call_operand.vmem [shape: bf16[16,144], index: 10, kind: input, shape index: {}]   ;;  %s5380_s11 = inlined_call_operand.vmem [shape: f32[16,1], index: 11, kind: input, shape index: {}]   ;;  %s5381_s12 = inlined_call_operand.vmem [shape: f32[16,1], index: 12, kind: input, shape index: {}]   ;;  %s5382_s13 = inlined_call_operand.vmem [shape: bf16[16,16], index: 13, kind: input, shape index: {}]   ;;  %s5383_s14 = inlined_call_operand.vmem [shape: f32[16,1], index: 14, kind: input, shape index: {}]   ;;  %s5384_s15 = inlined_call_operand.vmem [shape: f32[2,16,256], index: 15, kind: output, shape index: {}]  }
   0x1   :  { %20 = sst [smem:[#allocation2]] %s5378_s9 }
   0x2 LB: > { %s2912_s21 = sadd.s32 4294967295, %s3604_s20   ;;  %p2916_p0 = scmp.ge.s32.totalorder %s3604_s20, 1  ;;  %s3604_s20 = sphi %s3699_s20, %s26_s20  }
   0x3   : > { %p438_p1 = scmp.lt.s32.totalorder %s3604_s20, 3 }
   0x5   : > { %p439_p2 = pnand %p2916_p0, %p438_p1 }
   0x7   : > { %442 = sbr.rel (%p439_p2) target bundleno = 2382 (0x94e), region = 80 }
   0xe   : > { %p486_p3 = scmp.lt.s32.totalorder %s2912_s21, 1  ;;  %s3606_s25 = smov 17   ;;  %v3395_v24 = vld [vmem:[%s5371_s2 + $0x4] ss:$20 sps:$4 sm:$0xff]   ;;  %v553_v27 = vlaneseq  ;;  %v3613_v28 = vmov 1966171168  }
   0xf   : > { %s3607_s26 = smov 16   ;;  %s3608_s27 = smov 15   ;;  %1414 = vmatprep.mubr.bf16.mxu0 %v3395_v24  ;;  %v590_v29 = vunpack.c.l.s4 %v3613_v28  ;;  %v2921_v32 = vld.sshfl [vmem:[%s5370_s1] sm:$0x11 pattern:$0x75316420] }
  0x10   : > { %s5547_s21 = smov (!%p486_p3, %s2912_s21), 1  ;;  %s3609_s28 = smov 1   ;;  %v593_v31 = vshrl.u32 %v553_v27, 7  ;;  %v588_v33 = vcombine.high %v2921_v32, %v2921_v32  ;;  %v3907_v37 = vand.u32 127, %v553_v27  ;;  %vm1378_vm8 = vcmask 523264  }
  0x11   : > { %s2963_s9 = sshll.u32 %s5547_s21, 7  ;;  %s3610_s16 = smov 127   ;;  %v591_v30 = vunpack.c.0.s8 %v590_v29  ;;  %v2922_v43 = vld.sshfl [vmem:[%s5370_s1 + $0x2] sm:$0x11 pattern:$0x75316420] }
  0x12   : > { %s490_s24 = scalar_lea.vmem %s5369_s0, %s2963_s9  ;;  %s3611_s17 = smov 113   ;;  %5441 = vst [vmem:[#allocation3_spill] sm:$0xff] %v3907_v37  ;;  %v3909_v40 = vsub.s32 0, %v593_v31  ;;  %vm555_vm0 = vcmp.lt.s32.totalorder %v3907_v37, 17  ;;  %v690_v47 = vcombine.high %v2922_v43, %v2922_v43  ;;  %vm657_vm1 = vcmp.lt.s32.totalorder %v3907_v37, 16 }
  0x13   : > { %v3713_v0 = vld [vmem:[%s490_s24 + $0x20] sm:$0xff]  ;;  %v3715_v1 = vld [vmem:[%s490_s24 + $0x30] sm:$0xff]  ;;  %v3725_v5 = vld [vmem:[%s490_s24 + $0x28] sm:$0xff]  ;;  %s3612_s18 = smov 112   ;;  %s3614_s19 = smov 111   ;;  %v3895_v34 = vsub.s32 %v591_v30, %v593_v31  ;;  %vm759_vm2 = vcmp.lt.s32.totalorder %v3907_v37, 15 }
  0x14   : > { %v3717_v2 = vld [vmem:[%s490_s24] sm:$0xff]  ;;  %v3721_v3 = vpack.i.bf16 %v3715_v1, %v3713_v0  ;;  %v3723_v4 = vld [vmem:[%s490_s24 + $0x10] sm:$0xff]  ;;  %v3727_v6 = vld [vmem:[%s490_s24 + $0x38] sm:$0xff]  ;;  %vm861_vm3 = vcmp.lt.s32.totalorder %v3907_v37, 1  ;;  %vm971_vm4 = vcmp.lt.s32.totalorder %v3907_v37, 127  ;;  %vm1073_vm5 = vcmp.lt.s32.totalorder %v3907_v37, 113 }
  0x15   : > { %v3731_v7 = vpack.i.bf16 %v3723_v4, %v3717_v2  ;;  %v3733_v8 = vld [vmem:[%s490_s24 + $0x8] sm:$0xff]  ;;  %v3735_v9 = vld [vmem:[%s490_s24 + $0x18] sm:$0xff]  ;;  %v3741_v10 = vpack.i.bf16 %v3727_v6, %v3725_v5  ;;  %v3753_v14 = vld [vmem:[%s490_s24 + $0x40] sm:$0xff]  ;;  %v931_v26 = vpack.c.bf16 %v3723_v4, %v3717_v2  ;;  %v602_v35 = vrot.slane %v588_v33, %v3895_v34  ;;  %s2553_s9 = sld [smem:[#allocation2]] }
  0x16   : > { %3002 = vrot.lane.b32.xlu1 %v3721_v3, %s3606_s25  ;;  %v3747_v11 = vpack.i.bf16 %v3735_v9, %v3733_v8  ;;  %v3749_v12 = vld [vmem:[%s490_s24 + $0x48] sm:$0xff]  ;;  %v3751_v13 = vld [vmem:[%s490_s24 + $0x58] sm:$0xff]  ;;  %v3755_v15 = vld [vmem:[%s490_s24 + $0x50] sm:$0xff]  ;;  %v932_v25 = vpack.c.bf16 %v3735_v9, %v3733_v8  ;;  %v595_v36 = vrot.slane %v2921_v32, %v3895_v34  ;;  %v3920_v48 = vrot.slane %v2922_v43, %v3895_v34 }
  0x17   : > { %2992 = vrot.lane.b32.xlu0 %v3731_v7, %s3606_s25  ;;  %v3761_v16 = vpack.i.bf16 %v3751_v13, %v3749_v12  ;;  %v3767_v17 = vpack.i.bf16 %v3755_v15, %v3753_v14  ;;  %v3769_v18 = vld [vmem:[%s490_s24 + $0x68] sm:$0xff]  ;;  %v3771_v19 = vld [vmem:[%s490_s24 + $0x78] sm:$0xff]  ;;  %v3773_v20 = vld [vmem:[%s490_s24 + $0x60] sm:$0xff]  ;;  %v611_v41 = vpack.i.b16 %v602_v35, %v602_v35  ;;  %v704_v31 = vrot.slane %v690_v47, %v3895_v34 }
  0x18   : > { %v3775_v21 = vld [vmem:[%s490_s24 + $0x70] sm:$0xff]  ;;  %v3781_v22 = vpack.i.bf16 %v3771_v19, %v3769_v18  ;;  %v604_v42 = vpack.i.b16 %v595_v36, %v595_v36  ;;  %v1512_v47 = vld [vmem:[%s5372_s3 + $0x8] sm:$0xff]  ;;  %vm1277_vm6 = vcmp.lt.s32.totalorder %v3907_v37, 111  ;;  %vm1175_vm7 = vcmp.lt.s32.totalorder %v3907_v37, 112 }
  0x19   : > { %v3787_v23 = vpack.i.bf16 %v3775_v21, %v3773_v20  ;;  %v3923_v52 = vrot.slane %v611_v41, %v3909_v40  ;;  %v706_v41 = vpack.i.b16 %v3920_v48, %v3920_v48  ;;  %v1511_v48 = vld [vmem:[%s5372_s3] sm:$0xff]  ;;  %v2927_v9 = vld.sshfl [vmem:[%s5370_s1 + $0xe] sm:$0x11 pattern:$0x75316420]  ;;  %vm1556_vm9 = vcmask 130048  }
  0x1a   : > { %3007 = vrot.lane.b32.xlu1 %v3741_v10, %s3606_s25  ;;  %v3926_v53 = vrot.slane %v604_v42, %v3909_v40  ;;  %v5385_v42 = vmov 0  }
  0x1b   : > { %2997 = vrot.lane.b32.xlu0 %v3747_v11, %s3606_s25  ;;  %5442 = vst [vmem:[#allocation4_spill] sm:$0xff] %v3923_v52  ;;  %1500 = vmatprep.mubr.bf16.mxu1 %v5385_v42 }
  0x1c   : > { %5443 = vst [vmem:[#allocation5_spill] sm:$0xff] %v3926_v53  ;;  %3312 = vset.pattern.permute.xlu1 %v5385_v42  ;;  %3311 = vset.pattern.permute.xlu0 %v5385_v42 }
  0x1e   : > { %3017 = vrot.lane.b32.xlu1 %v3761_v16, %s3606_s25 }
  0x1f   : > { %3012 = vrot.lane.b32.xlu0 %v3767_v17, %s3606_s25 }
  0x22   : > { %3027 = vrot.lane.b32.xlu1 %v3781_v22, %s3606_s25 }
  0x23   : > { %3022 = vrot.lane.b32.xlu0 %v3787_v23, %s3606_s25 }
  0x26   : > { %3037 = vrot.lane.b32.xlu1 %v3747_v11, %s3607_s26 }
  0x27   : > { %3032 = vrot.lane.b32.xlu0 %v3731_v7, %s3607_s26 }
  0x2a   : > { %3047 = vrot.lane.b32.xlu1 %v3741_v10, %s3607_s26 }
  0x2b   : > { %3042 = vrot.lane.b32.xlu0 %v3721_v3, %s3607_s26 }
  0x2e   : > { %3057 = vrot.lane.b32.xlu1 %v3761_v16, %s3607_s26 }
  0x2f   : > { %3052 = vrot.lane.b32.xlu0 %v3767_v17, %s3607_s26 }
  0x32   : > { %3067 = vrot.lane.b32.xlu1 %v3781_v22, %s3607_s26 }
  0x33   : > { %3062 = vrot.lane.b32.xlu0 %v3787_v23, %s3607_s26 }
  0x36   : > { %3077 = vrot.lane.b32.xlu1 %v3747_v11, %s3608_s27 }
  0x37   : > { %3072 = vrot.lane.b32.xlu0 %v3731_v7, %s3608_s27 }
  0x3a   : > { %3087 = vrot.lane.b32.xlu1 %v3741_v10, %s3608_s27 }
  0x3b   : > { %3082 = vrot.lane.b32.xlu0 %v3721_v3, %s3608_s27 }
  0x3e   : > { %3097 = vrot.lane.b32.xlu1 %v3761_v16, %s3608_s27 }
  0x3f   : > { %3092 = vrot.lane.b32.xlu0 %v3767_v17, %s3608_s27 }
  0x42   : > { %3107 = vrot.lane.b32.xlu1 %v3781_v22, %s3608_s27 }
  0x43   : > { %3102 = vrot.lane.b32.xlu0 %v3787_v23, %s3608_s27 }
  0x46   : > { %3117 = vrot.lane.b32.xlu1 %v3747_v11, %s3609_s28 }
  0x47   : > { %3112 = vrot.lane.b32.xlu0 %v3731_v7, %s3609_s28 }
  0x4a   : > { %3127 = vrot.lane.b32.xlu1 %v3741_v10, %s3609_s28 }
  0x4b   : > { %3122 = vrot.lane.b32.xlu0 %v3721_v3, %s3609_s28 }
  0x4e   : > { %3137 = vrot.lane.b32.xlu1 %v3761_v16, %s3609_s28 }
  0x4f   : > { %3132 = vrot.lane.b32.xlu0 %v3767_v17, %s3609_s28 }
  0x52   : > { %3147 = vrot.lane.b32.xlu1 %v3781_v22, %s3609_s28 }
  0x53   : > { %3142 = vrot.lane.b32.xlu0 %v3787_v23, %s3609_s28 }
  0x56   : > { %3157 = vrot.lane.b32.xlu1 %v3747_v11, %s3610_s16 }
  0x57   : > { %3152 = vrot.lane.b32.xlu0 %v3731_v7, %s3610_s16 }
  0x5a   : > { %3167 = vrot.lane.b32.xlu1 %v3741_v10, %s3610_s16 }
  0x5b   : > { %3162 = vrot.lane.b32.xlu0 %v3721_v3, %s3610_s16 }
  0x5e   : > { %3177 = vrot.lane.b32.xlu1 %v3761_v16, %s3610_s16 }
  0x5f   : > { %3172 = vrot.lane.b32.xlu0 %v3767_v17, %s3610_s16 }
  0x62   : > { %3187 = vrot.lane.b32.xlu1 %v3781_v22, %s3610_s16 }
  0x63   : > { %3182 = vrot.lane.b32.xlu0 %v3787_v23, %s3610_s16 }
  0x66   : > { %3197 = vrot.lane.b32.xlu1 %v3747_v11, %s3611_s17 }
  0x67   : > { %3192 = vrot.lane.b32.xlu0 %v3731_v7, %s3611_s17 }
  0x6a   : > { %3207 = vrot.lane.b32.xlu1 %v3741_v10, %s3611_s17 }
  0x6b   : > { %3202 = vrot.lane.b32.xlu0 %v3721_v3, %s3611_s17 }
  0x6e   : > { %3217 = vrot.lane.b32.xlu1 %v3761_v16, %s3611_s17 }
  0x6f   : > { %3212 = vrot.lane.b32.xlu0 %v3767_v17, %s3611_s17 }
  0x72   : > { %3227 = vrot.lane.b32.xlu1 %v3781_v22, %s3611_s17 }
  0x73   : > { %3222 = vrot.lane.b32.xlu0 %v3787_v23, %s3611_s17 }
  0x76   : > { %3237 = vrot.lane.b32.xlu1 %v3747_v11, %s3612_s18 }
  0x77   : > { %3232 = vrot.lane.b32.xlu0 %v3731_v7, %s3612_s18 }
  0x7a   : > { %3247 = vrot.lane.b32.xlu1 %v3747_v11, %s3614_s19 }
  0x7b   : > { %3242 = vrot.lane.b32.xlu0 %v3731_v7, %s3614_s19 }
  0x7e   : > { %3257 = vrot.lane.b32.xlu1 %v3741_v10, %s3612_s18 }
  0x7f   : > { %3252 = vrot.lane.b32.xlu0 %v3721_v3, %s3612_s18 }
  0x82   : > { %3267 = vrot.lane.b32.xlu1 %v3741_v10, %s3614_s19 }
  0x83   : > { %3262 = vrot.lane.b32.xlu0 %v3721_v3, %s3614_s19 }
  0x86   : > { %3277 = vrot.lane.b32.xlu1 %v3761_v16, %s3612_s18 }
  0x87   : > { %3272 = vrot.lane.b32.xlu0 %v3767_v17, %s3612_s18 }
  0x88   : > { %v3003_v38 = vpop.permute.xlu1 %3002 }
  0x89   : > { %v2993_v39 = vpop.permute.xlu0 %2992  ;;  %v3005_v44 = vunpack.i.h.bf16 %v3003_v38  ;;  %v3004_v45 = vunpack.i.l.bf16 %v3003_v38 }
  0x8a   : > { %3287 = vrot.lane.b32.xlu1 %v3761_v16, %s3614_s19  ;;  %v2995_v54 = vunpack.i.h.bf16 %v2993_v39  ;;  %v2994_v55 = vunpack.i.l.bf16 %v2993_v39 }
  0x8b   : > { %3282 = vrot.lane.b32.xlu0 %v3767_v17, %s3614_s19 }
  0x8c   : > { %v3008_v46 = vpop.permute.xlu1 %3007 }
  0x8d   : > { %v3010_v49 = vunpack.i.h.bf16 %v3008_v46  ;;  %v3009_v50 = vunpack.i.l.bf16 %v3008_v46  ;;  %v2998_v51 = vpop.permute.xlu0 %2997 }
  0x8e   : > { %v3000_v56 = vunpack.i.h.bf16 %v2998_v51  ;;  %v2999_v57 = vunpack.i.l.bf16 %v2998_v51  ;;  %3297 = vrot.lane.b32.xlu1 %v3781_v22, %s3612_s18 }
  0x8f   : > { %3292 = vrot.lane.b32.xlu0 %v3787_v23, %s3612_s18  ;;  %v558_v58 = vsel %vm555_vm0, %v3004_v45, %v3009_v50  ;;  %v559_v59 = vsel %vm555_vm0, %v3005_v44, %v3010_v49  ;;  %v566_v60 = vsel %vm555_vm0, %v3009_v50, %v3004_v45  ;;  %v567_v61 = vsel %vm555_vm0, %v3010_v49, %v3005_v44 }
  0x90   : > { %v3018_v62 = vpop.permute.xlu1 %3017  ;;  %v556_v63 = vsel %vm555_vm0, %v2994_v55, %v2999_v57  ;;  %v557_v3 = vsel %vm555_vm0, %v2995_v54, %v3000_v56  ;;  %v564_v7 = vsel %vm555_vm0, %v2999_v57, %v2994_v55  ;;  %v565_v10 = vsel %vm555_vm0, %v3000_v56, %v2995_v54 }
  0x91   : > { %v3020_v11 = vunpack.i.h.bf16 %v3018_v62  ;;  %v3019_v16 = vunpack.i.l.bf16 %v3018_v62  ;;  %v3013_v17 = vpop.permute.xlu0 %3012  ;;  %v573_v24 = vpack.c.bf16 %v557_v3, %v556_v63  ;;  %v572_v27 = vpack.c.bf16 %v565_v10, %v564_v7  ;;  %v1527_v63 = vld [vmem:[%s5373_s4] sm:$0xff] }
  0x92   : > { %v3015_v28 = vunpack.i.h.bf16 %v3013_v17  ;;  %v3014_v29 = vunpack.i.l.bf16 %v3013_v17  ;;  %3307 = vrot.lane.b32.xlu1 %v3781_v22, %s3614_s19  ;;  %v575_v30 = vpack.c.bf16 %v559_v59, %v558_v58  ;;  %v574_v35 = vpack.c.bf16 %v567_v61, %v566_v60 }
  0x93   : > { %3302 = vrot.lane.b32.xlu0 %v3787_v23, %s3614_s19  ;;  %v618_v32 = vmul.bf16 %v3923_v52, %v573_v24  ;;  %v617_v33 = vmul.bf16 %v3926_v53, %v572_v27  ;;  %v713_v54 = vpack.i.b16 %v704_v31, %v704_v31 }
  0x94   : > { %v3028_v36 = vpop.permute.xlu1 %3027  ;;  %v620_v38 = vmul.bf16 %v3923_v52, %v575_v30  ;;  %v560_v39 = vsel %vm555_vm0, %v3014_v29, %v3019_v16  ;;  %v561_v22 = vsel %vm555_vm0, %v3015_v28, %v3020_v11  ;;  %v568_v46 = vsel %vm555_vm0, %v3019_v16, %v3014_v29  ;;  %v1528_v16 = vld [vmem:[%s5373_s4 + $0x8] sm:$0xff] }
  0x95   : > { %1382 = vmatprep.subr.bf16.mxu0 %v618_v32  ;;  %v3030_v23 = vunpack.i.h.bf16 %v3028_v36  ;;  %v3029_v43 = vunpack.i.l.bf16 %v3028_v36  ;;  %v3023_v44 = vpop.permute.xlu0 %3022  ;;  %v577_v45 = vpack.c.bf16 %v561_v22, %v560_v39  ;;  %v569_v51 = vsel %vm555_vm0, %v3020_v11, %v3015_v28 }
  0x96   : > { %v3025_v49 = vunpack.i.h.bf16 %v3023_v44  ;;  %v3024_v50 = vunpack.i.l.bf16 %v3023_v44  ;;  %1383 = vmatpush1.bf16.msra.mxu0 %v617_v33  ;;  %v619_v55 = vmul.bf16 %v3926_v53, %v574_v35  ;;  %v576_v57 = vpack.c.bf16 %v569_v51, %v568_v46  ;;  %1520 = vperm.xlu1 %3312, %v1512_v47  }
  0x97   : > { %1384 = vmatprep.subr.bf16.mxu0 %v620_v38  ;;  %v622_v56 = vmul.bf16 %v3923_v52, %v577_v45  ;;  %1515 = vperm.xlu0 %3311, %v1511_v48   ;;  %v3995_v30 = vrot.slane %v713_v54, %v3909_v40  ;;  %v4004_v36 = vrot.slane %v706_v41, %v3909_v40  ;;  %v2923_v38 = vld.sshfl [vmem:[%s5370_s1 + $0x4] sm:$0x11 pattern:$0x75316420] }
  0x98   : > { %v3038_v58 = vpop.permute.xlu1 %3037  ;;  %v562_v59 = vsel %vm555_vm0, %v3024_v50, %v3029_v43  ;;  %v563_v60 = vsel %vm555_vm0, %v3025_v49, %v3030_v23  ;;  %v570_v61 = vsel %vm555_vm0, %v3029_v43, %v3024_v50  ;;  %v571_v62 = vsel %vm555_vm0, %v3030_v23, %v3025_v49 }
  0x99   : > { %v3040_v3 = vunpack.i.h.bf16 %v3038_v58  ;;  %v3039_v7 = vunpack.i.l.bf16 %v3038_v58  ;;  %v3033_v10 = vpop.permute.xlu0 %3032  ;;  %v579_v11 = vpack.c.bf16 %v563_v60, %v562_v59  ;;  %v621_v27 = vmul.bf16 %v3926_v53, %v576_v57  ;;  %5444 = vst [vmem:[#allocation6_spill] sm:$0xff] %v3995_v30  ;;  %5445 = vst [vmem:[#allocation7_spill] sm:$0xff] %v4004_v36 }
  0x9a   : > { %v3035_v17 = vunpack.i.h.bf16 %v3033_v10  ;;  %v3034_v24 = vunpack.i.l.bf16 %v3033_v10  ;;  %1385 = vmatpush1.bf16.msra.mxu0 %v619_v55  ;;  %v578_v28 = vpack.c.bf16 %v571_v62, %v570_v61  ;;  %1531 = vperm.xlu1 %3312, %v1527_v63   ;;  %v792_v49 = vcombine.high %v2923_v38, %v2923_v38 }
  0x9b   : > { %1386 = vmatprep.subr.bf16.mxu0 %v622_v56  ;;  %v624_v29 = vmul.bf16 %v3923_v52, %v579_v11  ;;  %1536 = vperm.xlu0 %3311, %v1528_v16  }
  0x9c   : > { %v3048_v31 = vpop.permute.xlu1 %3047  ;;  %v658_v32 = vsel %vm657_vm1, %v3034_v24, %v3039_v7  ;;  %v659_v33 = vsel %vm657_vm1, %v3035_v17, %v3040_v3  ;;  %v666_v35 = vsel %vm657_vm1, %v3039_v7, %v3034_v24  ;;  %v667_v44 = vsel %vm657_vm1, %v3040_v3, %v3035_v17 }
  0x9d   : > { %v3050_v39 = vunpack.i.h.bf16 %v3048_v31  ;;  %v3049_v22 = vunpack.i.l.bf16 %v3048_v31  ;;  %v3043_v23 = vpop.permute.xlu0 %3042  ;;  %v675_v43 = vpack.c.bf16 %v659_v33, %v658_v32  ;;  %v623_v47 = vmul.bf16 %v3926_v53, %v578_v28 }
  0x9e   : > { %v3045_v45 = vunpack.i.h.bf16 %v3043_v23  ;;  %v3044_v46 = vunpack.i.l.bf16 %v3043_v23  ;;  %1387 = vmatpush1.bf16.msra.mxu0 %v621_v27  ;;  %v674_v48 = vpack.c.bf16 %v667_v44, %v666_v35  ;;  %v806_v10 = vrot.slane %v792_v49, %v3895_v34 }
  0x9f   : > { %1388 = vmatprep.subr.bf16.mxu0 %v624_v29  ;;  %v720_v41 = vmul.bf16 %v3995_v30, %v675_v43  ;;  %v799_v27 = vrot.slane %v2923_v38, %v3895_v34 }
  0xa0   : > { %v3058_v50 = vpop.permute.xlu1 %3057  ;;  %v660_v51 = vsel %vm657_vm1, %v3044_v46, %v3049_v22  ;;  %v661_v54 = vsel %vm657_vm1, %v3045_v45, %v3050_v39  ;;  %v668_v55 = vsel %vm657_vm1, %v3049_v22, %v3044_v46  ;;  %v669_v60 = vsel %vm657_vm1, %v3050_v39, %v3045_v45 }
  0xa1   : > { %v3060_v56 = vunpack.i.h.bf16 %v3058_v50  ;;  %v3059_v57 = vunpack.i.l.bf16 %v3058_v50  ;;  %v3053_v58 = vpop.permute.xlu0 %3052  ;;  %v677_v59 = vpack.c.bf16 %v661_v54, %v660_v51  ;;  %v719_v63 = vmul.bf16 %v4004_v36, %v674_v48 }
  0xa2   : > { %v3055_v61 = vunpack.i.h.bf16 %v3053_v58  ;;  %v3054_v62 = vunpack.i.l.bf16 %v3053_v58  ;;  %1389 = vmatpush1.bf16.msra.mxu0 %v623_v47  ;;  %v676_v3 = vpack.c.bf16 %v669_v60, %v668_v55  ;;  %v815_v44 = vpack.i.b16 %v806_v10, %v806_v10  ;;  %v2924_v10 = vld.sshfl [vmem:[%s5370_s1 + $0x6] sm:$0x11 pattern:$0x75316420] }
  0xa3   : > { %1390 = vmatprep.subr.bf16.mxu0 %v720_v41  ;;  %v722_v7 = vmul.bf16 %v3995_v30, %v677_v59  ;;  %v808_v48 = vpack.i.b16 %v799_v27, %v799_v27 }
  0xa4   : > { %v3068_v11 = vpop.permute.xlu1 %3067  ;;  %v662_v16 = vsel %vm657_vm1, %v3054_v62, %v3059_v57  ;;  %v663_v17 = vsel %vm657_vm1, %v3055_v61, %v3060_v56  ;;  %v670_v24 = vsel %vm657_vm1, %v3059_v57, %v3054_v62  ;;  %v671_v33 = vsel %vm657_vm1, %v3060_v56, %v3055_v61 }
  0xa5   : > { %v3070_v28 = vunpack.i.h.bf16 %v3068_v11  ;;  %v3069_v29 = vunpack.i.l.bf16 %v3068_v11  ;;  %v3063_v31 = vpop.permute.xlu0 %3062  ;;  %v679_v32 = vpack.c.bf16 %v663_v17, %v662_v16  ;;  %v721_v22 = vmul.bf16 %v4004_v36, %v676_v3 }
  0xa6   : > { %v3065_v35 = vunpack.i.h.bf16 %v3063_v31  ;;  %v3064_v39 = vunpack.i.l.bf16 %v3063_v31  ;;  %1391 = vmatpush1.bf16.msra.mxu0 %v719_v63  ;;  %v678_v23 = vpack.c.bf16 %v671_v33, %v670_v24  ;;  %v4047_v60 = vrot.slane %v815_v44, %v3909_v40 }
  0xa7   : > { %1392 = vmatprep.subr.bf16.mxu0 %v722_v7  ;;  %v724_v43 = vmul.bf16 %v3995_v30, %v679_v32  ;;  %v4056_v7 = vrot.slane %v808_v48, %v3909_v40 }
  0xa8   : > { %v3078_v38 = vpop.permute.xlu1 %3077  ;;  %v664_v45 = vsel %vm657_vm1, %v3064_v39, %v3069_v29  ;;  %v665_v46 = vsel %vm657_vm1, %v3065_v35, %v3070_v28  ;;  %v672_v47 = vsel %vm657_vm1, %v3069_v29, %v3064_v39  ;;  %v673_v54 = vsel %vm657_vm1, %v3070_v28, %v3065_v35  ;;  %5446 = vst [vmem:[#allocation8_spill] sm:$0xff] %v4047_v60 }
  0xa9   : > { %v3080_v41 = vunpack.i.h.bf16 %v3078_v38  ;;  %v3079_v49 = vunpack.i.l.bf16 %v3078_v38  ;;  %v3073_v50 = vpop.permute.xlu0 %3072  ;;  %v681_v51 = vpack.c.bf16 %v665_v46, %v664_v45  ;;  %v723_v57 = vmul.bf16 %v4004_v36, %v678_v23  ;;  %5447 = vst [vmem:[#allocation9_spill] sm:$0xff] %v4056_v7 }
  0xaa   : > { %v3075_v55 = vunpack.i.h.bf16 %v3073_v50  ;;  %v3074_v56 = vunpack.i.l.bf16 %v3073_v50  ;;  %1393 = vmatpush1.bf16.msra.mxu0 %v721_v22  ;;  %v680_v58 = vpack.c.bf16 %v673_v54, %v672_v47  ;;  %v894_v35 = vcombine.high %v2924_v10, %v2924_v10 }
  0xab   : > { %1394 = vmatprep.subr.bf16.mxu0 %v724_v43  ;;  %v726_v59 = vmul.bf16 %v3995_v30, %v681_v51 }
  0xac   : > { %v3088_v61 = vpop.permute.xlu1 %3087  ;;  %v760_v62 = vsel %vm759_vm2, %v3074_v56, %v3079_v49  ;;  %v761_v63 = vsel %vm759_vm2, %v3075_v55, %v3080_v41  ;;  %v768_v3 = vsel %vm759_vm2, %v3079_v49, %v3074_v56  ;;  %v769_v27 = vsel %vm759_vm2, %v3080_v41, %v3075_v55 }
  0xad   : > { %v3090_v11 = vunpack.i.h.bf16 %v3088_v61  ;;  %v3089_v16 = vunpack.i.l.bf16 %v3088_v61  ;;  %v3083_v17 = vpop.permute.xlu0 %3082  ;;  %v777_v24 = vpack.c.bf16 %v761_v63, %v760_v62  ;;  %v725_v31 = vmul.bf16 %v4004_v36, %v680_v58 }
  0xae   : > { %v3085_v28 = vunpack.i.h.bf16 %v3083_v17  ;;  %v3084_v29 = vunpack.i.l.bf16 %v3083_v17  ;;  %1395 = vmatpush1.bf16.msra.mxu0 %v723_v57  ;;  %v776_v32 = vpack.c.bf16 %v769_v27, %v768_v3  ;;  %v908_v54 = vrot.slane %v894_v35, %v3895_v34 }
  0xaf   : > { %1396 = vmatprep.subr.bf16.mxu0 %v726_v59  ;;  %v822_v33 = vmul.bf16 %v4047_v60, %v777_v24  ;;  %v901_v59 = vrot.slane %v2924_v10, %v3895_v34 }
  0xb0   : > { %v3098_v39 = vpop.permute.xlu1 %3097  ;;  %v762_v22 = vsel %vm759_vm2, %v3084_v29, %v3089_v16  ;;  %v763_v23 = vsel %vm759_vm2, %v3085_v28, %v3090_v11  ;;  %v770_v43 = vsel %vm759_vm2, %v3089_v16, %v3084_v29  ;;  %v771_v47 = vsel %vm759_vm2, %v3090_v11, %v3085_v28 }
  0xb1   : > { %v3100_v44 = vunpack.i.h.bf16 %v3098_v39  ;;  %v3099_v38 = vunpack.i.l.bf16 %v3098_v39  ;;  %v3093_v45 = vpop.permute.xlu0 %3092  ;;  %v779_v46 = vpack.c.bf16 %v763_v23, %v762_v22  ;;  %v821_v49 = vmul.bf16 %v4056_v7, %v776_v32 }
  0xb2   : > { %v3095_v48 = vunpack.i.h.bf16 %v3093_v45  ;;  %v3094_v41 = vunpack.i.l.bf16 %v3093_v45  ;;  %1397 = vmatpush1.bf16.msra.mxu0 %v725_v31  ;;  %v778_v50 = vpack.c.bf16 %v771_v47, %v770_v43  ;;  %v917_v29 = vpack.i.b16 %v908_v54, %v908_v54 }
  0xb3   : > { %1398 = vmatprep.subr.bf16.mxu0 %v822_v33  ;;  %v824_v51 = vmul.bf16 %v4047_v60, %v779_v46  ;;  %v910_v35 = vpack.i.b16 %v901_v59, %v901_v59 }
  0xb4   : > { %v3108_v55 = vpop.permute.xlu1 %3107  ;;  %v764_v56 = vsel %vm759_vm2, %v3094_v41, %v3099_v38  ;;  %v765_v57 = vsel %vm759_vm2, %v3095_v48, %v3100_v44  ;;  %v772_v58 = vsel %vm759_vm2, %v3099_v38, %v3094_v41  ;;  %v773_v11 = vsel %vm759_vm2, %v3100_v44, %v3095_v48 }
  0xb5   : > { %v3110_v61 = vunpack.i.h.bf16 %v3108_v55  ;;  %v3109_v62 = vunpack.i.l.bf16 %v3108_v55  ;;  %v3103_v63 = vpop.permute.xlu0 %3102  ;;  %v781_v3 = vpack.c.bf16 %v765_v57, %v764_v56  ;;  %v823_v24 = vmul.bf16 %v4056_v7, %v778_v50 }
  0xb6   : > { %v3105_v16 = vunpack.i.h.bf16 %v3103_v63  ;;  %v3104_v17 = vunpack.i.l.bf16 %v3103_v63  ;;  %1399 = vmatpush1.bf16.msra.mxu0 %v821_v49  ;;  %v780_v27 = vpack.c.bf16 %v773_v11, %v772_v58  ;;  %v4099_v41 = vrot.slane %v917_v29, %v3909_v40 }
  0xb7   : > { %1400 = vmatprep.subr.bf16.mxu0 %v824_v51  ;;  %v826_v28 = vmul.bf16 %v4047_v60, %v781_v3  ;;  %v4108_v55 = vrot.slane %v910_v35, %v3909_v40 }
  0xb8   : > { %v3118_v10 = vpop.permute.xlu1 %3117  ;;  %v766_v31 = vsel %vm759_vm2, %v3104_v17, %v3109_v62  ;;  %v767_v32 = vsel %vm759_vm2, %v3105_v16, %v3110_v61  ;;  %v774_v33 = vsel %vm759_vm2, %v3109_v62, %v3104_v17  ;;  %v775_v44 = vsel %vm759_vm2, %v3110_v61, %v3105_v16  ;;  %5448 = vst [vmem:[#allocation10_spill] sm:$0xff] %v4099_v41 }
  0xb9   : > { %v3120_v39 = vunpack.i.h.bf16 %v3118_v10  ;;  %v3119_v22 = vunpack.i.l.bf16 %v3118_v10  ;;  %v3113_v23 = vpop.permute.xlu0 %3112  ;;  %v783_v43 = vpack.c.bf16 %v767_v32, %v766_v31  ;;  %v825_v46 = vmul.bf16 %v4056_v7, %v780_v27  ;;  %5449 = vst [vmem:[#allocation11_spill] sm:$0xff] %v4108_v55 }
  0xba   : > { %v3115_v38 = vunpack.i.h.bf16 %v3113_v23  ;;  %v3114_v45 = vunpack.i.l.bf16 %v3113_v23  ;;  %1401 = vmatpush1.bf16.msra.mxu0 %v823_v24  ;;  %v782_v47 = vpack.c.bf16 %v775_v44, %v774_v33 }
  0xbb   : > { %1402 = vmatprep.subr.bf16.mxu0 %v826_v28  ;;  %v828_v48 = vmul.bf16 %v4047_v60, %v783_v43 }
  0xbc   : > { %v3128_v49 = vpop.permute.xlu1 %3127  ;;  %v862_v50 = vsel %vm861_vm3, %v3114_v45, %v3119_v22  ;;  %v863_v51 = vsel %vm861_vm3, %v3115_v38, %v3120_v39  ;;  %v870_v54 = vsel %vm861_vm3, %v3119_v22, %v3114_v45  ;;  %v871_v61 = vsel %vm861_vm3, %v3120_v39, %v3115_v38 }
  0xbd   : > { %v3130_v56 = vunpack.i.h.bf16 %v3128_v49  ;;  %v3129_v57 = vunpack.i.l.bf16 %v3128_v49  ;;  %v3123_v58 = vpop.permute.xlu0 %3122  ;;  %v879_v59 = vpack.c.bf16 %v863_v51, %v862_v50  ;;  %v827_v3 = vmul.bf16 %v4056_v7, %v782_v47 }
  0xbe   : > { %v3125_v62 = vunpack.i.h.bf16 %v3123_v58  ;;  %v3124_v63 = vunpack.i.l.bf16 %v3123_v58  ;;  %1403 = vmatpush1.bf16.msra.mxu0 %v825_v46  ;;  %v878_v11 = vpack.c.bf16 %v871_v61, %v870_v54 }
  0xbf   : > { %1404 = vmatprep.subr.bf16.mxu0 %v828_v48  ;;  %v924_v16 = vmul.bf16 %v4099_v41, %v879_v59 }
  0xc0   : > { %v3138_v17 = vpop.permute.xlu1 %3137  ;;  %v864_v24 = vsel %vm861_vm3, %v3124_v63, %v3129_v57  ;;  %v865_v27 = vsel %vm861_vm3, %v3125_v62, %v3130_v56  ;;  %v872_v28 = vsel %vm861_vm3, %v3129_v57, %v3124_v63  ;;  %v873_v33 = vsel %vm861_vm3, %v3130_v56, %v3125_v62 }
  0xc1   : > { %v3140_v29 = vunpack.i.h.bf16 %v3138_v17  ;;  %v3139_v10 = vunpack.i.l.bf16 %v3138_v17  ;;  %v3133_v31 = vpop.permute.xlu0 %3132  ;;  %v881_v32 = vpack.c.bf16 %v865_v27, %v864_v24  ;;  %v923_v22 = vmul.bf16 %v4108_v55, %v878_v11  ;;  %v2925_v24 = vld.sshfl [vmem:[%s5370_s1 + $0xa] sm:$0x11 pattern:$0x75316420] }
  0xc2   : > { %v3135_v35 = vunpack.i.h.bf16 %v3133_v31  ;;  %v3134_v39 = vunpack.i.l.bf16 %v3133_v31  ;;  %1405 = vmatpush1.bf16.msra.mxu0 %v827_v3  ;;  %v880_v23 = vpack.c.bf16 %v873_v33, %v872_v28 }
  0xc3   : > { %1406 = vmatprep.subr.bf16.mxu0 %v924_v16  ;;  %v926_v43 = vmul.bf16 %v4099_v41, %v881_v32  ;;  %v1004_v32 = vcombine.high %v2925_v24, %v2925_v24 }
  0xc4   : > { %v3148_v44 = vpop.permute.xlu1 %3147  ;;  %v866_v38 = vsel %vm861_vm3, %v3134_v39, %v3139_v10  ;;  %v867_v45 = vsel %vm861_vm3, %v3135_v35, %v3140_v29  ;;  %v874_v46 = vsel %vm861_vm3, %v3139_v10, %v3134_v39  ;;  %v875_v51 = vsel %vm861_vm3, %v3140_v29, %v3135_v35  ;;  %v2926_v29 = vld.sshfl [vmem:[%s5370_s1 + $0xc] sm:$0x11 pattern:$0x75316420] }
  0xc5   : > { %v3150_v47 = vunpack.i.h.bf16 %v3148_v44  ;;  %v3149_v48 = vunpack.i.l.bf16 %v3148_v44  ;;  %v3143_v49 = vpop.permute.xlu0 %3142  ;;  %v883_v50 = vpack.c.bf16 %v867_v45, %v866_v38  ;;  %v925_v57 = vmul.bf16 %v4108_v55, %v880_v23  ;;  %v3393_v38 = vld [vmem:[%s5371_s2] ss:$20 sps:$4 sm:$0xff]  }
  0xc6   : > { %v3145_v54 = vunpack.i.h.bf16 %v3143_v49  ;;  %v3144_v56 = vunpack.i.l.bf16 %v3143_v49  ;;  %1407 = vmatpush1.bf16.msra.mxu0 %v923_v22  ;;  %v882_v58 = vpack.c.bf16 %v875_v51, %v874_v46  ;;  %v1106_v35 = vcombine.high %v2926_v29, %v2926_v29 }
  0xc7   : > { %1408 = vmatprep.subr.bf16.mxu0 %v926_v43  ;;  %v928_v59 = vmul.bf16 %v4099_v41, %v883_v50  ;;  %v1018_v23 = vrot.slane %v1004_v32, %v3895_v34  ;;  %v1011_v43 = vrot.slane %v2925_v24, %v3895_v34  ;;  %v934_v51 = vpack.c.bf16 %v3727_v6, %v3725_v5 }
  0xc8   : > { %v4134_v61 = vpop.permute.xlu1 %3157  ;;  %v868_v62 = vsel %vm861_vm3, %v3144_v56, %v3149_v48  ;;  %v869_v63 = vsel %vm861_vm3, %v3145_v54, %v3150_v47  ;;  %v876_v3 = vsel %vm861_vm3, %v3149_v48, %v3144_v56  ;;  %v877_v17 = vsel %vm861_vm3, %v3150_v47, %v3145_v54  ;;  %v3399_v48 = vld [vmem:[%s5371_s2 + $0xc] ss:$20 sps:$4 sm:$0xff]  }
  0xc9   : > { %v4142_v11 = vpop.permute.xlu0 %3152  ;;  %v885_v16 = vpack.c.bf16 %v869_v63, %v868_v62  ;;  %v927_v27 = vmul.bf16 %v4108_v55, %v882_v58  ;;  %v884_v28 = vpack.c.bf16 %v877_v17, %v876_v3  ;;  %v1120_v45 = vrot.slane %v1106_v35, %v3895_v34 }
  0xca   : > { %1409 = vmatpush1.bf16.msra.mxu0 %v925_v57  ;;  %v3159_v46 = vunpack.i.l.bf16 %v4134_v61  ;;  %v3154_v47 = vunpack.i.l.bf16 %v4142_v11  ;;  %v3160_v49 = vunpack.i.h.bf16 %v4134_v61  ;;  %v3155_v50 = vunpack.i.h.bf16 %v4142_v11 }
  0xcb   : > { %1410 = vmatprep.subr.bf16.mxu0 %v928_v59  ;;  %v930_v10 = vmul.bf16 %v4099_v41, %v885_v16  ;;  %v929_v39 = vmul.bf16 %v4108_v55, %v884_v28  ;;  %v1027_v56 = vpack.i.b16 %v1018_v23, %v1018_v23  ;;  %v1020_v57 = vpack.i.b16 %v1011_v43, %v1011_v43 }
  0xcc   : > { %v4154_v31 = vpop.permute.xlu1 %3167  ;;  %v1129_v59 = vpack.i.b16 %v1120_v45, %v1120_v45  ;;  %v4187_v61 = vrot.slane %v2926_v29, %v3895_v34  ;;  %v933_v5 = vpack.c.bf16 %v3715_v1, %v3713_v0  ;;  %v936_v6 = vpack.c.bf16 %v3751_v13, %v3749_v12  ;;  %v2928_v1 = vld.sshfl [vmem:[%s5370_s1 + $0x10] sm:$0x11 pattern:$0x75316420] }
  0xcd   : > { %v4156_v33 = vpop.permute.xlu0 %3162  ;;  %v3170_v62 = vunpack.i.h.bf16 %v4154_v31  ;;  %v980_v8 = vsel %vm971_vm4, %v3159_v46, %v3154_v47  ;;  %v981_v0 = vsel %vm971_vm4, %v3160_v49, %v3155_v50  ;;  %v935_v12 = vpack.c.bf16 %v3755_v15, %v3753_v14 }
  0xce   : > { %1411 = vmatpush1.bf16.msra.mxu0 %v927_v27  ;;  %v3165_v63 = vunpack.i.h.bf16 %v4156_v33  ;;  %v3164_v2 = vunpack.i.l.bf16 %v4156_v33  ;;  %v938_v13 = vpack.c.bf16 %v3771_v19, %v3769_v18  ;;  %v4220_v3 = vrot.slane %v1020_v57, %v3909_v40 }
  0xcf   : > { %1412 = vmatprep.subr.bf16.mxu0 %v930_v10  ;;  %v937_v16 = vpack.c.bf16 %v3775_v21, %v3773_v20  ;;  %v4227_v17 = vrot.slane %v1129_v59, %v3909_v40  ;;  %v1122_v14 = vpack.i.b16 %v4187_v61, %v4187_v61  ;;  %v1208_v15 = vcombine.high %v2927_v9, %v2927_v9 }
  0xd0   : > { %v4159_v22 = vpop.permute.xlu1 %3177  ;;  %5451 = vst [vmem:[#allocation13_spill] sm:$0xff] %v4220_v3  ;;  %v973_v18 = vsel %vm971_vm4, %v3155_v50, %v3160_v49  ;;  %v972_v19 = vsel %vm971_vm4, %v3154_v47, %v3159_v46  ;;  %v989_v24 = vpack.c.bf16 %v981_v0, %v980_v8  ;;  %v1310_v27 = vcombine.high %v2928_v1, %v2928_v1 }
  0xd1   : > { %v4163_v44 = vpop.permute.xlu0 %3172  ;;  %5452 = vst [vmem:[#allocation14_spill] sm:$0xff] %v4227_v17  ;;  %v975_v28 = vsel %vm971_vm4, %v3165_v63, %v3170_v62  ;;  %v3180_v21 = vunpack.i.h.bf16 %v4159_v22  ;;  %v3179_v10 = vunpack.i.l.bf16 %v4159_v22  ;;  %v983_v35 = vsel %vm971_vm4, %v3170_v62, %v3165_v63 }
  0xd2   : > { %1413 = vmatpush1.bf16.msra.mxu0 %v929_v39  ;;  %v3174_v32 = vunpack.i.l.bf16 %v4163_v44  ;;  %v1324_v22 = vrot.slane %v1310_v27, %v3895_v34  ;;  %v4259_v46 = vrot.slane %v1208_v15, %v3895_v34  ;;  %v4262_v47 = vrot.slane %v2927_v9, %v3895_v34 }
  0xd3   : > { %1425 = vmatprep.subr.bf16.mxu0 %v932_v25  ;;  %v3169_v25 = vunpack.i.l.bf16 %v4154_v31  ;;  %v3175_v31 = vunpack.i.h.bf16 %v4163_v44  ;;  %v1317_v44 = vrot.slane %v2928_v1, %v3895_v34 }
  0xd4   : > { %v4182_v54 = vpop.permute.xlu1 %3187  ;;  %v1333_v0 = vpack.i.b16 %v1324_v22, %v1324_v22  ;;  %v1231_v1 = vpack.i.b16 %v4259_v46, %v4259_v46 }
  0xd5   : > { %v4184_v58 = vpop.permute.xlu0 %3182  ;;  %1415 = vmatmul.mubr.bf16.vlgmr.msra.gmra.mrb[0].mxu0 %v3393_v38  ;;  %v974_v20 = vsel %vm971_vm4, %v3164_v2, %v3169_v25  ;;  %v982_v29 = vsel %vm971_vm4, %v3169_v25, %v3164_v2  ;;  %v3190_v39 = vunpack.i.h.bf16 %v4182_v54  ;;  %v3189_v23 = vunpack.i.l.bf16 %v4182_v54 }
  0xd6   : > { %1426 = vmatpush1.bf16.msra.mxu0 %v931_v26  ;;  %1457 = vmatprep.mubr.bf16.mxu0 %v3399_v48  ;;  %v4217_v26 = vrot.slane %v1027_v56, %v3909_v40  ;;  %v3185_v43 = vunpack.i.h.bf16 %v4184_v58  ;;  %v3184_v38 = vunpack.i.l.bf16 %v4184_v58  ;;  %v988_v48 = vpack.c.bf16 %v973_v18, %v972_v19 }
  0xd7   : > { %1427 = vmatprep.subr.bf16.mxu0 %v934_v51  ;;  %v990_v49 = vpack.c.bf16 %v975_v28, %v974_v20  ;;  %v991_v51 = vpack.c.bf16 %v983_v35, %v982_v29  ;;  %v977_v54 = vsel %vm971_vm4, %v3175_v31, %v3180_v21  ;;  %v976_v56 = vsel %vm971_vm4, %v3174_v32, %v3179_v10 }
  0xd8   : > { %v4210_v4 = vpop.permute.xlu1 %3197  ;;  %5450 = vst [vmem:[#allocation12_spill] sm:$0xff] %v4217_v26  ;;  %v1034_v50 = vmul.bf16 %v4217_v26, %v989_v24  ;;  %v984_v58 = vsel %vm971_vm4, %v3179_v10, %v3174_v32  ;;  %v985_v34 = vsel %vm971_vm4, %v3180_v21, %v3175_v31  ;;  %v979_v59 = vsel %vm971_vm4, %v3185_v43, %v3190_v39 }
  0xd9   : > { %v4222_v11 = vpop.permute.xlu0 %3192  ;;  %v978_v61 = vsel %vm971_vm4, %v3184_v38, %v3189_v23  ;;  %v3200_v62 = vunpack.i.h.bf16 %v4210_v4  ;;  %v3199_v8 = vunpack.i.l.bf16 %v4210_v4  ;;  %v987_v63 = vsel %vm971_vm4, %v3190_v39, %v3185_v43 }
  0xda   : > { %1428 = vmatpush1.bf16.msra.mxu0 %v933_v5  ;;  %v3195_v9 = vunpack.i.h.bf16 %v4222_v11  ;;  %v3194_v25 = vunpack.i.l.bf16 %v4222_v11  ;;  %v4290_v2 = vrot.slane %v1122_v14, %v3909_v40  ;;  %v1036_v11 = vmul.bf16 %v4217_v26, %v991_v51 }
  0xdb   : > { %1429 = vmatprep.subr.bf16.mxu0 %v936_v6  ;;  %v986_v6 = vsel %vm971_vm4, %v3189_v23, %v3184_v38  ;;  %v1326_v15 = vpack.i.b16 %v1317_v44, %v1317_v44  ;;  %v992_v18 = vpack.c.bf16 %v977_v54, %v976_v56  ;;  %v994_v19 = vpack.c.bf16 %v979_v59, %v978_v61 }
  0xdc   : > { %v4246_v33 = vpop.permute.xlu1 %3207  ;;  %5453 = vst [vmem:[#allocation15_spill] sm:$0xff] %v4290_v2  ;;  %v993_v24 = vpack.c.bf16 %v985_v34, %v984_v58  ;;  %v995_v27 = vpack.c.bf16 %v987_v63, %v986_v6  ;;  %v4306_v28 = vsel %vm1073_vm5, %v3195_v9, %v3200_v62  ;;  %v4310_v20 = vsel %vm1073_vm5, %v3194_v25, %v3199_v8 }
  0xdd   : > { %v4254_v45 = vpop.permute.xlu0 %3202  ;;  %v3210_v21 = vunpack.i.h.bf16 %v4246_v33  ;;  %v1082_v29 = vsel %vm1073_vm5, %v3199_v8, %v3194_v25  ;;  %v3209_v10 = vunpack.i.l.bf16 %v4246_v33  ;;  %v1083_v35 = vsel %vm1073_vm5, %v3200_v62, %v3195_v9 }
  0xde   : > { %1430 = vmatpush1.bf16.msra.mxu0 %v935_v12  ;;  %v1224_v12 = vpack.i.b16 %v4262_v47, %v4262_v47  ;;  %v3205_v31 = vunpack.i.h.bf16 %v4254_v45  ;;  %v3204_v32 = vunpack.i.l.bf16 %v4254_v45  ;;  %v1038_v33 = vmul.bf16 %v4217_v26, %v993_v24 }
  0xdf   : > { %1431 = vmatprep.subr.bf16.mxu0 %v938_v13  ;;  %v1033_v13 = vmul.bf16 %v4220_v3, %v988_v48  ;;  %v1037_v45 = vmul.bf16 %v4220_v3, %v992_v18  ;;  %v4331_v48 = vrot.slane %v1333_v0, %v3909_v40  ;;  %v1040_v51 = vmul.bf16 %v4217_v26, %v995_v27 }
  0xe0   : > { %v4269_v57 = vpop.permute.xlu1 %3217  ;;  %v1039_v54 = vmul.bf16 %v4220_v3, %v994_v19  ;;  %v1091_v56 = vpack.c.bf16 %v1083_v35, %v1082_v29  ;;  %v1076_v58 = vsel %vm1073_vm5, %v3204_v32, %v3209_v10  ;;  %v1084_v34 = vsel %vm1073_vm5, %v3209_v10, %v3204_v32 }
  0xe1   : > { %v4280_v5 = vpop.permute.xlu0 %3212  ;;  %v3220_v39 = vunpack.i.h.bf16 %v4269_v57  ;;  %v3219_v23 = vunpack.i.l.bf16 %v4269_v57  ;;  %5454 = vst [vmem:[#allocation16_spill] sm:$0xff] %v4331_v48  ;;  %v1077_v57 = vsel %vm1073_vm5, %v3205_v31, %v3210_v21  ;;  %v1085_v59 = vsel %vm1073_vm5, %v3210_v21, %v3205_v31 }
  0xe2   : > { %1432 = vmatpush1.bf16.msra.mxu0 %v937_v16  ;;  %v1035_v16 = vmul.bf16 %v4220_v3, %v990_v49  ;;  %v3215_v43 = vunpack.i.h.bf16 %v4280_v5  ;;  %v3214_v38 = vunpack.i.l.bf16 %v4280_v5  ;;  %v4334_v49 = vrot.slane %v1326_v15, %v3909_v40 }
  0xe3   : > { %1433 = vmatprep.subr.bf16.mxu0 %v1034_v50  ;;  %v1090_v50 = vpack.c.bf16 %v4306_v28, %v4310_v20  ;;  %v1093_v24 = vpack.c.bf16 %v1085_v59, %v1084_v34  ;;  %v4399_v59 = vrot.slane %v1231_v1, %v3909_v40 }
  0xe4   : > { %v4296_v4 = vpop.permute.xlu1 %3227  ;;  %5455 = vst [vmem:[#allocation17_spill] sm:$0xff] %v4334_v49  ;;  %v1086_v6 = vsel %vm1073_vm5, %v3219_v23, %v3214_v38  ;;  %v1087_v8 = vsel %vm1073_vm5, %v3220_v39, %v3215_v43  ;;  %v4360_v18 = vsel %vm1073_vm5, %v3215_v43, %v3220_v39  ;;  %v4364_v19 = vsel %vm1073_vm5, %v3214_v38, %v3219_v23 }
  0xe5   : > { %v4301_v14 = vpop.permute.xlu0 %3222  ;;  %v3230_v61 = vunpack.i.h.bf16 %v4296_v4  ;;  %v3229_v62 = vunpack.i.l.bf16 %v4296_v4  ;;  %v1136_v4 = vmul.bf16 %v4227_v17, %v1091_v56  ;;  %v1135_v34 = vmul.bf16 %v4290_v2, %v1090_v50  ;;  %5456 = vst [vmem:[#allocation18_spill] sm:$0xff] %v4399_v59 }
  0xe6   : > { %1434 = vmatpush1.bf16.msra.mxu0 %v1033_v13  ;;  %v3225_v9 = vunpack.i.h.bf16 %v4301_v14  ;;  %v3224_v25 = vunpack.i.l.bf16 %v4301_v14  ;;  %v1095_v14 = vpack.c.bf16 %v1087_v8, %v1086_v6 }
  0xe7   : > { %1435 = vmatprep.subr.bf16.mxu0 %v1036_v11  ;;  %v1092_v11 = vpack.c.bf16 %v1077_v57, %v1076_v58 }
  0xe8   : > { %v4324_v22 = vpop.permute.xlu1 %3237  ;;  %v1081_v10 = vsel %vm1073_vm5, %v3225_v9, %v3230_v61  ;;  %v1080_v31 = vsel %vm1073_vm5, %v3224_v25, %v3229_v62  ;;  %v1088_v38 = vsel %vm1073_vm5, %v3229_v62, %v3224_v25  ;;  %v1140_v6 = vmul.bf16 %v4227_v17, %v1095_v14 }
  0xe9   : > { %v4326_v44 = vpop.permute.xlu0 %3232  ;;  %v3240_v23 = vunpack.i.h.bf16 %v4324_v22  ;;  %v3239_v43 = vunpack.i.l.bf16 %v4324_v22  ;;  %v1138_v22 = vmul.bf16 %v4227_v17, %v1093_v24  ;;  %v1096_v50 = vpack.c.bf16 %v1081_v10, %v1080_v31 }
  0xea   : > { %1436 = vmatpush1.bf16.msra.mxu0 %v1035_v16 }
  0xeb   : > { %1437 = vmatprep.subr.bf16.mxu0 %v1038_v33  ;;  %v1089_v33 = vsel %vm1073_vm5, %v3230_v61, %v3225_v9 }
  0xec   : > { %v3248_v5 = vpop.permute.xlu1 %3247  ;;  %v1097_v25 = vpack.c.bf16 %v1089_v33, %v1088_v38  ;;  %v1141_v33 = vmul.bf16 %v4290_v2, %v1096_v50 }
  0xed   : > { %v3250_v63 = vunpack.i.h.bf16 %v3248_v5  ;;  %v3249_v0 = vunpack.i.l.bf16 %v3248_v5  ;;  %v3243_v13 = vpop.permute.xlu0 %3242 }
  0xee   : > { %v3245_v16 = vunpack.i.h.bf16 %v3243_v13  ;;  %v3244_v15 = vunpack.i.l.bf16 %v3243_v13  ;;  %1438 = vmatpush1.bf16.msra.mxu0 %v1037_v45  ;;  %v3235_v45 = vunpack.i.h.bf16 %v4326_v44  ;;  %v1142_v38 = vmul.bf16 %v4227_v17, %v1097_v25 }
  0xef   : > { %1439 = vmatprep.subr.bf16.mxu0 %v1040_v51  ;;  %v3234_v51 = vunpack.i.l.bf16 %v4326_v44  ;;  %v1094_v44 = vpack.c.bf16 %v4360_v18, %v4364_v19 }
  0xf0   : > { %v4366_v27 = vpop.permute.xlu1 %3257  ;;  %v1286_v28 = vsel %vm1277_vm6, %v3249_v0, %v3244_v15  ;;  %v1287_v20 = vsel %vm1277_vm6, %v3250_v63, %v3245_v16  ;;  %v1278_v21 = vsel %vm1277_vm6, %v3244_v15, %v3249_v0  ;;  %v1279_v29 = vsel %vm1277_vm6, %v3245_v16, %v3250_v63 }
  0xf1   : > { %v4380_v32 = vpop.permute.xlu0 %3252  ;;  %v1295_v35 = vpack.c.bf16 %v1287_v20, %v1286_v28  ;;  %v1294_v39 = vpack.c.bf16 %v1279_v29, %v1278_v21  ;;  %v4406_v46 = vsel %vm1175_vm7, %v3235_v45, %v3240_v23  ;;  %v4410_v1 = vsel %vm1175_vm7, %v3234_v51, %v3239_v43 }
  0xf2   : > { %1440 = vmatpush1.bf16.msra.mxu0 %v1039_v54  ;;  %v1137_v54 = vmul.bf16 %v4290_v2, %v1092_v11  ;;  %v1184_v63 = vsel %vm1175_vm7, %v3239_v43, %v3234_v51  ;;  %v1185_v0 = vsel %vm1175_vm7, %v3240_v23, %v3235_v45  ;;  %v3260_v18 = vunpack.i.h.bf16 %v4366_v27 }
  0xf3   : > { %1441 = vmatprep.subr.bf16.mxu0 %v1136_v4  ;;  %v1340_v56 = vmul.bf16 %v4331_v48, %v1295_v35  ;;  %v1339_v57 = vmul.bf16 %v4334_v49, %v1294_v39  ;;  %v3259_v19 = vunpack.i.l.bf16 %v4366_v27  ;;  %v3255_v20 = vunpack.i.h.bf16 %v4380_v32 }
  0xf4   : > { %v3268_v58 = vpop.permute.xlu1 %3267  ;;  %v3254_v21 = vunpack.i.l.bf16 %v4380_v32  ;;  %v1139_v43 = vmul.bf16 %v4290_v2, %v1094_v44  ;;  %v4441_v32 = vrot.slane %v1224_v12, %v3909_v40  ;;  %v1192_v45 = vpack.c.bf16 %v4406_v46, %v4410_v1 }
  0xf5   : > { %v3270_v61 = vunpack.i.h.bf16 %v3268_v58  ;;  %v3269_v62 = vunpack.i.l.bf16 %v3268_v58  ;;  %v3263_v5 = vpop.permute.xlu0 %3262  ;;  %1468 = vmatprep.subr.bf16.mxu1 %v1340_v56  ;;  %v1193_v58 = vpack.c.bf16 %v1185_v0, %v1184_v63  ;;  %v1187_v47 = vsel %vm1175_vm7, %v3260_v18, %v3255_v20 }
  0xf6   : > { %v3265_v8 = vunpack.i.h.bf16 %v3263_v5  ;;  %v3264_v9 = vunpack.i.l.bf16 %v3263_v5  ;;  %1442 = vmatpush1.bf16.msra.mxu0 %v1135_v34  ;;  %1469 = vmatpush1.bf16.msra.mxu1 %v1339_v57  ;;  %5457 = vst [vmem:[#allocation19_spill] sm:$0xff] %v4441_v32  ;;  %v1179_v12 = vsel %vm1175_vm7, %v3255_v20, %v3260_v18  ;;  %v1178_v44 = vsel %vm1175_vm7, %v3254_v21, %v3259_v19 }
  0xf7   : > { %1443 = vmatprep.subr.bf16.mxu0 %v1138_v22  ;;  %v1238_v46 = vmul.bf16 %v4399_v59, %v1193_v58 }
  0xf8   : > { %v4416_v13 = vpop.permute.xlu1 %3277  ;;  %v1288_v11 = vsel %vm1277_vm6, %v3269_v62, %v3264_v9  ;;  %v1289_v16 = vsel %vm1277_vm6, %v3270_v61, %v3265_v8  ;;  %v1280_v15 = vsel %vm1277_vm6, %v3264_v9, %v3269_v62  ;;  %v1281_v4 = vsel %vm1277_vm6, %v3265_v8, %v3270_v61 }
  0xf9   : > { %v3273_v24 = vpop.permute.xlu0 %3272  ;;  %v1297_v14 = vpack.c.bf16 %v1289_v16, %v1288_v11  ;;  %v1296_v28 = vpack.c.bf16 %v1281_v4, %v1280_v15  ;;  %v3280_v29 = vunpack.i.h.bf16 %v4416_v13  ;;  %v3279_v10 = vunpack.i.l.bf16 %v4416_v13 }
  0xfa   : > { %1444 = vmatpush1.bf16.msra.mxu0 %v1137_v54  ;;  %v3275_v31 = vunpack.i.h.bf16 %v3273_v24  ;;  %v3274_v35 = vunpack.i.l.bf16 %v3273_v24  ;;  %v1186_v54 = vsel %vm1175_vm7, %v3259_v19, %v3254_v21  ;;  %v1194_v4 = vpack.c.bf16 %v1179_v12, %v1178_v44 }
  0xfb   : > { %1445 = vmatprep.subr.bf16.mxu0 %v1140_v6  ;;  %v1342_v39 = vmul.bf16 %v4331_v48, %v1297_v14  ;;  %v1341_v23 = vmul.bf16 %v4334_v49, %v1296_v28  ;;  %v1195_v1 = vpack.c.bf16 %v1187_v47, %v1186_v54  ;;  %v1237_v21 = vmul.bf16 %v4441_v32, %v1192_v45 }
  0xfc   : > { %v3288_v27 = vpop.permute.xlu1 %3287  ;;  %v1188_v61 = vsel %vm1175_vm7, %v3279_v10, %v3274_v35  ;;  %v1189_v62 = vsel %vm1175_vm7, %v3280_v29, %v3275_v31  ;;  %v1181_v14 = vsel %vm1175_vm7, %v3275_v31, %v3280_v29  ;;  %v1180_v28 = vsel %vm1175_vm7, %v3274_v35, %v3279_v10 }
  0xfd   : > { %v3290_v51 = vunpack.i.h.bf16 %v3288_v27  ;;  %v3289_v56 = vunpack.i.l.bf16 %v3288_v27  ;;  %v3283_v57 = vpop.permute.xlu0 %3282  ;;  %1470 = vmatprep.subr.bf16.mxu1 %v1342_v39  ;;  %v1197_v24 = vpack.c.bf16 %v1189_v62, %v1188_v61  ;;  %v1196_v10 = vpack.c.bf16 %v1181_v14, %v1180_v28 }
  0xfe   : > { %v3285_v34 = vunpack.i.h.bf16 %v3283_v57  ;;  %v3284_v22 = vunpack.i.l.bf16 %v3283_v57  ;;  %1446 = vmatpush1.bf16.msra.mxu0 %v1139_v43  ;;  %1471 = vmatpush1.bf16.msra.mxu1 %v1341_v23  ;;  %v1240_v43 = vmul.bf16 %v4399_v59, %v1195_v1  ;;  %v1239_v35 = vmul.bf16 %v4441_v32, %v1194_v4 }
  0xff   : > { %1447 = vmatprep.subr.bf16.mxu0 %v1142_v38  ;;  %v1242_v45 = vmul.bf16 %v4399_v59, %v1197_v24 }
 0x100   : > { %v3298_v5 = vpop.permute.xlu1 %3297  ;;  %v1290_v6 = vsel %vm1277_vm6, %v3289_v56, %v3284_v22  ;;  %v1291_v50 = vsel %vm1277_vm6, %v3290_v51, %v3285_v34  ;;  %v1282_v8 = vsel %vm1277_vm6, %v3284_v22, %v3289_v56  ;;  %v1283_v9 = vsel %vm1277_vm6, %v3285_v34, %v3290_v51 }
 0x101   : > { %v3293_v25 = vpop.permute.xlu0 %3292  ;;  %v1299_v63 = vpack.c.bf16 %v1291_v50, %v1290_v6  ;;  %v1298_v0 = vpack.c.bf16 %v1283_v9, %v1282_v8  ;;  %v3300_v13 = vunpack.i.h.bf16 %v3298_v5  ;;  %v3299_v11 = vunpack.i.l.bf16 %v3298_v5  ;;  %v3396_v50 = vld [vmem:[%s5371_s2 + $0x10] ss:$20 sps:$4 sm:$0xff]   ;;  %v3397_v9 = vld [vmem:[%s5371_s2 + $0x8] ss:$20 sps:$4 sm:$0xff]  }
 0x102   : > { %v3295_v16 = vunpack.i.h.bf16 %v3293_v25  ;;  %v3294_v15 = vunpack.i.l.bf16 %v3293_v25  ;;  %1448 = vmatpush1.bf16.msra.mxu0 %v1141_v33  ;;  %v1241_v5 = vmul.bf16 %v4441_v32, %v1196_v10 }
 0x103   : > { %1449 = vmatprep.subr.bf16.mxu0 %v1238_v46  ;;  %v1344_v18 = vmul.bf16 %v4331_v48, %v1299_v63  ;;  %v1343_v19 = vmul.bf16 %v4334_v49, %v1298_v0 }
 0x104   : > { %v3308_v20 = vpop.permute.xlu1 %3307  ;;  %v1190_v51 = vsel %vm1175_vm7, %v3299_v11, %v3294_v15  ;;  %v1191_v29 = vsel %vm1175_vm7, %v3300_v13, %v3295_v16  ;;  %v1183_v31 = vsel %vm1175_vm7, %v3295_v16, %v3300_v13  ;;  %v1182_v22 = vsel %vm1175_vm7, %v3294_v15, %v3299_v11 }
 0x105   : > { %v3310_v39 = vunpack.i.h.bf16 %v3308_v20  ;;  %v3309_v23 = vunpack.i.l.bf16 %v3308_v20  ;;  %v3303_v27 = vpop.permute.xlu0 %3302  ;;  %1472 = vmatprep.subr.bf16.mxu1 %v1344_v18  ;;  %v1199_v47 = vpack.c.bf16 %v1191_v29, %v1190_v51  ;;  %v1198_v62 = vpack.c.bf16 %v1183_v31, %v1182_v22 }
 0x106   : > { %v3305_v38 = vunpack.i.h.bf16 %v3303_v27  ;;  %v3304_v33 = vunpack.i.l.bf16 %v3303_v27  ;;  %1450 = vmatpush1.bf16.msra.mxu0 %v1237_v21  ;;  %1473 = vmatpush1.bf16.msra.mxu1 %v1343_v19 }
 0x107   : > { %1451 = vmatprep.subr.bf16.mxu0 %v1240_v43  ;;  %v1244_v6 = vmul.bf16 %v4399_v59, %v1199_v47  ;;  %v1243_v8 = vmul.bf16 %v4441_v32, %v1198_v62 }
 0x108   : > { %v1292_v56 = vsel %vm1277_vm6, %v3309_v23, %v3304_v33  ;;  %v1293_v57 = vsel %vm1277_vm6, %v3310_v39, %v3305_v38  ;;  %v1284_v58 = vsel %vm1277_vm6, %v3304_v33, %v3309_v23  ;;  %v1285_v34 = vsel %vm1277_vm6, %v3305_v38, %v3310_v39 }
 0x109   : > { %v1301_v54 = vpack.c.bf16 %v1293_v57, %v1292_v56  ;;  %v1300_v12 = vpack.c.bf16 %v1285_v34, %v1284_v58  ;;  %v3400_v57 = vld [vmem:[%s5374_s5] sm:$0xff]  }
 0x10a   : > { %1452 = vmatpush1.bf16.msra.mxu0 %v1239_v35  ;;  %v1603_v58 = vld [vmem:[%s5375_s6] sm:$0x1] }
 0x10b   : > { %1453 = vmatprep.subr.bf16.mxu0 %v1242_v45  ;;  %v1346_v44 = vmul.bf16 %v4331_v48, %v1301_v54  ;;  %v1345_v61 = vmul.bf16 %v4334_v49, %v1300_v12 }
 0x10d   : > { %1474 = vmatprep.subr.bf16.mxu1 %v1346_v44 }
 0x10e   : > { %1454 = vmatpush1.bf16.msra.mxu0 %v1241_v5  ;;  %1475 = vmatpush1.bf16.msra.mxu1 %v1345_v61 }
 0x10f   : > { %1455 = vmatprep.subr.bf16.mxu0 %v1244_v6 }
 0x111   : > { %2934 = vmatmul.mubr.msk.bf16.vlgmr.msra.gmra.mrb[0].mxu1 %vm1378_vm8, %v3396_v50 }
 0x112   : > { %1456 = vmatpush1.bf16.msra.mxu0 %v1243_v8  ;;  %1592 = vmatprep.mubr.bf16.mxu1 %v5385_v42 }
 0x115   : > { %1458 = vmatmul.mubr.bf16.vlgmr.msra.gmra.mrb[0].mxu0 %v3397_v9  ;;  %v1521_v1 = vpop.permute.xlu1 %1520 }
 0x116   : > { %v1516_v13 = vpop.permute.xlu0 %1515 }
 0x119   : > { %v1532_v20 = vpop.permute.xlu1 %1531 }
 0x11a   : > { %v1537_v27 = vpop.permute.xlu0 %1536 }
 0x1e4   : > { %v1502_v25 = vpop.f32.mrb[0].mxu1 }
 0x1e5   : > { %v1504_v46 = vpop.f32.mrb[1].mxu1 }
 0x1e6   : > { %v1506_v63 = vpop.f32.mrb[2].mxu1 }
 0x1e7   : > { %v1508_v0 = vpop.f32.mrb[3].mxu1 }
 0x1e8   : > { %v1459_v11 = vpop.f32.mrb[0].mxu0 }
 0x1e9   : > { %v2965_v16 = vadd.f32 %v1502_v25, %v1459_v11  ;;  %v1461_v15 = vpop.f32.mrb[1].mxu0 }
 0x1ea   : > { %v2966_v4 = vadd.f32 %v1504_v46, %v1461_v15  ;;  %v1463_v18 = vpop.f32.mrb[2].mxu0 }
 0x1eb   : > { %v1523_v19 = vmul.f32 %v2965_v16, %v1516_v13  ;;  %v2967_v24 = vadd.f32 %v1506_v63, %v1463_v18  ;;  %v1465_v14 = vpop.f32.mrb[3].mxu0 }
 0x1ec   : > { %v1524_v28 = vmul.f32 %v2966_v4, %v1516_v13  ;;  %v2968_v21 = vadd.f32 %v1508_v0, %v1465_v14 }
 0x1ed   : > { %v1525_v39 = vmul.f32 %v2967_v24, %v1521_v1  ;;  %v4506_v38 = vadd.f32 %v1532_v20, %v1523_v19 }
 0x1ee   : > { %v4504_v23 = vadd.f32 %v1532_v20, %v1524_v28  ;;  %v1526_v43 = vmul.f32 %v2968_v21, %v1521_v1 }
 0x1ef   : > { %5459 = vst [vmem:[#allocation21_spill] sm:$0xff] %v4506_v38  ;;  %v4508_v33 = vadd.f32 %v1537_v27, %v1525_v39  ;;  %v5389_v35 = vmax.f32 %v4506_v38, 0.0 }
 0x1f0   : > { %5458 = vst [vmem:[#allocation20_spill] sm:$0xff] %v4504_v23  ;;  %v4510_v51 = vadd.f32 %v1537_v27, %v1526_v43  ;;  %v5387_v10 = vmax.f32 %v4504_v23, 0.0 }
 0x1f1   : > { %5460 = vst [vmem:[#allocation22_spill] sm:$0xff] %v4508_v33  ;;  %v5388_v29 = vmax.f32 %v4508_v33, 0.0 }
 0x1f2   : > { %5461 = vst [vmem:[#allocation23_spill] sm:$0xff] %v4510_v51  ;;  %v5386_v31 = vmax.f32 %v4510_v51, 0.0 }
 0x1f3   : > { %v1547_v56 = vpack.c.bf16 %v5388_v29, %v5389_v35 }
 0x1f4   : > { %v1548_v45 = vpack.c.bf16 %v5386_v31, %v5387_v10 }
 0x1f6   : > { %1560 = vmatprep.subr.bf16.mxu1 %v1548_v45 }
 0x1f7   : > { %1561 = vmatpush1.bf16.msra.mxu1 %v1547_v56 }
 0x1f8   : > { %1607 = vmatprep.subr.bf16.mxu1 %v1548_v45 }
 0x1fa   : > { %2936 = vmatmul.mubr.msk.bf16.vlgmr.msra.gmra.mrb[4].mxu1 %vm1556_vm9, %v3400_v57 }
 0x1fb   : > { %1608 = vmatpush1.bf16.msra.mxu1 %v1547_v56  ;;  %1639 = vmatprep.mubr.bf16.mxu1 %v5385_v42 }
 0x1fc   : > { %1738 = vmatprep.subr.bf16.mxu1 %v1548_v45 }
 0x202   : > { %2937 = vmatmul.mubr.msk.bf16.vlgmr.msra.gmra.mrb[8].mxu1 %vm1556_vm9, %v1603_v58 }
 0x203   : > { %1739 = vmatpush1.bf16.msra.mxu1 %v1547_v56  ;;  %1770 = vmatprep.mubr.bf16.mxu1 %v5385_v42 }
 0x204   : > { %2465 = vmatprep.subr.bf16.mxu1 %v1548_v45 }
 0x2cd   : > { %v1594_v34 = vpop.f32.mrb[4].mxu1 }
 0x2ce   : > { %v1596_v22 = vpop.f32.mrb[5].mxu1 }
 0x2cf   : > { %v1598_v54 = vpop.f32.mrb[6].mxu1 }
 0x2d0   : > { %v1648_v47 = vpack.c.bf16 %v1598_v54, %v1594_v34  ;;  %v1600_v12 = vpop.f32.mrb[7].mxu1 }
 0x2d1   : > { %v1649_v44 = vpack.c.bf16 %v1600_v12, %v1596_v22 }
 0x2d2   : > { %1658 = vxpose.xlu1.c.b16.start.end [1/1] (short) %v1648_v47, 128 }
 0x2d3   : > { %1674 = vxpose.xlu0.c.b16.start.end [1/1] (short) %v1649_v44, 128 }
 0x2d5   : > { %v1641_v61 = vpop.f32.mrb[8].mxu1 }
 0x2d6   : > { %v1643_v62 = vpop.f32.mrb[9].mxu1  ;;  %v4567_v14 = vrot.slane %v1641_v61, %v3909_v40 }
 0x2d7   : > { %v1645_v5 = vpop.f32.mrb[10].mxu1  ;;  %v4570_v28 = vrot.slane %v1643_v62, %v3909_v40 }
 0x2d8   : > { %v1646_v6 = vpop.f32.mrb[11].mxu1 }
 0x338   : > { %v1666_v50 = vpop.trf.xlu1 }
 0x339   : > { %2938 = vmatmul.mubr.msk.bf16.vlgmr.msra.gmra.mrb[12].mxu1 %vm1556_vm9, %v1666_v50  ;;  %v1682_v13 = vpop.trf.xlu0 }
 0x33a   : > { %2466 = vmatpush1.bf16.msra.mxu1 %v1547_v56  ;;  %1780 = vmatprep.mubr.bf16.mxu1 %v5385_v42 }
 0x33c   : > { %v1667_v8 = vpop.trf.xlu1 }
 0x33d   : > { %v1683_v11 = vpop.trf.xlu0 }
 0x340   : > { %v1668_v9 = vpop.trf.xlu1 }
 0x341   : > { %2939 = vmatmul.mubr.msk.bf16.gmra.mrb[16].mxu1 %vm1556_vm9, %v1667_v8  ;;  %v1684_v16 = vpop.trf.xlu0 }
 0x342   : > { %1790 = vmatprep.mubr.bf16.mxu1 %v5385_v42 }
 0x344   : > { %v1669_v25 = vpop.trf.xlu1 }
 0x345   : > { %v1685_v15 = vpop.trf.xlu0 }
 0x348   : > { %v1670_v46 = vpop.trf.xlu1 }
 0x349   : > { %2940 = vmatmul.mubr.msk.bf16.gmra.mrb[20].mxu1 %vm1556_vm9, %v1668_v9  ;;  %v1686_v4 = vpop.trf.xlu0 }
 0x34a   : > { %1800 = vmatprep.mubr.bf16.mxu1 %v5385_v42 }
 0x34c   : > { %v1671_v1 = vpop.trf.xlu1 }
 0x34d   : > { %v1687_v18 = vpop.trf.xlu0 }
 0x350   : > { %v1672_v63 = vpop.trf.xlu1 }
 0x351   : > { %2941 = vmatmul.mubr.msk.bf16.gmra.mrb[24].mxu1 %vm1556_vm9, %v1669_v25  ;;  %v1688_v19 = vpop.trf.xlu0 }
 0x352   : > { %1810 = vmatprep.mubr.bf16.mxu1 %v5385_v42 }
 0x354   : > { %v1673_v0 = vpop.trf.xlu1 }
 0x355   : > { %v1689_v24 = vpop.trf.xlu0 }
 0x359   : > { %2942 = vmatmul.mubr.msk.bf16.gmra.mrb[28].mxu1 %vm1556_vm9, %v1670_v46 }
 0x35a   : > { %1820 = vmatprep.mubr.bf16.mxu1 %v5385_v42 }
 0x361   : > { %2943 = vmatmul.mubr.msk.bf16.gmra.mrb[32].mxu1 %vm1556_vm9, %v1671_v1 }
 0x362   : > { %1830 = vmatprep.mubr.bf16.mxu1 %v5385_v42 }
 0x369   : > { %2944 = vmatmul.mubr.msk.bf16.gmra.mrb[36].mxu1 %vm1556_vm9, %v1672_v63 }
 0x36a   : > { %1840 = vmatprep.mubr.bf16.mxu1 %v5385_v42 }
 0x371   : > { %2945 = vmatmul.mubr.msk.bf16.gmra.mrb[40].mxu1 %vm1556_vm9, %v1673_v0 }
 0x372   : > { %1850 = vmatprep.mubr.bf16.mxu1 %v5385_v42 }
 0x379   : > { %2946 = vmatmul.mubr.msk.bf16.gmra.mrb[44].mxu1 %vm1556_vm9, %v1682_v13 }
 0x37a   : > { %1860 = vmatprep.mubr.bf16.mxu1 %v5385_v42 }
 0x381   : > { %2947 = vmatmul.mubr.msk.bf16.gmra.mrb[48].mxu1 %vm1556_vm9, %v1683_v11 }
 0x382   : > { %1870 = vmatprep.mubr.bf16.mxu1 %v5385_v42 }
 0x389   : > { %2948 = vmatmul.mubr.msk.bf16.gmra.mrb[52].mxu1 %vm1556_vm9, %v1684_v16 }
 0x38a   : > { %1880 = vmatprep.mubr.bf16.mxu1 %v5385_v42 }
 0x391   : > { %2949 = vmatmul.mubr.msk.bf16.gmra.mrb[56].mxu1 %vm1556_vm9, %v1685_v15 }
 0x392   : > { %1890 = vmatprep.mubr.bf16.mxu1 %v5385_v42 }
 0x399   : > { %2950 = vmatmul.mubr.msk.bf16.gmra.mrb[60].mxu1 %vm1556_vm9, %v1686_v4 }
 0x39a   : > { %1900 = vmatprep.mubr.bf16.mxu1 %v5385_v42 }
 0x3a1   : > { %2951 = vmatmul.mubr.msk.bf16.gmra.mrb[64].mxu1 %vm1556_vm9, %v1687_v18 }
 0x3a2   : > { %1910 = vmatprep.mubr.bf16.mxu1 %v5385_v42 }
 0x3a9   : > { %2952 = vmatmul.mubr.msk.bf16.gmra.mrb[68].mxu1 %vm1556_vm9, %v1688_v19 }
 0x3aa   : > { %1920 = vmatprep.mubr.bf16.mxu1 %v5385_v42 }
 0x3b1   : > { %2953 = vmatmul.mubr.msk.bf16.gmra.mrb[72].mxu1 %vm1556_vm9, %v1689_v24 }
 0x3b2   : > { %2497 = vmatprep.mubr.bf16.mxu1 %v5385_v42 }
 0x40c   : > { %v1772_v20 = vpop.f32.mrb[12].mxu1 }
 0x40d   : > { %v4573_v21 = vadd.f32 %v1772_v20, %v4567_v14  ;;  %v1774_v39 = vpop.f32.mrb[13].mxu1 }
 0x40e   : > { %v4576_v27 = vadd.f32 %v1774_v39, %v4570_v28  ;;  %v1776_v43 = vpop.f32.mrb[14].mxu1 }
 0x40f   : > { %v4579_v45 = vadd.f32 %v1776_v43, %v4567_v14  ;;  %v1778_v56 = vpop.f32.mrb[15].mxu1 }
 0x410   : > { %v4582_v57 = vadd.f32 %v1778_v56, %v4570_v28  ;;  %v1931_v40 = vmax.f32 %v4573_v21, %v4576_v27 }
 0x412   : > { %1932 = vmax.xlane.f32.xlu0 %v1931_v40  ;;  %v1934_v58 = vmax.f32 %v4579_v45, %v4582_v57 }
 0x414   : > { %v1782_v34 = vpop.f32.mrb[16].mxu1  ;;  %1935 = vmax.xlane.f32.xlu1 %v1934_v58 }
 0x415   : > { %v4589_v22 = vadd.f32 %v1782_v34, %v4567_v14  ;;  %v1784_v54 = vpop.f32.mrb[17].mxu1 }
 0x416   : > { %v4592_v47 = vadd.f32 %v1784_v54, %v4570_v28  ;;  %v1786_v12 = vpop.f32.mrb[18].mxu1 }
 0x417   : > { %v4595_v44 = vadd.f32 %v1786_v12, %v4567_v14  ;;  %v1788_v61 = vpop.f32.mrb[19].mxu1 }
 0x418   : > { %v4598_v62 = vadd.f32 %v1788_v61, %v4570_v28  ;;  %v1937_v5 = vmax.f32 %v4589_v22, %v4592_v47 }
 0x41a   : > { %1938 = vmax.xlane.f32.xlu0 %v1937_v5  ;;  %v1940_v6 = vmax.f32 %v4595_v44, %v4598_v62 }
 0x41c   : > { %v1792_v50 = vpop.f32.mrb[20].mxu1  ;;  %1941 = vmax.xlane.f32.xlu1 %v1940_v6 }
 0x41d   : > { %v4605_v8 = vadd.f32 %v1792_v50, %v4567_v14  ;;  %v1794_v9 = vpop.f32.mrb[21].mxu1 }
 0x41e   : > { %v4608_v25 = vadd.f32 %v1794_v9, %v4570_v28  ;;  %v1796_v46 = vpop.f32.mrb[22].mxu1 }
 0x41f   : > { %v4611_v1 = vadd.f32 %v1796_v46, %v4567_v14  ;;  %v1798_v63 = vpop.f32.mrb[23].mxu1 }
 0x420   : > { %v4614_v0 = vadd.f32 %v1798_v63, %v4570_v28  ;;  %v1943_v13 = vmax.f32 %v4605_v8, %v4608_v25 }
 0x422   : > { %1944 = vmax.xlane.f32.xlu0 %v1943_v13  ;;  %v1946_v11 = vmax.f32 %v4611_v1, %v4614_v0 }
 0x424   : > { %v1802_v16 = vpop.f32.mrb[24].mxu1  ;;  %1947 = vmax.xlane.f32.xlu1 %v1946_v11 }
 0x425   : > { %v4621_v15 = vadd.f32 %v1802_v16, %v4567_v14  ;;  %v1804_v4 = vpop.f32.mrb[25].mxu1 }
 0x426   : > { %v4624_v18 = vadd.f32 %v1804_v4, %v4570_v28  ;;  %v1806_v19 = vpop.f32.mrb[26].mxu1 }
 0x427   : > { %v4627_v24 = vadd.f32 %v1806_v19, %v4567_v14  ;;  %v1808_v20 = vpop.f32.mrb[27].mxu1 }
 0x428   : > { %v4630_v39 = vadd.f32 %v1808_v20, %v4570_v28  ;;  %v1949_v43 = vmax.f32 %v4621_v15, %v4624_v18 }
 0x42a   : > { %1950 = vmax.xlane.f32.xlu0 %v1949_v43  ;;  %v1952_v56 = vmax.f32 %v4627_v24, %v4630_v39 }
 0x42c   : > { %v1812_v40 = vpop.f32.mrb[28].mxu1  ;;  %1953 = vmax.xlane.f32.xlu1 %v1952_v56 }
 0x42d   : > { %v4637_v58 = vadd.f32 %v1812_v40, %v4567_v14  ;;  %v1814_v34 = vpop.f32.mrb[29].mxu1 }
 0x42e   : > { %v4640_v54 = vadd.f32 %v1814_v34, %v4570_v28  ;;  %v1816_v12 = vpop.f32.mrb[30].mxu1 }
 0x42f   : > { %v4643_v61 = vadd.f32 %v1816_v12, %v4567_v14  ;;  %v1818_v5 = vpop.f32.mrb[31].mxu1 }
 0x430   : > { %v4646_v6 = vadd.f32 %v1818_v5, %v4570_v28  ;;  %v1955_v50 = vmax.f32 %v4637_v58, %v4640_v54 }
 0x432   : > { %1956 = vmax.xlane.f32.xlu0 %v1955_v50  ;;  %v1958_v9 = vmax.f32 %v4643_v61, %v4646_v6 }
 0x434   : > { %v1822_v46 = vpop.f32.mrb[32].mxu1  ;;  %1959 = vmax.xlane.f32.xlu1 %v1958_v9 }
 0x435   : > { %v4653_v63 = vadd.f32 %v1822_v46, %v4567_v14  ;;  %v1824_v13 = vpop.f32.mrb[33].mxu1 }
 0x436   : > { %v4656_v11 = vadd.f32 %v1824_v13, %v4570_v28  ;;  %v1826_v16 = vpop.f32.mrb[34].mxu1 }
 0x437   : > { %v4659_v4 = vadd.f32 %v1826_v16, %v4567_v14  ;;  %v1828_v19 = vpop.f32.mrb[35].mxu1 }
 0x438   : > { %v4662_v20 = vadd.f32 %v1828_v19, %v4570_v28  ;;  %v1961_v43 = vmax.f32 %v4653_v63, %v4656_v11 }
 0x43a   : > { %1962 = vmax.xlane.f32.xlu0 %v1961_v43  ;;  %v1964_v56 = vmax.f32 %v4659_v4, %v4662_v20 }
 0x43c   : > { %v1832_v40 = vpop.f32.mrb[36].mxu1  ;;  %1965 = vmax.xlane.f32.xlu1 %v1964_v56 }
 0x43d   : > { %v4669_v34 = vadd.f32 %v1832_v40, %v4567_v14  ;;  %v1834_v12 = vpop.f32.mrb[37].mxu1 }
 0x43e   : > { %v4672_v5 = vadd.f32 %v1834_v12, %v4570_v28  ;;  %v1836_v50 = vpop.f32.mrb[38].mxu1 }
 0x43f   : > { %v4675_v9 = vadd.f32 %v1836_v50, %v4567_v14  ;;  %v1838_v46 = vpop.f32.mrb[39].mxu1 }
 0x440   : > { %v4678_v13 = vadd.f32 %v1838_v46, %v4570_v28  ;;  %v1967_v16 = vmax.f32 %v4669_v34, %v4672_v5 }
 0x442   : > { %1968 = vmax.xlane.f32.xlu0 %v1967_v16  ;;  %v1970_v19 = vmax.f32 %v4675_v9, %v4678_v13 }
 0x444   : > { %v1842_v43 = vpop.f32.mrb[40].mxu1  ;;  %1971 = vmax.xlane.f32.xlu1 %v1970_v19 }
 0x445   : > { %v4685_v56 = vadd.f32 %v1842_v43, %v4567_v14  ;;  %v1844_v40 = vpop.f32.mrb[41].mxu1 }
 0x446   : > { %v4688_v12 = vadd.f32 %v1844_v40, %v4570_v28  ;;  %v1846_v50 = vpop.f32.mrb[42].mxu1 }
 0x447   : > { %v4691_v46 = vadd.f32 %v1846_v50, %v4567_v14  ;;  %v1848_v42 = vpop.f32.mrb[43].mxu1 }
 0x448   : > { %v1973_v16 = vmax.f32 %v4685_v56, %v4688_v12  ;;  %v4696_v31 = vadd.f32 %v1848_v42, %v4570_v28 }
 0x44a   : > { %v1976_v19 = vmax.f32 %v4691_v46, %v4696_v31  ;;  %1974 = vmax.xlane.f32.xlu0 %v1973_v16 }
 0x44c   : > { %v1852_v43 = vpop.f32.mrb[44].mxu1  ;;  %1977 = vmax.xlane.f32.xlu1 %v1976_v19 }
 0x44d   : > { %v4701_v40 = vadd.f32 %v1852_v43, %v4567_v14  ;;  %v1854_v10 = vpop.f32.mrb[45].mxu1 }
 0x44e   : > { %v4704_v50 = vadd.f32 %v1854_v10, %v4570_v28  ;;  %v1856_v29 = vpop.f32.mrb[46].mxu1 }
 0x44f   : > { %v4707_v35 = vadd.f32 %v1856_v29, %v4567_v14  ;;  %v1858_v49 = vpop.f32.mrb[47].mxu1 }
 0x450   : > { %5462 = vst [vmem:[#allocation24_spill] sm:$0xff] %v4704_v50  ;;  %v1979_v42 = vmax.f32 %v4701_v40, %v4704_v50  ;;  %v4712_v48 = vadd.f32 %v1858_v49, %v4570_v28 }
 0x451   : > { %5463 = vst [vmem:[#allocation25_spill] sm:$0xff] %v4707_v35 }
 0x452   : > { %5464 = vst [vmem:[#allocation26_spill] sm:$0xff] %v4712_v48  ;;  %v1982_v16 = vmax.f32 %v4707_v35, %v4712_v48  ;;  %1980 = vmax.xlane.f32.xlu0 %v1979_v42 }
 0x454   : > { %v1862_v19 = vpop.f32.mrb[48].mxu1  ;;  %1983 = vmax.xlane.f32.xlu1 %v1982_v16 }
 0x455   : > { %v4717_v10 = vadd.f32 %v1862_v19, %v4567_v14  ;;  %v1864_v43 = vpop.f32.mrb[49].mxu1 }
 0x456   : > { %v4720_v29 = vadd.f32 %v1864_v43, %v4570_v28  ;;  %v1866_v32 = vpop.f32.mrb[50].mxu1 }
 0x457   : > { %5465 = vst [vmem:[#allocation27_spill] sm:$0xff] %v4717_v10  ;;  %v4723_v59 = vadd.f32 %v1866_v32, %v4567_v14  ;;  %v1868_v2 = vpop.f32.mrb[51].mxu1 }
 0x458   : > { %5466 = vst [vmem:[#allocation28_spill] sm:$0xff] %v4720_v29  ;;  %v1985_v49 = vmax.f32 %v4717_v10, %v4720_v29  ;;  %v4728_v17 = vadd.f32 %v1868_v2, %v4570_v28 }
 0x459   : > { %5467 = vst [vmem:[#allocation29_spill] sm:$0xff] %v4723_v59 }
 0x45a   : > { %5468 = vst [vmem:[#allocation30_spill] sm:$0xff] %v4728_v17  ;;  %v1988_v42 = vmax.f32 %v4723_v59, %v4728_v17  ;;  %1986 = vmax.xlane.f32.xlu0 %v1985_v49 }
 0x45c   : > { %v1872_v16 = vpop.f32.mrb[52].mxu1  ;;  %1989 = vmax.xlane.f32.xlu1 %v1988_v42 }
 0x45d   : > { %v4733_v19 = vadd.f32 %v1872_v16, %v4567_v14  ;;  %v1874_v43 = vpop.f32.mrb[53].mxu1 }
 0x45e   : > { %v4736_v32 = vadd.f32 %v1874_v43, %v4570_v28  ;;  %v1876_v3 = vpop.f32.mrb[54].mxu1 }
 0x45f   : > { %5469 = vst [vmem:[#allocation31_spill] sm:$0xff] %v4733_v19  ;;  %v4739_v26 = vadd.f32 %v1876_v3, %v4567_v14  ;;  %v1878_v55 = vpop.f32.mrb[55].mxu1 }
 0x460   : > { %5470 = vst [vmem:[#allocation32_spill] sm:$0xff] %v4736_v32  ;;  %v1991_v2 = vmax.f32 %v4733_v19, %v4736_v32  ;;  %v4744_v41 = vadd.f32 %v1878_v55, %v4570_v28 }
 0x461   : > { %5471 = vst [vmem:[#allocation33_spill] sm:$0xff] %v4739_v26 }
 0x462   : > { %5472 = vst [vmem:[#allocation34_spill] sm:$0xff] %v4744_v41  ;;  %v1994_v49 = vmax.f32 %v4739_v26, %v4744_v41  ;;  %1992 = vmax.xlane.f32.xlu0 %v1991_v2 }
 0x464   : > { %v1882_v42 = vpop.f32.mrb[56].mxu1  ;;  %1995 = vmax.xlane.f32.xlu1 %v1994_v49 }
 0x465   : > { %v4749_v16 = vadd.f32 %v1882_v42, %v4567_v14  ;;  %v1884_v43 = vpop.f32.mrb[57].mxu1 }
 0x466   : > { %v4752_v3 = vadd.f32 %v1884_v43, %v4570_v28  ;;  %v1886_v7 = vpop.f32.mrb[58].mxu1 }
 0x467   : > { %5473 = vst [vmem:[#allocation35_spill] sm:$0xff] %v4749_v16  ;;  %v4755_v60 = vadd.f32 %v1886_v7, %v4567_v14  ;;  %v1888_v36 = vpop.f32.mrb[59].mxu1 }
 0x468   : > { %5474 = vst [vmem:[#allocation36_spill] sm:$0xff] %v4752_v3  ;;  %v1997_v55 = vmax.f32 %v4749_v16, %v4752_v3  ;;  %v4760_v30 = vadd.f32 %v1888_v36, %v4570_v28  ;;  %v3401_v3 = vld [vmem:[%s5376_s7] sm:$0xff]  }
 0x469   : > { %5475 = vst [vmem:[#allocation37_spill] sm:$0xff] %v4755_v60  ;;  %2955 = vmatmul.mubr.msk.bf16.vlgmr.msra.gmra.mrb[76].mxu1 %vm1556_vm9, %v3401_v3 }
 0x46a   : > { %5476 = vst [vmem:[#allocation38_spill] sm:$0xff] %v4760_v30  ;;  %v2000_v2 = vmax.f32 %v4755_v60, %v4760_v30  ;;  %1998 = vmax.xlane.f32.xlu0 %v1997_v55 }
 0x46c   : > { %v1892_v49 = vpop.f32.mrb[60].mxu1  ;;  %2001 = vmax.xlane.f32.xlu1 %v2000_v2 }
 0x46d   : > { %v1894_v42 = vpop.f32.mrb[61].mxu1 }
 0x46e   : > { %v1896_v43 = vpop.f32.mrb[62].mxu1 }
 0x46f   : > { %v1898_v53 = vpop.f32.mrb[63].mxu1 }
 0x474   : > { %v4764_v52 = vpop.f32.mrb[64].mxu1 }
 0x475   : > { %v4766_v7 = vpop.f32.mrb[65].mxu1 }
 0x476   : > { %v4768_v37 = vpop.f32.mrb[66].mxu1 }
 0x477   : > { %v4770_v51 = vpop.f32.mrb[67].mxu1 }
 0x47c   : > { %v4772_v23 = vpop.f32.mrb[68].mxu1 }
 0x47d   : > { %v4774_v36 = vpop.f32.mrb[69].mxu1 }
 0x47e   : > { %v4776_v33 = vpop.f32.mrb[70].mxu1 }
 0x47f   : > { %v4778_v55 = vpop.f32.mrb[71].mxu1 }
 0x484   : > { %v4780_v2 = vpop.f32.mrb[72].mxu1 }
 0x485   : > { %v4782_v38 = vpop.f32.mrb[73].mxu1 }
 0x486   : > { %v4784_v30 = vpop.f32.mrb[74].mxu1 }
 0x487   : > { %v4786_v60 = vpop.f32.mrb[75].mxu1 }
 0x49f   : > { %v1933_v16 = vpop.xlane.xlu0 %1932 }
 0x4a0   : > { %v2027_v41 = vsub.f32 %v4573_v21, %v1933_v16  ;;  %v2028_v26 = vsub.f32 %v4576_v27, %v1933_v16 }
 0x4a1   : > { %v1936_v32 = vpop.xlane.xlu1 %1935 }
 0x4a2   : > { %v2091_v19 = vmul.f32 1.442695, %v2027_v41  ;;  %v2093_v17 = vmul.f32 1.442695, %v2028_v26  ;;  %v2029_v59 = vsub.f32 %v4579_v45, %v1936_v32  ;;  %v2030_v29 = vsub.f32 %v4582_v57, %v1936_v32 }
 0x4a4   : > { %3406 = vpow2.f32 %v2091_v19  ;;  %v2095_v10 = vmul.f32 1.442695, %v2029_v59  ;;  %v2097_v48 = vmul.f32 1.442695, %v2030_v29 }
 0x4a5   : > { %3408 = vpow2.f32 %v2093_v17 }
 0x4a6   : > { %3410 = vpow2.f32 %v2095_v10 }
 0x4a7   : > { %3412 = vpow2.f32 %v2097_v48  ;;  %v1939_v35 = vpop.xlane.xlu0 %1938  ;;  %v4805_v48 = vadd.f32 %v1892_v49, %v4567_v14 }
 0x4a8   : > { %v2031_v3 = vsub.f32 %v4589_v22, %v1939_v35  ;;  %v2032_v21 = vsub.f32 %v4592_v47, %v1939_v35  ;;  %v4810_v47 = vadd.f32 %v1894_v42, %v4570_v28  ;;  %v4821_v42 = vadd.f32 %v1896_v43, %v4567_v14 }
 0x4a9   : > { %v1942_v50 = vpop.xlane.xlu1 %1941  ;;  %v4838_v43 = vadd.f32 %v4764_v52, %v4567_v14 }
 0x4aa   : > { %v2099_v27 = vmul.f32 1.442695, %v2031_v3  ;;  %v2101_v16 = vmul.f32 1.442695, %v2032_v21  ;;  %v2033_v41 = vsub.f32 %v4595_v44, %v1942_v50  ;;  %v2034_v26 = vsub.f32 %v4598_v62, %v1942_v50 }
 0x4ab   : > { %v2003_v21 = vmax.f32 %v4805_v48, %v4810_v47 }
 0x4ac   : > { %3414 = vpow2.f32 %v2099_v27  ;;  %v2103_v45 = vmul.f32 1.442695, %v2033_v41  ;;  %v2105_v57 = vmul.f32 1.442695, %v2034_v26 }
 0x4ad   : > { %3416 = vpow2.f32 %v2101_v16 }
 0x4ae   : > { %v4800_v59 = vpop.eup %3406  ;;  %3418 = vpow2.f32 %v2103_v45  ;;  %v4844_v45 = vadd.f32 %v4766_v7, %v4570_v28  ;;  %v4856_v7 = vadd.f32 %v4768_v37, %v4567_v14 }
 0x4af   : > { %v4802_v17 = vpop.eup %3408  ;;  %3420 = vpow2.f32 %v2105_v57  ;;  %v1945_v35 = vpop.xlane.xlu0 %1944 }
 0x4b0   : > { %v4807_v22 = vpop.eup %3410  ;;  %v2035_v44 = vsub.f32 %v4605_v8, %v1945_v35  ;;  %v2036_v62 = vsub.f32 %v4608_v25, %v1945_v35  ;;  %v2219_v50 = vadd.f32 %v4802_v17, %v4800_v59  ;;  %v4824_v8 = vadd.f32 %v1898_v53, %v4570_v28 }
 0x4b1   : > { %v4816_v10 = vpop.eup %3412  ;;  %v1948_v29 = vpop.xlane.xlu1 %1947 }
 0x4b2   : > { %v2107_v19 = vmul.f32 1.442695, %v2035_v44  ;;  %v2109_v32 = vmul.f32 1.442695, %v2036_v62  ;;  %v2037_v49 = vsub.f32 %v4611_v1, %v1948_v29  ;;  %v2038_v3 = vsub.f32 %v4614_v0, %v1948_v29  ;;  %2220 = vadd.xlane.f32.xlu0 %v2219_v50 }
 0x4b3   : > { %v2222_v25 = vadd.f32 %v4816_v10, %v4807_v22  ;;  %v2006_v53 = vmax.f32 %v4821_v42, %v4824_v8 }
 0x4b4   : > { %3422 = vpow2.f32 %v2107_v19  ;;  %v2111_v27 = vmul.f32 1.442695, %v2037_v49  ;;  %v2113_v16 = vmul.f32 1.442695, %v2038_v3  ;;  %v2009_v49 = vmax.f32 %v4838_v43, %v4844_v45 }
 0x4b5   : > { %3424 = vpow2.f32 %v2109_v32  ;;  %2223 = vadd.xlane.f32.xlu1 %v2222_v25  ;;  %v4874_v25 = vadd.f32 %v4772_v23, %v4567_v14 }
 0x4b6   : > { %v4830_v1 = vpop.eup %3414  ;;  %3426 = vpow2.f32 %v2111_v27  ;;  %2004 = vmax.xlane.f32.xlu0 %v2003_v21 }
 0x4b7   : > { %v4832_v0 = vpop.eup %3416  ;;  %3428 = vpow2.f32 %v2113_v16  ;;  %v1951_v41 = vpop.xlane.xlu0 %1950  ;;  %v4880_v16 = vadd.f32 %v4774_v36, %v4570_v28  ;;  %v4892_v36 = vadd.f32 %v4776_v33, %v4567_v14 }
 0x4b8   : > { %v4840_v26 = vpop.eup %3418  ;;  %v2039_v57 = vsub.f32 %v4621_v15, %v1951_v41  ;;  %v2040_v35 = vsub.f32 %v4624_v18, %v1951_v41  ;;  %v2225_v44 = vadd.f32 %v4832_v0, %v4830_v1  ;;  %v4860_v15 = vadd.f32 %v4770_v51, %v4570_v28 }
 0x4b9   : > { %v4850_v62 = vpop.eup %3420  ;;  %2007 = vmax.xlane.f32.xlu1 %v2006_v53  ;;  %v1954_v52 = vpop.xlane.xlu1 %1953 }
 0x4ba   : > { %v2115_v50 = vmul.f32 1.442695, %v2039_v57  ;;  %v2117_v29 = vmul.f32 1.442695, %v2040_v35  ;;  %v2041_v19 = vsub.f32 %v4627_v24, %v1954_v52  ;;  %v2042_v32 = vsub.f32 %v4630_v39, %v1954_v52  ;;  %2226 = vadd.xlane.f32.xlu0 %v2225_v44 }
 0x4bb   : > { %v2228_v18 = vadd.f32 %v4850_v62, %v4840_v26  ;;  %v2012_v51 = vmax.f32 %v4856_v7, %v4860_v15 }
 0x4bc   : > { %3430 = vpow2.f32 %v2115_v50  ;;  %v2119_v3 = vmul.f32 1.442695, %v2041_v19  ;;  %v2121_v24 = vmul.f32 1.442695, %v2042_v32  ;;  %v2015_v19 = vmax.f32 %v4874_v25, %v4880_v16 }
 0x4bd   : > { %3432 = vpow2.f32 %v2117_v29  ;;  %2229 = vadd.xlane.f32.xlu1 %v2228_v18  ;;  %v4910_v18 = vadd.f32 %v4780_v2, %v4567_v14 }
 0x4be   : > { %v4866_v39 = vpop.eup %3422  ;;  %3434 = vpow2.f32 %v2119_v3  ;;  %2010 = vmax.xlane.f32.xlu0 %v2009_v49 }
 0x4bf   : > { %v4868_v37 = vpop.eup %3424  ;;  %3436 = vpow2.f32 %v2121_v24  ;;  %v1957_v21 = vpop.xlane.xlu0 %1956  ;;  %v4916_v24 = vadd.f32 %v4782_v38, %v4570_v28  ;;  %v4928_v38 = vadd.f32 %v4784_v30, %v4567_v14 }
 0x4c0   : > { %v4876_v27 = vpop.eup %3426  ;;  %v2043_v53 = vsub.f32 %v4637_v58, %v1957_v21  ;;  %v2044_v41 = vsub.f32 %v4640_v54, %v1957_v21  ;;  %v2231_v57 = vadd.f32 %v4868_v37, %v4866_v39  ;;  %v4896_v58 = vadd.f32 %v4778_v55, %v4570_v28 }
 0x4c1   : > { %v4886_v35 = vpop.eup %3428  ;;  %2013 = vmax.xlane.f32.xlu1 %v2012_v51  ;;  %v1960_v23 = vpop.xlane.xlu1 %1959 }
 0x4c2   : > { %v2123_v44 = vmul.f32 1.442695, %v2043_v53  ;;  %v2125_v52 = vmul.f32 1.442695, %v2044_v41  ;;  %v2045_v50 = vsub.f32 %v4643_v61, %v1960_v23  ;;  %v2046_v29 = vsub.f32 %v4646_v6, %v1960_v23  ;;  %2232 = vadd.xlane.f32.xlu0 %v2231_v57 }
 0x4c3   : > { %v2234_v54 = vadd.f32 %v4886_v35, %v4876_v27  ;;  %v2018_v55 = vmax.f32 %v4892_v36, %v4896_v58 }
 0x4c4   : > { %3438 = vpow2.f32 %v2123_v44  ;;  %v2127_v32 = vmul.f32 1.442695, %v2045_v50  ;;  %v2129_v61 = vmul.f32 1.442695, %v2046_v29  ;;  %v2021_v50 = vmax.f32 %v4910_v18, %v4916_v24 }
 0x4c5   : > { %3440 = vpow2.f32 %v2125_v52  ;;  %2235 = vadd.xlane.f32.xlu1 %v2234_v54 }
 0x4c6   : > { %v4902_v6 = vpop.eup %3430  ;;  %3442 = vpow2.f32 %v2127_v32  ;;  %2016 = vmax.xlane.f32.xlu0 %v2015_v19 }
 0x4c7   : > { %v4904_v33 = vpop.eup %3432  ;;  %3444 = vpow2.f32 %v2129_v61  ;;  %v1963_v49 = vpop.xlane.xlu0 %1962 }
 0x4c8   : > { %v4912_v3 = vpop.eup %3434  ;;  %v2047_v51 = vsub.f32 %v4653_v63, %v1963_v49  ;;  %v2048_v21 = vsub.f32 %v4656_v11, %v1963_v49  ;;  %v2237_v53 = vadd.f32 %v4904_v33, %v4902_v6  ;;  %v4932_v63 = vadd.f32 %v4786_v60, %v4570_v28 }
 0x4c9   : > { %v4922_v41 = vpop.eup %3436  ;;  %2019 = vmax.xlane.f32.xlu1 %v2018_v55  ;;  %v1966_v2 = vpop.xlane.xlu1 %1965 }
 0x4ca   : > { %v2131_v57 = vmul.f32 1.442695, %v2047_v51  ;;  %v2133_v23 = vmul.f32 1.442695, %v2048_v21  ;;  %v2049_v44 = vsub.f32 %v4659_v4, %v1966_v2  ;;  %v2050_v52 = vsub.f32 %v4662_v20, %v1966_v2  ;;  %2238 = vadd.xlane.f32.xlu0 %v2237_v53 }
 0x4cb   : > { %v2240_v11 = vadd.f32 %v4922_v41, %v4912_v3  ;;  %v2024_v60 = vmax.f32 %v4928_v38, %v4932_v63 }
 0x4cc   : > { %3446 = vpow2.f32 %v2131_v57  ;;  %v2135_v29 = vmul.f32 1.442695, %v2049_v44  ;;  %v2137_v4 = vmul.f32 1.442695, %v2050_v52 }
 0x4cd   : > { %3448 = vpow2.f32 %v2133_v23  ;;  %2241 = vadd.xlane.f32.xlu1 %v2240_v11 }
 0x4ce   : > { %v4938_v20 = vpop.eup %3438  ;;  %3450 = vpow2.f32 %v2135_v29  ;;  %2022 = vmax.xlane.f32.xlu0 %v2021_v50 }
 0x4cf   : > { %v4940_v30 = vpop.eup %3440  ;;  %3452 = vpow2.f32 %v2137_v4  ;;  %v1969_v14 = vpop.xlane.xlu0 %1968 }
 0x4d0   : > { %v4944_v28 = vpop.eup %3442  ;;  %v2051_v54 = vsub.f32 %v4669_v34, %v1969_v14  ;;  %v2052_v19 = vsub.f32 %v4672_v5, %v1969_v14  ;;  %v2243_v32 = vadd.f32 %v4940_v30, %v4938_v20 }
 0x4d1   : > { %v4950_v61 = vpop.eup %3444  ;;  %2025 = vmax.xlane.f32.xlu1 %v2024_v60  ;;  %v1972_v55 = vpop.xlane.xlu1 %1971 }
 0x4d2   : > { %v2139_v49 = vmul.f32 1.442695, %v2051_v54  ;;  %v2141_v51 = vmul.f32 1.442695, %v2052_v19  ;;  %v2053_v21 = vsub.f32 %v4675_v9, %v1972_v55  ;;  %v2054_v53 = vsub.f32 %v4678_v13, %v1972_v55  ;;  %2244 = vadd.xlane.f32.xlu0 %v2243_v32 }
 0x4d3   : > { %v2246_v2 = vadd.f32 %v4950_v61, %v4944_v28 }
 0x4d4   : > { %3454 = vpow2.f32 %v2139_v49  ;;  %v2143_v34 = vmul.f32 1.442695, %v2053_v21  ;;  %v2145_v5 = vmul.f32 1.442695, %v2054_v53 }
 0x4d5   : > { %3456 = vpow2.f32 %v2141_v51  ;;  %2247 = vadd.xlane.f32.xlu1 %v2246_v2 }
 0x4d6   : > { %v4956_v57 = vpop.eup %3446  ;;  %3458 = vpow2.f32 %v2143_v34 }
 0x4d7   : > { %v4958_v23 = vpop.eup %3448  ;;  %3460 = vpow2.f32 %v2145_v5  ;;  %v1975_v44 = vpop.xlane.xlu0 %1974 }
 0x4d8   : > { %v4960_v52 = vpop.eup %3450  ;;  %v2055_v9 = vsub.f32 %v4685_v56, %v1975_v44  ;;  %v2056_v13 = vsub.f32 %v4688_v12, %v1975_v44  ;;  %v2249_v11 = vadd.f32 %v4958_v23, %v4956_v57 }
 0x4d9   : > { %v4966_v50 = vpop.eup %3452  ;;  %v1978_v29 = vpop.xlane.xlu1 %1977 }
 0x4da   : > { %v2147_v4 = vmul.f32 1.442695, %v2055_v9  ;;  %v2149_v60 = vmul.f32 1.442695, %v2056_v13  ;;  %v2057_v14 = vsub.f32 %v4691_v46, %v1978_v29  ;;  %v2058_v54 = vsub.f32 %v4696_v31, %v1978_v29  ;;  %2250 = vadd.xlane.f32.xlu0 %v2249_v11  ;;  %v5477_v46 = vld [vmem:[#allocation24_spill] sm:$0xff]  ;;  %v5478_v9 = vld [vmem:[#allocation25_spill] sm:$0xff] }
 0x4db   : > { %v2252_v19 = vadd.f32 %v4966_v50, %v4960_v52  ;;  %v5479_v11 = vld [vmem:[#allocation26_spill] sm:$0xff] }
 0x4dc   : > { %3462 = vpow2.f32 %v2147_v4  ;;  %v2151_v56 = vmul.f32 1.442695, %v2057_v14  ;;  %v2153_v32 = vmul.f32 1.442695, %v2058_v54 }
 0x4dd   : > { %3464 = vpow2.f32 %v2149_v60  ;;  %2253 = vadd.xlane.f32.xlu1 %v2252_v19 }
 0x4de   : > { %v4972_v12 = vpop.eup %3454  ;;  %3466 = vpow2.f32 %v2151_v56 }
 0x4df   : > { %v4974_v55 = vpop.eup %3456  ;;  %3468 = vpow2.f32 %v2153_v32  ;;  %v1981_v49 = vpop.xlane.xlu0 %1980  ;;  %v5482_v32 = vld [vmem:[#allocation27_spill] sm:$0xff] }
 0x4e0   : > { %v4976_v51 = vpop.eup %3458  ;;  %v2059_v31 = vsub.f32 %v4701_v40, %v1981_v49  ;;  %v2060_v21 = vsub.f32 %v5477_v46, %v1981_v49  ;;  %v2255_v53 = vadd.f32 %v4974_v55, %v4972_v12 }
 0x4e1   : > { %v4982_v2 = vpop.eup %3460  ;;  %v1984_v34 = vpop.xlane.xlu1 %1983 }
 0x4e2   : > { %v2155_v5 = vmul.f32 1.442695, %v2059_v31  ;;  %v2157_v44 = vmul.f32 1.442695, %v2060_v21  ;;  %v2061_v13 = vsub.f32 %v5478_v9, %v1984_v34  ;;  %v2062_v29 = vsub.f32 %v5479_v11, %v1984_v34  ;;  %2256 = vadd.xlane.f32.xlu0 %v2255_v53  ;;  %v5483_v31 = vld [vmem:[#allocation28_spill] sm:$0xff]  ;;  %v5485_v9 = vld [vmem:[#allocation29_spill] sm:$0xff] }
 0x4e3   : > { %v2258_v4 = vadd.f32 %v4982_v2, %v4976_v51  ;;  %v5486_v11 = vld [vmem:[#allocation30_spill] sm:$0xff] }
 0x4e4   : > { %3470 = vpow2.f32 %v2155_v5  ;;  %v2159_v40 = vmul.f32 1.442695, %v2061_v13  ;;  %v2161_v60 = vmul.f32 1.442695, %v2062_v29 }
 0x4e5   : > { %3472 = vpow2.f32 %v2157_v44  ;;  %2259 = vadd.xlane.f32.xlu1 %v2258_v4 }
 0x4e6   : > { %v4988_v14 = vpop.eup %3462  ;;  %3474 = vpow2.f32 %v2159_v40 }
 0x4e7   : > { %5480 = vst [vmem:[#allocation24_spill] sm:$0xff] %v4988_v14  ;;  %v4990_v54 = vpop.eup %3464  ;;  %3476 = vpow2.f32 %v2161_v60  ;;  %v1987_v19 = vpop.xlane.xlu0 %1986 }
 0x4e8   : > { %v4992_v56 = vpop.eup %3466  ;;  %v2063_v49 = vsub.f32 %v5482_v32, %v1987_v19  ;;  %v2064_v46 = vsub.f32 %v5483_v31, %v1987_v19  ;;  %v2261_v21 = vadd.f32 %v4990_v54, %v4988_v14  ;;  %v5494_v14 = vld [vmem:[#allocation34_spill] sm:$0xff] }
 0x4e9   : > { %5481 = vst [vmem:[#allocation25_spill] sm:$0xff] %v4992_v56  ;;  %v4998_v53 = vpop.eup %3468  ;;  %v1990_v34 = vpop.xlane.xlu1 %1989 }
 0x4ea   : > { %5484 = vst [vmem:[#allocation26_spill] sm:$0xff] %v4998_v53  ;;  %v2163_v5 = vmul.f32 1.442695, %v2063_v49  ;;  %v2165_v44 = vmul.f32 1.442695, %v2064_v46  ;;  %v2065_v13 = vsub.f32 %v5485_v9, %v1990_v34  ;;  %v2066_v29 = vsub.f32 %v5486_v11, %v1990_v34  ;;  %2262 = vadd.xlane.f32.xlu0 %v2261_v21  ;;  %v5490_v46 = vld [vmem:[#allocation31_spill] sm:$0xff] }
 0x4eb   : > { %v2264_v4 = vadd.f32 %v4998_v53, %v4992_v56  ;;  %v5491_v21 = vld [vmem:[#allocation32_spill] sm:$0xff] }
 0x4ec   : > { %3478 = vpow2.f32 %v2163_v5  ;;  %v2167_v40 = vmul.f32 1.442695, %v2065_v13  ;;  %v2169_v60 = vmul.f32 1.442695, %v2066_v29 }
 0x4ed   : > { %3480 = vpow2.f32 %v2165_v44  ;;  %2265 = vadd.xlane.f32.xlu1 %v2264_v4  ;;  %v5493_v4 = vld [vmem:[#allocation33_spill] sm:$0xff] }
 0x4ee   : > { %v5004_v19 = vpop.eup %3470  ;;  %3482 = vpow2.f32 %v2167_v40 }
 0x4ef   : > { %5487 = vst [vmem:[#allocation27_spill] sm:$0xff] %v5004_v19  ;;  %v5006_v32 = vpop.eup %3472  ;;  %3484 = vpow2.f32 %v2169_v60  ;;  %v1993_v49 = vpop.xlane.xlu0 %1992 }
 0x4f0   : > { %5488 = vst [vmem:[#allocation28_spill] sm:$0xff] %v5006_v32  ;;  %v5008_v31 = vpop.eup %3474  ;;  %v2067_v34 = vsub.f32 %v5490_v46, %v1993_v49  ;;  %v2068_v9 = vsub.f32 %v5491_v21, %v1993_v49  ;;  %v2267_v5 = vadd.f32 %v5006_v32, %v5004_v19  ;;  %v5497_v19 = vld [vmem:[#allocation37_spill] sm:$0xff] }
 0x4f1   : > { %5489 = vst [vmem:[#allocation29_spill] sm:$0xff] %v5008_v31  ;;  %v5014_v13 = vpop.eup %3476  ;;  %v1996_v44 = vpop.xlane.xlu1 %1995 }
 0x4f2   : > { %5492 = vst [vmem:[#allocation30_spill] sm:$0xff] %v5014_v13  ;;  %v2171_v11 = vmul.f32 1.442695, %v2067_v34  ;;  %v2173_v29 = vmul.f32 1.442695, %v2068_v9  ;;  %v2069_v40 = vsub.f32 %v5493_v4, %v1996_v44  ;;  %v2070_v56 = vsub.f32 %v5494_v14, %v1996_v44  ;;  %2268 = vadd.xlane.f32.xlu0 %v2267_v5  ;;  %v5495_v4 = vld [vmem:[#allocation35_spill] sm:$0xff] }
 0x4f3   : > { %v2270_v60 = vadd.f32 %v5014_v13, %v5008_v31  ;;  %v5496_v5 = vld [vmem:[#allocation36_spill] sm:$0xff]  ;;  %v5498_v31 = vld [vmem:[#allocation38_spill] sm:$0xff] }
 0x4f4   : > { %3486 = vpow2.f32 %v2171_v11  ;;  %v2175_v46 = vmul.f32 1.442695, %v2069_v40  ;;  %v2177_v53 = vmul.f32 1.442695, %v2070_v56 }
 0x4f5   : > { %3488 = vpow2.f32 %v2173_v29  ;;  %2271 = vadd.xlane.f32.xlu1 %v2270_v60 }
 0x4f6   : > { %v5020_v49 = vpop.eup %3478  ;;  %3490 = vpow2.f32 %v2175_v46 }
 0x4f7   : > { %v5022_v21 = vpop.eup %3480  ;;  %3492 = vpow2.f32 %v2177_v53  ;;  %v1999_v34 = vpop.xlane.xlu0 %1998 }
 0x4f8   : > { %v5024_v9 = vpop.eup %3482  ;;  %v2071_v14 = vsub.f32 %v5495_v4, %v1999_v34  ;;  %v2072_v44 = vsub.f32 %v5496_v5, %v1999_v34  ;;  %v2273_v11 = vadd.f32 %v5022_v21, %v5020_v49 }
 0x4f9   : > { %v5030_v40 = vpop.eup %3484  ;;  %v2002_v56 = vpop.xlane.xlu1 %2001 }
 0x4fa   : > { %v2179_v29 = vmul.f32 1.442695, %v2071_v14  ;;  %v2181_v60 = vmul.f32 1.442695, %v2072_v44  ;;  %v2073_v46 = vsub.f32 %v5497_v19, %v2002_v56  ;;  %v2074_v13 = vsub.f32 %v5498_v31, %v2002_v56  ;;  %2274 = vadd.xlane.f32.xlu0 %v2273_v11 }
 0x4fb   : > { %v2276_v53 = vadd.f32 %v5030_v40, %v5024_v9 }
 0x4fc   : > { %3494 = vpow2.f32 %v2179_v29  ;;  %v2183_v4 = vmul.f32 1.442695, %v2073_v46  ;;  %v2185_v32 = vmul.f32 1.442695, %v2074_v13 }
 0x4fd   : > { %3496 = vpow2.f32 %v2181_v60  ;;  %2277 = vadd.xlane.f32.xlu1 %v2276_v53 }
 0x4fe   : > { %v5036_v34 = vpop.eup %3486  ;;  %3498 = vpow2.f32 %v2183_v4 }
 0x4ff   : > { %5499 = vst [vmem:[#allocation31_spill] sm:$0xff] %v5036_v34  ;;  %v5038_v5 = vpop.eup %3488  ;;  %3500 = vpow2.f32 %v2185_v32 }
 0x500   : > { %v5040_v14 = vpop.eup %3490  ;;  %v2279_v19 = vadd.f32 %v5038_v5, %v5036_v34 }
 0x501   : > { %5500 = vst [vmem:[#allocation32_spill] sm:$0xff] %v5040_v14  ;;  %v5044_v31 = vpop.eup %3492 }
 0x502   : > { %5501 = vst [vmem:[#allocation33_spill] sm:$0xff] %v5044_v31  ;;  %2280 = vadd.xlane.f32.xlu0 %v2279_v19  ;;  %v2282_v44 = vadd.f32 %v5044_v31, %v5040_v14 }
 0x504   : > { %2283 = vadd.xlane.f32.xlu1 %v2282_v44 }
 0x506   : > { %v5048_v13 = vpop.eup %3494 }
 0x507   : > { %5502 = vst [vmem:[#allocation34_spill] sm:$0xff] %v5048_v13  ;;  %v5050_v11 = vpop.eup %3496 }
 0x508   : > { %5503 = vst [vmem:[#allocation35_spill] sm:$0xff] %v5050_v11  ;;  %v5052_v56 = vpop.eup %3498  ;;  %v2285_v32 = vadd.f32 %v5050_v11, %v5048_v13 }
 0x509   : > { %5504 = vst [vmem:[#allocation36_spill] sm:$0xff] %v5052_v56  ;;  %v5056_v29 = vpop.eup %3500 }
 0x50a   : > { %5505 = vst [vmem:[#allocation37_spill] sm:$0xff] %v5056_v29  ;;  %2286 = vadd.xlane.f32.xlu0 %v2285_v32  ;;  %v2288_v60 = vadd.f32 %v5056_v29, %v5052_v56 }
 0x50c   : > { %2289 = vadd.xlane.f32.xlu1 %v2288_v60 }
 0x53f   : > { %v2221_v46 = vpop.xlane.xlu0 %2220 }
 0x540   : > { %3502 = vrcp.f32 %v2221_v46 }
 0x542   : > { %v2224_v53 = vpop.xlane.xlu1 %2223 }
 0x543   : > { %3504 = vrcp.f32 %v2224_v53  ;;  %v2005_v4 = vpop.xlane.xlu0 %2004 }
 0x544   : > { %v2075_v19 = vsub.f32 %v4805_v48, %v2005_v4  ;;  %v2076_v44 = vsub.f32 %v4810_v47, %v2005_v4 }
 0x546   : > { %v2187_v34 = vmul.f32 1.442695, %v2075_v19  ;;  %v2189_v14 = vmul.f32 1.442695, %v2076_v44  ;;  %v2008_v31 = vpop.xlane.xlu1 %2007 }
 0x547   : > { %v2077_v13 = vsub.f32 %v4821_v42, %v2008_v31  ;;  %v2078_v32 = vsub.f32 %v4824_v8, %v2008_v31  ;;  %v2227_v11 = vpop.xlane.xlu0 %2226 }
 0x548   : > { %3506 = vpow2.f32 %v2187_v34 }
 0x549   : > { %3508 = vpow2.f32 %v2189_v14  ;;  %v2191_v60 = vmul.f32 1.442695, %v2077_v13  ;;  %v2193_v56 = vmul.f32 1.442695, %v2078_v32 }
 0x54a   : > { %v3503_v46 = vpop.eup %3502  ;;  %3510 = vrcp.f32 %v2227_v11  ;;  %v2230_v53 = vpop.xlane.xlu1 %2229 }
 0x54b   : > { %3512 = vpow2.f32 %v2191_v60  ;;  %v2011_v29 = vpop.xlane.xlu0 %2010  ;;  %v2348_v42 = vmul.f32 %v3503_v46, %v4802_v17  ;;  %v2347_v8 = vmul.f32 %v3503_v46, %v4800_v59 }
 0x54c   : > { %3514 = vpow2.f32 %v2193_v56  ;;  %v2079_v48 = vsub.f32 %v4838_v43, %v2011_v29  ;;  %v2080_v47 = vsub.f32 %v4844_v45, %v2011_v29 }
 0x54d   : > { %v3505_v4 = vpop.eup %3504  ;;  %3516 = vrcp.f32 %v2230_v53 }
 0x54e   : > { %v2195_v34 = vmul.f32 1.442695, %v2079_v48  ;;  %v2197_v14 = vmul.f32 1.442695, %v2080_v47  ;;  %v2014_v31 = vpop.xlane.xlu1 %2013  ;;  %v2350_v13 = vmul.f32 %v3505_v4, %v4816_v10  ;;  %v2349_v11 = vmul.f32 %v3505_v4, %v4807_v22 }
 0x54f   : > { %v2081_v19 = vsub.f32 %v4856_v7, %v2014_v31  ;;  %v2082_v56 = vsub.f32 %v4860_v15, %v2014_v31  ;;  %v2233_v43 = vpop.xlane.xlu0 %2232 }
 0x550   : > { %3518 = vpow2.f32 %v2195_v34  ;;  %v2412_v45 = vpack.c.bf16 %v2350_v13, %v2348_v42  ;;  %v2411_v29 = vpack.c.bf16 %v2349_v11, %v2347_v8 }
 0x551   : > { %3520 = vpow2.f32 %v2197_v14  ;;  %v2199_v44 = vmul.f32 1.442695, %v2081_v19  ;;  %v2201_v17 = vmul.f32 1.442695, %v2082_v56 }
 0x552   : > { %v5072_v32 = vpop.eup %3506  ;;  %3522 = vrcp.f32 %v2233_v43  ;;  %v2236_v59 = vpop.xlane.xlu1 %2235  ;;  %2510 = vmatprep.subr.bf16.mxu0 %v2412_v45 }
 0x553   : > { %v5074_v60 = vpop.eup %3508  ;;  %3524 = vpow2.f32 %v2199_v44  ;;  %2511 = vmatpush1.bf16.xpose.msra.mxu0 %v2411_v29  ;;  %v2017_v22 = vpop.xlane.xlu0 %2016 }
 0x554   : > { %v3511_v10 = vpop.eup %3510  ;;  %3526 = vpow2.f32 %v2201_v17  ;;  %v2083_v7 = vsub.f32 %v4874_v25, %v2017_v22  ;;  %v2084_v15 = vsub.f32 %v4880_v16, %v2017_v22  ;;  %v2291_v46 = vadd.f32 %v5074_v60, %v5072_v32 }
 0x555   : > { %v5080_v53 = vpop.eup %3512  ;;  %3528 = vrcp.f32 %v2236_v59  ;;  %v2352_v31 = vmul.f32 %v3511_v10, %v4832_v0  ;;  %v2351_v11 = vmul.f32 %v3511_v10, %v4830_v1 }
 0x556   : > { %v5082_v48 = vpop.eup %3514  ;;  %v2203_v47 = vmul.f32 1.442695, %v2083_v7  ;;  %v2205_v4 = vmul.f32 1.442695, %v2084_v15  ;;  %v2020_v42 = vpop.xlane.xlu1 %2019  ;;  %2292 = vadd.xlane.f32.xlu0 %v2291_v46 }
 0x557   : > { %v3517_v8 = vpop.eup %3516  ;;  %v2085_v34 = vsub.f32 %v4892_v36, %v2020_v42  ;;  %v2086_v14 = vsub.f32 %v4896_v58, %v2020_v42  ;;  %v2294_v25 = vadd.f32 %v5082_v48, %v5080_v53  ;;  %v2239_v16 = vpop.xlane.xlu0 %2238 }
 0x558   : > { %3530 = vpow2.f32 %v2203_v47  ;;  %v2354_v13 = vmul.f32 %v3517_v8, %v4850_v62  ;;  %v2353_v19 = vmul.f32 %v3517_v8, %v4840_v26 }
 0x559   : > { %3532 = vpow2.f32 %v2205_v4  ;;  %v2207_v56 = vmul.f32 1.442695, %v2085_v34  ;;  %v2209_v43 = vmul.f32 1.442695, %v2086_v14  ;;  %2295 = vadd.xlane.f32.xlu1 %v2294_v25 }
 0x55a   : > { %v5092_v36 = vpop.eup %3518  ;;  %3534 = vrcp.f32 %v2239_v16  ;;  %v2242_v58 = vpop.xlane.xlu1 %2241  ;;  %v2414_v45 = vpack.c.bf16 %v2354_v13, %v2352_v31  ;;  %v2413_v29 = vpack.c.bf16 %v2353_v19, %v2351_v11 }
 0x55b   : > { %v5094_v44 = vpop.eup %3520  ;;  %3536 = vpow2.f32 %v2207_v56  ;;  %v2023_v0 = vpop.xlane.xlu0 %2022 }
 0x55c   : > { %v3523_v17 = vpop.eup %3522  ;;  %3538 = vpow2.f32 %v2209_v43  ;;  %2512 = vmatprep.subr.bf16.mxu0 %v2414_v45  ;;  %v2087_v1 = vsub.f32 %v4910_v18, %v2023_v0  ;;  %v2088_v26 = vsub.f32 %v4916_v24, %v2023_v0  ;;  %v2297_v62 = vadd.f32 %v5094_v44, %v5092_v36 }
 0x55d   : > { %v5100_v59 = vpop.eup %3524  ;;  %3540 = vrcp.f32 %v2242_v58  ;;  %2513 = vmatpush1.bf16.xpose.msra.mxu0 %v2413_v29  ;;  %v2356_v42 = vmul.f32 %v3523_v17, %v4868_v37  ;;  %v2355_v34 = vmul.f32 %v3523_v17, %v4866_v39 }
 0x55e   : > { %v5102_v22 = vpop.eup %3526  ;;  %v2211_v10 = vmul.f32 1.442695, %v2087_v1  ;;  %v2213_v7 = vmul.f32 1.442695, %v2088_v26  ;;  %v2026_v15 = vpop.xlane.xlu1 %2025  ;;  %2298 = vadd.xlane.f32.xlu0 %v2297_v62 }
 0x55f   : > { %v3529_v46 = vpop.eup %3528  ;;  %v2089_v47 = vsub.f32 %v4928_v38, %v2026_v15  ;;  %v2090_v18 = vsub.f32 %v4932_v63, %v2026_v15  ;;  %v2300_v24 = vadd.f32 %v5102_v22, %v5100_v59  ;;  %v2245_v4 = vpop.xlane.xlu0 %2244 }
 0x560   : > { %3542 = vpow2.f32 %v2211_v10  ;;  %v2358_v8 = vmul.f32 %v3529_v46, %v4886_v35  ;;  %v2357_v14 = vmul.f32 %v3529_v46, %v4876_v27 }
 0x561   : > { %3544 = vpow2.f32 %v2213_v7  ;;  %v2215_v25 = vmul.f32 1.442695, %v2089_v47  ;;  %v2217_v16 = vmul.f32 1.442695, %v2090_v18  ;;  %2301 = vadd.xlane.f32.xlu1 %v2300_v24 }
 0x562   : > { %v5112_v38 = vpop.eup %3530  ;;  %3546 = vrcp.f32 %v2245_v4  ;;  %v2248_v63 = vpop.xlane.xlu1 %2247  ;;  %v2416_v31 = vpack.c.bf16 %v2358_v8, %v2356_v42  ;;  %v2415_v13 = vpack.c.bf16 %v2357_v14, %v2355_v34 }
 0x563   : > { %v5114_v11 = vpop.eup %3532  ;;  %3548 = vpow2.f32 %v2215_v25 }
 0x564   : > { %v3535_v37 = vpop.eup %3534  ;;  %3550 = vpow2.f32 %v2217_v16  ;;  %2514 = vmatprep.subr.bf16.mxu0 %v2416_v31  ;;  %v2303_v39 = vadd.f32 %v5114_v11, %v5112_v38 }
 0x565   : > { %v5118_v27 = vpop.eup %3536  ;;  %3552 = vrcp.f32 %v2248_v63  ;;  %2515 = vmatpush1.bf16.xpose.msra.mxu0 %v2415_v13  ;;  %v2360_v58 = vmul.f32 %v3535_v37, %v4904_v33  ;;  %v2359_v29 = vmul.f32 %v3535_v37, %v4902_v6 }
 0x566   : > { %v5120_v35 = vpop.eup %3538  ;;  %2304 = vadd.xlane.f32.xlu0 %v2303_v39 }
 0x567   : > { %v3541_v19 = vpop.eup %3540  ;;  %v2306_v56 = vadd.f32 %v5120_v35, %v5118_v27  ;;  %v2251_v43 = vpop.xlane.xlu0 %2250 }
 0x568   : > { %v2362_v45 = vmul.f32 %v3541_v19, %v4922_v41  ;;  %v2361_v0 = vmul.f32 %v3541_v19, %v4912_v3  ;;  %3554 = vrcp.f32 %v2251_v43  ;;  %v5155_v43 = vpop.f32.mrb[76].mxu1 }
 0x569   : > { %2307 = vadd.xlane.f32.xlu1 %v2306_v56 }
 0x56a   : > { %v5128_v17 = vpop.eup %3542  ;;  %v2254_v1 = vpop.xlane.xlu1 %2253  ;;  %v2418_v26 = vpack.c.bf16 %v2362_v45, %v2360_v58  ;;  %v2417_v62 = vpack.c.bf16 %v2361_v0, %v2359_v29 }
 0x56b   : > { %v5130_v10 = vpop.eup %3544  ;;  %3556 = vrcp.f32 %v2254_v1  ;;  %v5157_v45 = vpop.f32.mrb[77].mxu1 }
 0x56c   : > { %v3547_v7 = vpop.eup %3546  ;;  %2516 = vmatprep.subr.bf16.mxu0 %v2418_v26  ;;  %v2309_v33 = vadd.f32 %v5130_v10, %v5128_v17 }
 0x56d   : > { %v5134_v41 = vpop.eup %3548  ;;  %2517 = vmatpush1.bf16.xpose.msra.mxu0 %v2417_v62  ;;  %v2364_v47 = vmul.f32 %v3547_v7, %v4940_v30  ;;  %v2363_v24 = vmul.f32 %v3547_v7, %v4938_v20  ;;  %v5506_v62 = vld [vmem:[#allocation26_spill] sm:$0xff] }
 0x56e   : > { %v5136_v6 = vpop.eup %3550  ;;  %2310 = vadd.xlane.f32.xlu0 %v2309_v33  ;;  %v5507_v33 = vld [vmem:[#allocation25_spill] sm:$0xff] }
 0x56f   : > { %v3553_v3 = vpop.eup %3552  ;;  %v2312_v15 = vadd.f32 %v5136_v6, %v5134_v41  ;;  %v2257_v46 = vpop.xlane.xlu0 %2256 }
 0x570   : > { %v2366_v18 = vmul.f32 %v3553_v3, %v4950_v61  ;;  %v2365_v4 = vmul.f32 %v3553_v3, %v4944_v28  ;;  %3558 = vrcp.f32 %v2257_v46  ;;  %v5508_v46 = vld [vmem:[#allocation24_spill] sm:$0xff] }
 0x571   : > { %2313 = vadd.xlane.f32.xlu1 %v2312_v15 }
 0x572   : > { %v2260_v42 = vpop.xlane.xlu1 %2259  ;;  %v2420_v8 = vpack.c.bf16 %v2366_v18, %v2364_v47  ;;  %v2419_v34 = vpack.c.bf16 %v2365_v4, %v2363_v24  ;;  %v3555_v14 = vpop.eup %3554 }
 0x573   : > { %3560 = vrcp.f32 %v2260_v42  ;;  %v2368_v16 = vmul.f32 %v3555_v14, %v4958_v23  ;;  %v2367_v20 = vmul.f32 %v3555_v14, %v4956_v57  ;;  %v2446_v57 = vld [vmem:[%s5377_s8 + $0x8] sm:$0xff] }
 0x574   : > { %2518 = vmatprep.subr.bf16.mxu0 %v2420_v8 }
 0x575   : > { %v3557_v25 = vpop.eup %3556  ;;  %2519 = vmatpush1.bf16.xpose.msra.mxu0 %v2419_v34  ;;  %v5509_v34 = vld [vmem:[#allocation28_spill] sm:$0xff] }
 0x576   : > { %v2370_v30 = vmul.f32 %v3557_v25, %v4966_v50  ;;  %v2369_v61 = vmul.f32 %v3557_v25, %v4960_v52  ;;  %v5510_v25 = vld [vmem:[#allocation30_spill] sm:$0xff] }
 0x577   : > { %v2263_v63 = vpop.xlane.xlu0 %2262 }
 0x578   : > { %v2422_v28 = vpack.c.bf16 %v2370_v30, %v2368_v16  ;;  %3562 = vrcp.f32 %v2263_v63  ;;  %v2421_v31 = vpack.c.bf16 %v2369_v61, %v2367_v20  ;;  %v5511_v16 = vld [vmem:[#allocation29_spill] sm:$0xff]  ;;  %v5512_v63 = vld [vmem:[#allocation27_spill] sm:$0xff] }
 0x57a   : > { %v2266_v13 = vpop.xlane.xlu1 %2265  ;;  %2520 = vmatprep.subr.bf16.mxu0 %v2422_v28  ;;  %v3559_v37 = vpop.eup %3558 }
 0x57b   : > { %3564 = vrcp.f32 %v2266_v13  ;;  %v2372_v19 = vmul.f32 %v3559_v37, %v4974_v55  ;;  %v2371_v52 = vmul.f32 %v3559_v37, %v4972_v12  ;;  %v2445_v55 = vld [vmem:[%s5377_s8] sm:$0xff] }
 0x57d   : > { %v3561_v39 = vpop.eup %3560  ;;  %2521 = vmatpush1.bf16.xpose.msra.mxu0 %v2421_v31 }
 0x57e   : > { %v2374_v23 = vmul.f32 %v3561_v39, %v4982_v2  ;;  %v2373_v50 = vmul.f32 %v3561_v39, %v4976_v51  ;;  %v5162_v2 = vpop.f32.mrb[78].mxu1 }
 0x57f   : > { %v2269_v56 = vpop.xlane.xlu0 %2268  ;;  %v5164_v0 = vpop.f32.mrb[79].mxu1 }
 0x580   : > { %v2424_v58 = vpack.c.bf16 %v2374_v23, %v2372_v19  ;;  %3566 = vrcp.f32 %v2269_v56  ;;  %v2423_v29 = vpack.c.bf16 %v2373_v50, %v2371_v52 }
 0x582   : > { %2454 = vperm.xlu1 %3312, %v2446_v57   ;;  %v2272_v51 = vpop.xlane.xlu1 %2271  ;;  %2522 = vmatprep.subr.bf16.mxu0 %v2424_v58  ;;  %v3563_v1 = vpop.eup %3562 }
 0x583   : > { %3568 = vrcp.f32 %v2272_v51  ;;  %v2376_v26 = vmul.f32 %v3563_v1, %v4990_v54  ;;  %v2375_v47 = vmul.f32 %v3563_v1, %v5508_v46 }
 0x584   : > { %2449 = vperm.xlu0 %3311, %v2445_v55  }
 0x585   : > { %v3565_v12 = vpop.eup %3564  ;;  %2523 = vmatpush1.bf16.xpose.msra.mxu0 %v2423_v29 }
 0x586   : > { %v2378_v7 = vmul.f32 %v3565_v12, %v5506_v62  ;;  %v2377_v3 = vmul.f32 %v3565_v12, %v5507_v33  ;;  %v5513_v12 = vld [vmem:[#allocation33_spill] sm:$0xff] }
 0x587   : > { %v2275_v15 = vpop.xlane.xlu0 %2274 }
 0x588   : > { %v2426_v18 = vpack.c.bf16 %v2378_v7, %v2376_v26  ;;  %3570 = vrcp.f32 %v2275_v15  ;;  %v2425_v24 = vpack.c.bf16 %v2377_v3, %v2375_v47  ;;  %v5514_v26 = vld [vmem:[#allocation32_spill] sm:$0xff]  ;;  %v5516_v15 = vld [vmem:[#allocation35_spill] sm:$0xff]  ;;  %v5517_v47 = vld [vmem:[#allocation37_spill] sm:$0xff] }
 0x58a   : > { %v2278_v4 = vpop.xlane.xlu1 %2277  ;;  %2524 = vmatprep.subr.bf16.mxu0 %v2426_v18  ;;  %v3567_v42 = vpop.eup %3566 }
 0x58b   : > { %3572 = vrcp.f32 %v2278_v4  ;;  %v2380_v14 = vmul.f32 %v3567_v42, %v5509_v34  ;;  %v2379_v20 = vmul.f32 %v3567_v42, %v5512_v63 }
 0x58d   : > { %v3569_v8 = vpop.eup %3568  ;;  %2525 = vmatpush1.bf16.xpose.msra.mxu0 %v2425_v24  ;;  %v5518_v24 = vld [vmem:[#allocation36_spill] sm:$0xff] }
 0x58e   : > { %v2382_v54 = vmul.f32 %v3569_v8, %v5510_v25  ;;  %v2381_v30 = vmul.f32 %v3569_v8, %v5511_v16 }
 0x58f   : > { %v2281_v61 = vpop.xlane.xlu0 %2280 }
 0x590   : > { %3574 = vrcp.f32 %v2281_v61  ;;  %v2428_v28 = vpack.c.bf16 %v2382_v54, %v2380_v14  ;;  %v2427_v13 = vpack.c.bf16 %v2381_v30, %v2379_v20 }
 0x591   : > { %v2284_v31 = vpop.xlane.xlu1 %2283 }
 0x592   : > { %3576 = vrcp.f32 %v2284_v31  ;;  %2526 = vmatprep.subr.bf16.mxu0 %v2428_v28  ;;  %v3571_v37 = vpop.eup %3570 }
 0x593   : > { %v2384_v19 = vmul.f32 %v3571_v37, %v5022_v21  ;;  %v2383_v57 = vmul.f32 %v3571_v37, %v5020_v49 }
 0x595   : > { %v3573_v39 = vpop.eup %3572  ;;  %2527 = vmatpush1.bf16.xpose.msra.mxu0 %v2427_v13 }
 0x596   : > { %v2386_v23 = vmul.f32 %v3573_v39, %v5030_v40  ;;  %v2385_v50 = vmul.f32 %v3573_v39, %v5024_v9  ;;  %v5515_v9 = vld [vmem:[#allocation31_spill] sm:$0xff] }
 0x597   : > { %v2287_v56 = vpop.xlane.xlu0 %2286 }
 0x598   : > { %3578 = vrcp.f32 %v2287_v56  ;;  %v2430_v52 = vpack.c.bf16 %v2386_v23, %v2384_v19  ;;  %v2429_v29 = vpack.c.bf16 %v2385_v50, %v2383_v57 }
 0x599   : > { %v2290_v58 = vpop.xlane.xlu1 %2289 }
 0x59a   : > { %v3575_v55 = vpop.eup %3574  ;;  %3580 = vrcp.f32 %v2290_v58  ;;  %2528 = vmatprep.subr.bf16.mxu0 %v2430_v52 }
 0x59b   : > { %v2388_v1 = vmul.f32 %v3575_v55, %v5038_v5  ;;  %v2387_v7 = vmul.f32 %v3575_v55, %v5515_v9  ;;  %v5519_v5 = vld [vmem:[#allocation34_spill] sm:$0xff] }
 0x59c   : > { %v3577_v51 = vpop.eup %3576 }
 0x59d   : > { %2529 = vmatpush1.bf16.xpose.msra.mxu0 %v2429_v29  ;;  %v2390_v21 = vmul.f32 %v3577_v51, %v5513_v12  ;;  %v2389_v40 = vmul.f32 %v3577_v51, %v5514_v26 }
 0x59f   : > { %v2432_v62 = vpack.c.bf16 %v2390_v21, %v2388_v1  ;;  %v2431_v49 = vpack.c.bf16 %v2389_v40, %v2387_v7 }
 0x5a1   : > { %2530 = vmatprep.subr.bf16.mxu0 %v2432_v62 }
 0x5a2   : > { %v3579_v33 = vpop.eup %3578 }
 0x5a3   : > { %v2392_v46 = vmul.f32 %v3579_v33, %v5516_v15  ;;  %v2391_v8 = vmul.f32 %v3579_v33, %v5519_v5 }
 0x5a4   : > { %v3581_v3 = vpop.eup %3580 }
 0x5a5   : > { %2531 = vmatpush1.bf16.xpose.msra.mxu0 %v2431_v49  ;;  %v2394_v18 = vmul.f32 %v3581_v3, %v5517_v47  ;;  %v2393_v4 = vmul.f32 %v3581_v3, %v5518_v24 }
 0x5a7   : > { %v2434_v42 = vpack.c.bf16 %v2394_v18, %v2392_v46  ;;  %v2433_v34 = vpack.c.bf16 %v2393_v4, %v2391_v8 }
 0x5a9   : > { %2532 = vmatprep.subr.bf16.mxu0 %v2434_v42 }
 0x5ad   : > { %2533 = vmatpush1.bf16.xpose.msra.mxu0 %v2433_v34  ;;  %v5524_v34 = vld [vmem:[#allocation20_spill] sm:$0xff] }
 0x5e3   : > { %v2293_v14 = vpop.xlane.xlu0 %2292 }
 0x5e4   : > { %3582 = vrcp.f32 %v2293_v14  ;;  %v5525_v14 = vmax.f32 %v5524_v34, 0.0 }
 0x5e6   : > { %v2296_v25 = vpop.xlane.xlu1 %2295 }
 0x5e7   : > { %3584 = vrcp.f32 %v2296_v25 }
 0x5eb   : > { %v2299_v54 = vpop.xlane.xlu0 %2298 }
 0x5ec   : > { %3586 = vrcp.f32 %v2299_v54  ;;  %v5526_v54 = vld [vmem:[#allocation23_spill] sm:$0xff] }
 0x5ee   : > { %v2302_v16 = vpop.xlane.xlu1 %2301  ;;  %v3583_v30 = vpop.eup %3582 }
 0x5ef   : > { %3588 = vrcp.f32 %v2302_v16  ;;  %v2396_v63 = vmul.f32 %v3583_v30, %v5074_v60  ;;  %v2395_v28 = vmul.f32 %v3583_v30, %v5072_v32  ;;  %v5527_v16 = vmax.f32 %v5526_v54, 0.0 }
 0x5f1   : > { %v3585_v61 = vpop.eup %3584 }
 0x5f2   : > { %v2398_v20 = vmul.f32 %v3585_v61, %v5082_v48  ;;  %v2397_v31 = vmul.f32 %v3585_v61, %v5080_v53 }
 0x5f3   : > { %v2305_v13 = vpop.xlane.xlu0 %2304 }
 0x5f4   : > { %v2436_v37 = vpack.c.bf16 %v2398_v20, %v2396_v63  ;;  %v2435_v39 = vpack.c.bf16 %v2397_v31, %v2395_v28  ;;  %3590 = vrcp.f32 %v2305_v13  ;;  %v3402_v31 = vld [vmem:[%s5379_s10 + $0x4] ss:$8 sps:$4 sm:$0xff]  }
 0x5f5   : > { %v2750_v13 = vld [vmem:[%s5380_s11] sm:$0xff]  ;;  %2958 = vmatprep.mubr.msk.bf16.mxu1 %vm1556_vm9, %v3402_v31  ;;  %v5533_v31 = vld [vmem:[#allocation8_spill] sm:$0xff] }
 0x5f6   : > { %v2308_v19 = vpop.xlane.xlu1 %2307  ;;  %2534 = vmatprep.subr.bf16.mxu0 %v2436_v37  ;;  %v3587_v23 = vpop.eup %3586  ;;  %v2751_v37 = vld [vmem:[%s5380_s11 + $0x8] sm:$0xff] }
 0x5f7   : > { %3592 = vrcp.f32 %v2308_v19  ;;  %2535 = vmatpush1.bf16.xpose.msra.mxu0 %v2435_v39  ;;  %v2400_v56 = vmul.f32 %v3587_v23, %v5094_v44  ;;  %v2399_v48 = vmul.f32 %v3587_v23, %v5092_v36  ;;  %v2766_v39 = vld [vmem:[%s5381_s12] sm:$0xff]  ;;  %v2767_v19 = vld [vmem:[%s5381_s12 + $0x8] sm:$0xff] }
 0x5f8   : > { %v2790_v23 = vld [vmem:[%s5383_s14] sm:$0xff] }
 0x5f9   : > { %v3589_v50 = vpop.eup %3588 }
 0x5fa   : > { %v2402_v60 = vmul.f32 %v3589_v50, %v5102_v22  ;;  %v2401_v32 = vmul.f32 %v3589_v50, %v5100_v59  ;;  %v2791_v50 = vld [vmem:[%s5383_s14 + $0x8] sm:$0xff] }
 0x5fb   : > { %v2311_v57 = vpop.xlane.xlu0 %2310 }
 0x5fc   : > { %v2438_v53 = vpack.c.bf16 %v2402_v60, %v2400_v56  ;;  %v2437_v52 = vpack.c.bf16 %v2401_v32, %v2399_v48  ;;  %3594 = vrcp.f32 %v2311_v57 }
 0x5fe   : > { %v2314_v58 = vpop.xlane.xlu1 %2313  ;;  %2536 = vmatprep.subr.bf16.mxu0 %v2438_v53  ;;  %v3591_v29 = vpop.eup %3590 }
 0x5ff   : > { %3596 = vrcp.f32 %v2314_v58  ;;  %2537 = vmatpush1.bf16.xpose.msra.mxu0 %v2437_v52  ;;  %v2404_v1 = vmul.f32 %v3591_v29, %v5114_v11  ;;  %v2403_v22 = vmul.f32 %v3591_v29, %v5112_v38  ;;  %v5545_v52 = vmov 0  }
 0x601   : > { %v3593_v55 = vpop.eup %3592 }
 0x602   : > { %v2455_v51 = vpop.permute.xlu1 %2454  ;;  %v2406_v44 = vmul.f32 %v3593_v55, %v5120_v35  ;;  %v2405_v36 = vmul.f32 %v3593_v55, %v5118_v27 }
 0x603   : > { %v2504_v59 = vadd.f32 %v5162_v2, %v2455_v51  ;;  %v2506_v12 = vadd.f32 %v5164_v0, %v2455_v51  ;;  %v2450_v21 = vpop.permute.xlu0 %2449 }
 0x604   : > { %v2500_v26 = vadd.f32 %v5155_v43, %v2450_v21  ;;  %v2502_v40 = vadd.f32 %v5157_v45, %v2450_v21  ;;  %v2440_v62 = vpack.c.bf16 %v2406_v44, %v2404_v1  ;;  %v2439_v9 = vpack.c.bf16 %v2405_v36, %v2403_v22 }
 0x605   : > { %v2554_v45 = vstv %s2553_s9 }
 0x606   : > { %v2508_v7 = vpack.c.bf16 %v2504_v59, %v2500_v26  ;;  %v2509_v49 = vpack.c.bf16 %v2506_v12, %v2502_v40  ;;  %2538 = vmatprep.subr.bf16.mxu0 %v2440_v62  ;;  %v3595_v11 = vpop.eup %3594  ;;  %v5529_v40 = vld [vmem:[#allocation4_spill] sm:$0xff] }
 0x607   : > { %2539 = vmatpush1.bf16.xpose.msra.mxu0 %v2439_v9  ;;  %v2408_v27 = vmul.f32 %v3595_v11, %v5130_v10  ;;  %v2407_v2 = vmul.f32 %v3595_v11, %v5128_v17  ;;  %v5530_v9 = vld [vmem:[#allocation5_spill] sm:$0xff] }
 0x608   : > { %2542 = vmatprep.mubr.bf16.mxu0 %v2509_v49 }
 0x609   : > { %v3597_v38 = vpop.eup %3596 }
 0x60a   : > { %v2410_v35 = vmul.f32 %v3597_v38, %v5136_v6  ;;  %v2409_v0 = vmul.f32 %v3597_v38, %v5134_v41  ;;  %v5520_v6 = vld [vmem:[#allocation21_spill] sm:$0xff]  ;;  %v5522_v41 = vld [vmem:[#allocation22_spill] sm:$0xff] }
 0x60b   : > { %v5521_v42 = vmax.f32 %v5520_v6, 0.0  ;;  %v5523_v5 = vmax.f32 %v5522_v41, 0.0 }
 0x60c   : > { %v2442_v43 = vpack.c.bf16 %v2410_v35, %v2408_v27  ;;  %v2441_v33 = vpack.c.bf16 %v2409_v0, %v2407_v2 }
 0x60e   : > { %2540 = vmatprep.subr.bf16.mxu0 %v2442_v43 }
 0x60f   : > { %2541 = vmatpush1.bf16.xpose.msra.mxu0 %v2441_v33 }
 0x616   : > { %2543 = vmatmul.mubr.bf16.vlgmr.msra.gmra.mrb[4].mxu0 %v2508_v7 }
 0x6e9   : > { %v2544_v3 = vpop.f32.mrb[4].mxu0 }
 0x6ea   : > { %v2555_v15 = vmul.f32 %v2554_v45, %v2544_v3  ;;  %v2546_v46 = vpop.f32.mrb[5].mxu0 }
 0x6eb   : > { %v2556_v47 = vmul.f32 %v2554_v45, %v2546_v46  ;;  %v2548_v18 = vpop.f32.mrb[6].mxu0  ;;  %v5531_v46 = vld [vmem:[#allocation6_spill] sm:$0xff] }
 0x6ec   : > { %v2557_v24 = vmul.f32 %v2554_v45, %v2548_v18  ;;  %v2550_v10 = vpop.f32.mrb[7].mxu0  ;;  %v5208_v17 = vadd.f32 %v2555_v15, %v5521_v42  ;;  %v5532_v18 = vld [vmem:[#allocation7_spill] sm:$0xff] }
 0x6ed   : > { %v2558_v4 = vmul.f32 %v2554_v45, %v2550_v10  ;;  %v5216_v25 = vadd.f32 %v2556_v47, %v5525_v14 }
 0x6ee   : > { %v5212_v8 = vadd.f32 %v2557_v24, %v5523_v5 }
 0x6ef   : > { %v5220_v30 = vadd.f32 %v2558_v4, %v5527_v16 }
 0x6f0   : > { %v3313_v61 = vpack.i.bf16 %v5212_v8, %v5208_v17  ;;  %v2627_v28 = vpack.c.bf16 %v5212_v8, %v5208_v17 }
 0x6f1   : > { %v3333_v63 = vpack.i.bf16 %v5220_v30, %v5216_v25  ;;  %v2628_v20 = vpack.c.bf16 %v5220_v30, %v5216_v25 }
 0x6f2   : > { %3314 = vrot.lane.b32.xlu1 %v3313_v61, %s3606_s25 }
 0x6f3   : > { %3334 = vrot.lane.b32.xlu0 %v3333_v63, %s3606_s25 }
 0x6f6   : > { %3319 = vrot.lane.b32.xlu1 %v3313_v61, %s3607_s26 }
 0x6f7   : > { %3339 = vrot.lane.b32.xlu0 %v3333_v63, %s3607_s26 }
 0x6fa   : > { %3324 = vrot.lane.b32.xlu1 %v3313_v61, %s3608_s27 }
 0x6fb   : > { %3344 = vrot.lane.b32.xlu0 %v3333_v63, %s3608_s27 }
 0x6fe   : > { %3329 = vrot.lane.b32.xlu1 %v3313_v61, %s3609_s28 }
 0x6ff   : > { %3349 = vrot.lane.b32.xlu0 %v3333_v63, %s3609_s28 }
 0x702   : > { %3354 = vrot.lane.b32.xlu1 %v3313_v61, %s3610_s16 }
 0x703   : > { %3374 = vrot.lane.b32.xlu0 %v3333_v63, %s3610_s16  ;;  %s2964_s16 = sshll.u32 %s5547_s21, 5 }
 0x706   : > { %3359 = vrot.lane.b32.xlu1 %v3313_v61, %s3611_s17 }
 0x707   : > { %3379 = vrot.lane.b32.xlu0 %v3333_v63, %s3611_s17 }
 0x70a   : > { %3364 = vrot.lane.b32.xlu1 %v3313_v61, %s3612_s18 }
 0x70b   : > { %3384 = vrot.lane.b32.xlu0 %v3333_v63, %s3612_s18  ;;  %s495_s18 = scalar_lea.vmem %s5384_s15, %s2964_s16 }
 0x70e   : > { %3369 = vrot.lane.b32.xlu1 %v3313_v61, %s3614_s19 }
 0x70f   : > { %3389 = vrot.lane.b32.xlu0 %v3333_v63, %s3614_s19 }
 0x712   : > { %2754 = vperm.xlu1 %3312, %v2750_v13  }
 0x713   : > { %2759 = vperm.xlu0 %3311, %v2751_v37   ;;  %v5534_v37 = vld [vmem:[#allocation9_spill] sm:$0xff] }
 0x716   : > { %2770 = vperm.xlu1 %3312, %v2766_v39  }
 0x717   : > { %2775 = vperm.xlu0 %3311, %v2767_v19  }
 0x71a   : > { %2794 = vperm.xlu1 %3312, %v2790_v23  }
 0x71b   : > { %2799 = vperm.xlu0 %3311, %v2791_v50  }
 0x764   : > { %v3315_v56 = vpop.permute.xlu1 %3314 }
 0x765   : > { %v3317_v60 = vunpack.i.h.bf16 %v3315_v56  ;;  %v3316_v48 = vunpack.i.l.bf16 %v3315_v56  ;;  %v3335_v32 = vpop.permute.xlu0 %3334 }
 0x766   : > { %v3337_v57 = vunpack.i.h.bf16 %v3335_v32  ;;  %v3336_v53 = vunpack.i.l.bf16 %v3335_v32 }
 0x768   : > { %v2572_v58 = vsel %vm555_vm0, %v3317_v60, %v3337_v57  ;;  %v2574_v29 = vsel %vm555_vm0, %v3337_v57, %v3317_v60  ;;  %v2571_v55 = vsel %vm555_vm0, %v3316_v48, %v3336_v53  ;;  %v2573_v51 = vsel %vm555_vm0, %v3336_v53, %v3316_v48  ;;  %v3320_v1 = vpop.permute.xlu1 %3319 }
 0x769   : > { %v2575_v44 = vpack.c.bf16 %v2574_v29, %v2573_v51  ;;  %v3322_v22 = vunpack.i.h.bf16 %v3320_v1  ;;  %v3321_v36 = vunpack.i.l.bf16 %v3320_v1  ;;  %v3340_v59 = vpop.permute.xlu0 %3339  ;;  %v2576_v12 = vpack.c.bf16 %v2572_v58, %v2571_v55  ;;  %v5535_v51 = vld [vmem:[#allocation10_spill] sm:$0xff] }
 0x76a   : > { %v3342_v21 = vunpack.i.h.bf16 %v3340_v59  ;;  %v3341_v26 = vunpack.i.l.bf16 %v3340_v59 }
 0x76b   : > { %v2578_v62 = vmul.bf16 %v2576_v12, %v5529_v40  ;;  %v2577_v7 = vmul.bf16 %v2575_v44, %v5530_v9  ;;  %v5536_v44 = vld [vmem:[#allocation11_spill] sm:$0xff] }
 0x76c   : > { %v2588_v49 = vsel %vm657_vm1, %v3322_v22, %v3342_v21  ;;  %v2590_v11 = vsel %vm657_vm1, %v3342_v21, %v3322_v22  ;;  %v2587_v38 = vsel %vm657_vm1, %v3321_v36, %v3341_v26  ;;  %v2589_v27 = vsel %vm657_vm1, %v3341_v26, %v3321_v36  ;;  %v3325_v35 = vpop.permute.xlu1 %3324 }
 0x76d   : > { %v2591_v2 = vpack.c.bf16 %v2590_v11, %v2589_v27  ;;  %v3327_v0 = vunpack.i.h.bf16 %v3325_v35  ;;  %v3326_v43 = vunpack.i.l.bf16 %v3325_v35  ;;  %v3345_v33 = vpop.permute.xlu0 %3344  ;;  %2707 = vmatprep.subr.bf16.mxu1 %v2578_v62  ;;  %v2592_v45 = vpack.c.bf16 %v2588_v49, %v2587_v38 }
 0x76e   : > { %v3347_v3 = vunpack.i.h.bf16 %v3345_v33  ;;  %v3346_v15 = vunpack.i.l.bf16 %v3345_v33  ;;  %2708 = vmatpush1.bf16.msra.mxu1 %v2577_v7 }
 0x76f   : > { %v2594_v47 = vmul.bf16 %v2592_v45, %v5531_v46  ;;  %v2593_v24 = vmul.bf16 %v2591_v2, %v5532_v18  ;;  %v5538_v18 = vld [vmem:[#allocation13_spill] sm:$0xff] }
 0x770   : > { %v2604_v10 = vsel %vm759_vm2, %v3327_v0, %v3347_v3  ;;  %v2606_v4 = vsel %vm759_vm2, %v3347_v3, %v3327_v0  ;;  %v2603_v6 = vsel %vm759_vm2, %v3326_v43, %v3346_v15  ;;  %v2605_v42 = vsel %vm759_vm2, %v3346_v15, %v3326_v43  ;;  %v3330_v41 = vpop.permute.xlu1 %3329  ;;  %v5537_v15 = vld [vmem:[#allocation12_spill] sm:$0xff] }
 0x771   : > { %v2607_v5 = vpack.c.bf16 %v2606_v4, %v2605_v42  ;;  %v3332_v34 = vunpack.i.h.bf16 %v3330_v41  ;;  %v3331_v14 = vunpack.i.l.bf16 %v3330_v41  ;;  %v3350_v54 = vpop.permute.xlu0 %3349  ;;  %2709 = vmatprep.subr.bf16.mxu1 %v2594_v47  ;;  %v2608_v16 = vpack.c.bf16 %v2604_v10, %v2603_v6  ;;  %v5539_v41 = vld [vmem:[#allocation14_spill] sm:$0xff] }
 0x772   : > { %v3352_v61 = vunpack.i.h.bf16 %v3350_v54  ;;  %v3351_v63 = vunpack.i.l.bf16 %v3350_v54  ;;  %2710 = vmatpush1.bf16.msra.mxu1 %v2593_v24 }
 0x773   : > { %v2610_v13 = vmul.bf16 %v2608_v16, %v5533_v31  ;;  %v2609_v39 = vmul.bf16 %v2607_v5, %v5534_v37 }
 0x774   : > { %v2620_v19 = vsel %vm861_vm3, %v3332_v34, %v3352_v61  ;;  %v2622_v23 = vsel %vm861_vm3, %v3352_v61, %v3332_v34  ;;  %v2619_v50 = vsel %vm861_vm3, %v3331_v14, %v3351_v63  ;;  %v2621_v56 = vsel %vm861_vm3, %v3351_v63, %v3331_v14  ;;  %v3355_v60 = vpop.permute.xlu1 %3354 }
 0x775   : > { %v2623_v48 = vpack.c.bf16 %v2622_v23, %v2621_v56  ;;  %v3357_v32 = vunpack.i.h.bf16 %v3355_v60  ;;  %v3356_v57 = vunpack.i.l.bf16 %v3355_v60  ;;  %v3375_v53 = vpop.permute.xlu0 %3374  ;;  %2711 = vmatprep.subr.bf16.mxu1 %v2610_v13  ;;  %v2624_v58 = vpack.c.bf16 %v2620_v19, %v2619_v50  ;;  %v5540_v13 = vld [vmem:[#allocation15_spill] sm:$0xff]  ;;  %v5541_v23 = vld [vmem:[#allocation18_spill] sm:$0xff] }
 0x776   : > { %v3377_v29 = vunpack.i.h.bf16 %v3375_v53  ;;  %v3376_v55 = vunpack.i.l.bf16 %v3375_v53  ;;  %2712 = vmatpush1.bf16.msra.mxu1 %v2609_v39 }
 0x777   : > { %v2626_v1 = vmul.bf16 %v2624_v58, %v5535_v51  ;;  %v2625_v22 = vmul.bf16 %v2623_v48, %v5536_v44  ;;  %v5542_v48 = vld [vmem:[#allocation19_spill] sm:$0xff]  ;;  %v5544_v58 = vld [vmem:[#allocation17_spill] sm:$0xff] }
 0x778   : > { %v2638_v36 = vsel %vm971_vm4, %v3357_v32, %v3377_v29  ;;  %v2640_v59 = vsel %vm971_vm4, %v3377_v29, %v3357_v32  ;;  %v2637_v12 = vsel %vm971_vm4, %v3356_v57, %v3376_v55  ;;  %v2639_v21 = vsel %vm971_vm4, %v3376_v55, %v3356_v57  ;;  %v3360_v26 = vpop.permute.xlu1 %3359  ;;  %v5543_v57 = vld [vmem:[#allocation16_spill] sm:$0xff] }
 0x779   : > { %v3362_v40 = vunpack.i.h.bf16 %v3360_v26  ;;  %v3361_v62 = vunpack.i.l.bf16 %v3360_v26  ;;  %v3380_v9 = vpop.permute.xlu0 %3379  ;;  %2713 = vmatprep.subr.bf16.mxu1 %v2626_v1  ;;  %v2642_v7 = vpack.c.bf16 %v2640_v59, %v2639_v21  ;;  %v2641_v38 = vpack.c.bf16 %v2638_v36, %v2637_v12  ;;  %v3404_v55 = vld [vmem:[%s5379_s10] ss:$8 sps:$4 sm:$0xff]  }
 0x77a   : > { %v3382_v49 = vunpack.i.h.bf16 %v3380_v9  ;;  %v3381_v11 = vunpack.i.l.bf16 %v3380_v9  ;;  %2714 = vmatpush1.bf16.msra.mxu1 %v2625_v22 }
 0x77b   : > { %2715 = vmatprep.subr.bf16.mxu1 %v2628_v20  ;;  %v2644_v46 = vmul.bf16 %v2642_v7, %v5537_v15  ;;  %v2643_v24 = vmul.bf16 %v2641_v38, %v5538_v18 }
 0x77c   : > { %v2654_v27 = vsel %vm1073_vm5, %v3362_v40, %v3382_v49  ;;  %v2656_v35 = vsel %vm1073_vm5, %v3382_v49, %v3362_v40  ;;  %v2653_v2 = vsel %vm1073_vm5, %v3361_v62, %v3381_v11  ;;  %v2655_v0 = vsel %vm1073_vm5, %v3381_v11, %v3361_v62  ;;  %v3365_v43 = vpop.permute.xlu1 %3364 }
 0x77d   : > { %v3367_v33 = vunpack.i.h.bf16 %v3365_v43  ;;  %v3366_v45 = vunpack.i.l.bf16 %v3365_v43  ;;  %v3385_v3 = vpop.permute.xlu0 %3384  ;;  %v2658_v25 = vpack.c.bf16 %v2656_v35, %v2655_v0  ;;  %v2657_v47 = vpack.c.bf16 %v2654_v27, %v2653_v2 }
 0x77e   : > { %v3387_v30 = vunpack.i.h.bf16 %v3385_v3  ;;  %v3386_v20 = vunpack.i.l.bf16 %v3385_v3  ;;  %2716 = vmatpush1.bf16.msra.mxu1 %v2627_v28 }
 0x77f   : > { %2717 = vmatprep.subr.bf16.mxu1 %v2644_v46  ;;  %v2660_v5 = vmul.bf16 %v2658_v25, %v5539_v41  ;;  %v2659_v37 = vmul.bf16 %v2657_v47, %v5540_v13 }
 0x780   : > { %v2670_v10 = vsel %vm1175_vm7, %v3367_v33, %v3387_v30  ;;  %v2672_v4 = vsel %vm1175_vm7, %v3387_v30, %v3367_v33  ;;  %v2671_v6 = vsel %vm1175_vm7, %v3386_v20, %v3366_v45  ;;  %v3370_v42 = vpop.permute.xlu1 %3369  ;;  %v2669_v17 = vsel %vm1175_vm7, %v3366_v45, %v3386_v20  ;;  %v3405_v45 = vld [vmem:[%s5382_s13] sm:$0xff]  }
 0x781   : > { %v3372_v8 = vunpack.i.h.bf16 %v3370_v42  ;;  %v3371_v28 = vunpack.i.l.bf16 %v3370_v42  ;;  %v3390_v34 = vpop.permute.xlu0 %3389  ;;  %v2674_v14 = vpack.c.bf16 %v2672_v4, %v2671_v6  ;;  %v2673_v61 = vpack.c.bf16 %v2670_v10, %v2669_v17 }
 0x782   : > { %v3392_v54 = vunpack.i.h.bf16 %v3390_v34  ;;  %v3391_v16 = vunpack.i.l.bf16 %v3390_v34  ;;  %2718 = vmatpush1.bf16.msra.mxu1 %v2643_v24 }
 0x783   : > { %2719 = vmatprep.subr.bf16.mxu1 %v2660_v5  ;;  %v2676_v50 = vmul.bf16 %v2674_v14, %v5541_v23  ;;  %v2675_v32 = vmul.bf16 %v2673_v61, %v5542_v48 }
 0x784   : > { %v2688_v63 = vsel %vm1277_vm6, %v3392_v54, %v3372_v8  ;;  %v2687_v31 = vsel %vm1277_vm6, %v3391_v16, %v3371_v28  ;;  %v2686_v39 = vsel %vm1277_vm6, %v3372_v8, %v3392_v54  ;;  %v2685_v19 = vsel %vm1277_vm6, %v3371_v28, %v3391_v16 }
 0x785   : > { %v2690_v56 = vpack.c.bf16 %v2688_v63, %v2687_v31  ;;  %v2689_v60 = vpack.c.bf16 %v2686_v39, %v2685_v19 }
 0x786   : > { %2720 = vmatpush1.bf16.msra.mxu1 %v2659_v37 }
 0x787   : > { %2721 = vmatprep.subr.bf16.mxu1 %v2676_v50  ;;  %v2692_v53 = vmul.bf16 %v2690_v56, %v5543_v57  ;;  %v2691_v29 = vmul.bf16 %v2689_v60, %v5544_v58 }
 0x78a   : > { %2722 = vmatpush1.bf16.msra.mxu1 %v2675_v32 }
 0x78b   : > { %2723 = vmatprep.subr.bf16.mxu1 %v2692_v53 }
 0x78e   : > { %2724 = vmatpush1.bf16.msra.mxu1 %v2691_v29 }
 0x791   : > { %2740 = vmatmul.mubr.bf16.vlgmr.msra.gmra.mrb[80].mxu1 %v3404_v55  ;;  %v2755_v51 = vpop.permute.xlu1 %2754 }
 0x792   : > { %2842 = vmatprep.mubr.bf16.mxu1 %v5545_v52  ;;  %v2760_v1 = vpop.permute.xlu0 %2759 }
 0x795   : > { %v2771_v59 = vpop.permute.xlu1 %2770 }
 0x796   : > { %v2776_v9 = vpop.permute.xlu0 %2775 }
 0x799   : > { %v2795_v3 = vpop.permute.xlu1 %2794 }
 0x79a   : > { %v2800_v30 = vpop.permute.xlu0 %2799 }
 0x864   : > { %v2741_v44 = vpop.f32.mrb[80].mxu1 }
 0x865   : > { %v2762_v22 = vmul.f32 %v2755_v51, %v2741_v44  ;;  %v2743_v36 = vpop.f32.mrb[81].mxu1 }
 0x866   : > { %v2763_v12 = vmul.f32 %v2755_v51, %v2743_v36  ;;  %v2745_v21 = vpop.f32.mrb[82].mxu1 }
 0x867   : > { %v2778_v26 = vadd.f32 %v2771_v59, %v2762_v22  ;;  %v2764_v40 = vmul.f32 %v2760_v1, %v2745_v21  ;;  %v2747_v62 = vpop.f32.mrb[83].mxu1 }
 0x868   : > { %v2779_v7 = vadd.f32 %v2771_v59, %v2763_v12  ;;  %v2765_v49 = vmul.f32 %v2760_v1, %v2747_v62 }
 0x869   : > { %v2780_v11 = vadd.f32 %v2776_v9, %v2764_v40  ;;  %v2782_v27 = vmax.f32 %v2778_v26, 0.0 }
 0x86a   : > { %v2781_v38 = vadd.f32 %v2776_v9, %v2765_v49  ;;  %v2783_v2 = vmax.f32 %v2779_v7, 0.0 }
 0x86b   : > { %v2784_v35 = vmax.f32 %v2780_v11, 0.0 }
 0x86c   : > { %v2785_v0 = vmax.f32 %v2781_v38, 0.0 }
 0x86d   : > { %v2788_v43 = vpack.c.bf16 %v2784_v35, %v2782_v27 }
 0x86e   : > { %v2789_v33 = vpack.c.bf16 %v2785_v0, %v2783_v2 }
 0x870   : > { %2810 = vmatprep.subr.bf16.mxu1 %v2789_v33 }
 0x871   : > { %2811 = vmatpush1.bf16.msra.mxu1 %v2788_v43 }
 0x874   : > { %2960 = vmatmul.mubr.msk.bf16.vlgmr.msra.gmra.mrb[84].mxu1 %vm1556_vm9, %v3405_v45 }
 0x947   : > { %v2844_v15 = vpop.f32.mrb[84].mxu1 }
 0x948   : > { %v2845_v46 = vadd.f32 %v2844_v15, %v2795_v3  ;;  %v2846_v25 = vpop.f32.mrb[85].mxu1 }
 0x949   : > { %v2847_v20 = vadd.f32 %v2846_v25, %v2795_v3  ;;  %v2848_v47 = vpop.f32.mrb[86].mxu1 }
 0x94a   : > { %2853 = vst [vmem:[%s495_s18] sm:$0xff] %v2845_v46  ;;  %v2849_v18 = vadd.f32 %v2848_v47, %v2800_v30  ;;  %v2850_v24 = vpop.f32.mrb[87].mxu1 }
 0x94b   : > { %2854 = vst [vmem:[%s495_s18 + $0x8] sm:$0xff] %v2847_v20  ;;  %v2851_v10 = vadd.f32 %v2850_v24, %v2800_v30 }
 0x94c   : > { %2855 = vst [vmem:[%s495_s18 + $0x10] sm:$0xff] %v2849_v18 }
 0x94d   : > { %2856 = vst [vmem:[%s495_s18 + $0x18] sm:$0xff] %v2851_v10 }
 0x94e PF: > { %s26_s20 = sadd.s32 1, %s3604_s20  }
 0x94f   : > { %p23_p4 = scmp.ge.s32.totalorder %s26_s20, 4  }
 0x951   :  { %25 = sbr.rel (!%p23_p4) target bundleno = 2 (0x2), region = 110 }

</bundles_post_ra>
